<compile_context>
chip_gen: v7x
topology: tpu7x:2x2x1
jax: 0.10.0
libtpu: 0.0.40
codegen_flags: <defaults>
</compile_context>

<pallas_src>
import functools
import math

import jax
import jax.numpy as jnp
from jax.experimental import pallas as pl
from jax.experimental.pallas import tpu as pltpu


def _attention_kernel(q_ref, k_ref, v_ref,
                      wq_ref, bq_ref, wk_ref, bk_ref,
                      wv_ref, bv_ref, wo_ref, bo_ref,
                      out_ref,
                      *, bb, nq, nk, h, d_k, d_v, compute_dtype):
    f32 = jnp.float32
    rows_q = bb * nq
    dm_p = out_ref.shape[-1]

    # Q @ K^T per batch element within the block: contract d_k, batch over bb.
    score_dn = (((2,), (2,)), ((0,), (0,)))
    # P @ V: contract nk, batch over bb.
    pv_dn = (((2,), (1,)), ((0,), (0,)))

    acc = jnp.zeros((rows_q, dm_p), f32)

    for head in range(h):
        wq_h = wq_ref[head]                       # (dm_p, d_k)  compute_dtype
        wk_h = wk_ref[head]                       # (dm_p, d_k)
        wv_h = wv_ref[head]                       # (dm_p, d_v)
        wo_h = wo_ref[head]                       # (d_v, dm_p)

        # Per-head projections: dense 2-D MXU matmuls, f32 accumulation.
        # (1/sqrt(d_k) already folded into wq/bq.)
        q_h = jnp.dot(q_ref[...], wq_h, preferred_element_type=f32) + bq_ref[head]
        k_h = jnp.dot(k_ref[...], wk_h, preferred_element_type=f32) + bk_ref[head]
        v_h = jnp.dot(v_ref[...], wv_h, preferred_element_type=f32) + bv_ref[head]

        q3 = q_h.astype(compute_dtype).reshape(bb, nq, d_k)
        k3 = k_h.astype(compute_dtype).reshape(bb, nk, d_k)
        v3 = v_h.astype(compute_dtype).reshape(bb, nk, d_v)

        # Scores + softmax over keys (f32 math).
        s = jax.lax.dot_general(q3, k3, score_dn, preferred_element_type=f32)
        m = jnp.max(s, axis=-1, keepdims=True)
        e = jnp.exp(s - m)
        den = jnp.sum(e, axis=-1, keepdims=True)
        inv = pl.reciprocal(den, approx=True)     # EUP; restore accuracy below
        inv = inv * (2.0 - den * inv)             # one Newton step
        p = (e * inv).astype(compute_dtype)

        # Dropout == identity (eval mode).

        pv = jax.lax.dot_general(p, v3, pv_dn, preferred_element_type=f32)
        pv2 = pv.astype(compute_dtype).reshape(rows_q, d_v)

        # Fold this head's contribution straight into the output projection.
        acc = acc + jnp.dot(pv2, wo_h, preferred_element_type=f32)

    out_ref[...] = (acc + bo_ref[...]).astype(out_ref.dtype)


def _choose_block_bs(b_s, nq, nk, target_rows=512):
    """Largest batch block with aligned rows, preferring >=2 grid steps."""
    def ok(c):
        return b_s % c == 0 and (c * nq) % 8 == 0 and (c * nk) % 8 == 0

    upper = max(1, min(b_s, max(1, target_rows // max(nq, 1))))
    best = None
    for cand in range(upper, 0, -1):
        if ok(cand):
            best = cand
            break
    if best is None:
        return b_s                                 # single full block (8,128)-safe
    if best == b_s and b_s >= 2:
        for cand in range(b_s // 2, 0, -1):        # >=2 steps for v7x megacore
            if ok(cand):
                return cand
    return best


def scaled_dot_product_attention(queries, keys, values, params, *,
                                 h, d_k, d_v, block_bs=None,
                                 compute_dtype=jnp.bfloat16):
    b_s, nq, d_model = queries.shape
    nk = keys.shape[1]
    out_dtype = queries.dtype
    wq, bq, wk, bk, wv, bv, wo, bo = params

    # Fold the 1/sqrt(d_k) score scale into the Q projection (one-time, free).
    scale = jnp.asarray(1.0 / math.sqrt(d_k), wq.dtype)
    wq = wq * scale
    bq = bq * scale

    # Pad d_model to a multiple of 128 so activation loads and output stores
    # are lane-dense.  Exact: padded input columns hit zero weight rows; padded
    # output columns are zero and sliced off afterwards.
    dm_p = ((d_model + 127) // 128) * 128
    if dm_p != d_model:
        pad = dm_p - d_model
        queries = jnp.pad(queries, ((0, 0), (0, 0), (0, pad)))
        keys = jnp.pad(keys, ((0, 0), (0, 0), (0, pad)))
        values = jnp.pad(values, ((0, 0), (0, 0), (0, pad)))
        wq = jnp.pad(wq, ((0, pad), (0, 0)))
        wk = jnp.pad(wk, ((0, pad), (0, 0)))
        wv = jnp.pad(wv, ((0, pad), (0, 0)))
        wo = jnp.pad(wo, ((0, 0), (0, pad)))
        bo = jnp.pad(bo, ((0, 0), (0, pad)))

    # Pre-stack weights per head so the kernel never lane-slices sub-128 columns.
    wq_s = wq.reshape(dm_p, h, d_k).transpose(1, 0, 2).astype(compute_dtype)
    wk_s = wk.reshape(dm_p, h, d_k).transpose(1, 0, 2).astype(compute_dtype)
    wv_s = wv.reshape(dm_p, h, d_v).transpose(1, 0, 2).astype(compute_dtype)
    wo_s = wo.reshape(h, d_v, dm_p).astype(compute_dtype)
    bq_s = bq.reshape(h, 1, d_k).astype(jnp.float32)
    bk_s = bk.reshape(h, 1, d_k).astype(jnp.float32)
    bv_s = bv.reshape(h, 1, d_v).astype(jnp.float32)
    bo_s = bo.astype(jnp.float32)                         # (1, dm_p)

    # Flatten batch into rows: lane-dense 2-D activation blocks.
    q2 = queries.reshape(b_s * nq, dm_p).astype(compute_dtype)
    k2 = keys.reshape(b_s * nk, dm_p).astype(compute_dtype)
    v2 = values.reshape(b_s * nk, dm_p).astype(compute_dtype)

    if block_bs is None:
        block_bs = _choose_block_bs(b_s, nq, nk)
    block_bs = max(1, min(block_bs, b_s))
    while b_s % block_bs:
        block_bs -= 1
    if block_bs != b_s and ((block_bs * nq) % 8 or (block_bs * nk) % 8):
        block_bs = b_s                                     # (8,128) sublane rule

    n_blocks = b_s // block_bs
    rows_q = block_bs * nq
    rows_k = block_bs * nk

    kernel = functools.partial(_attention_kernel, bb=block_bs, nq=nq, nk=nk,
                               h=h, d_k=d_k, d_v=d_v,
                               compute_dtype=compute_dtype)

    # VMEM budget: double-buffered activation blocks + resident weights +
    # headroom; capped at 48 MiB so the same kernel fits v7x's 64 MiB VMEM.
    def _pad_tile(shape):
        lead = 1
        for s in shape[:-2]:
            lead *= s
        r = -(-shape[-2] // 8) * 8
        c = -(-shape[-1] // 128) * 128
        return lead * r * c

    csize = jnp.dtype(compute_dtype).itemsize
    osize = jnp.dtype(out_dtype).itemsize
    act_bytes = 2 * (rows_q + 2 * rows_k) * dm_p * csize
    out_bytes = 2 * rows_q * dm_p * osize
    w_bytes = sum(_pad_tile(a.shape) * jnp.dtype(a.dtype).itemsize
                  for a in (wq_s, wk_s, wv_s, wo_s, bq_s, bk_s, bv_s, bo_s))
    est = act_bytes + out_bytes + 2 * w_bytes + 8 * 1024 * 1024
    vmem_limit = int(min(48 * 1024 * 1024, max(16 * 1024 * 1024, est)))

    args = (q2, k2, v2, wq_s, bq_s, wk_s, bk_s, wv_s, bv_s, wo_s, bo_s)

    def build(single_buffer_weights):
        if single_buffer_weights:
            def wspec(a):
                # Resident weights: constant index map + single VMEM buffer.
                return pl.BlockSpec(a.shape, lambda i, n=a.ndim: (0,) * n,
                                    pipeline_mode=pl.Buffered(1))
        else:
            def wspec(a):
                return pl.BlockSpec(a.shape, lambda i, n=a.ndim: (0,) * n)

        return pl.pallas_call(
            kernel,
            out_shape=jax.ShapeDtypeStruct((b_s * nq, dm_p), out_dtype),
            grid_spec=pltpu.PrefetchScalarGridSpec(
                num_scalar_prefetch=0,
                grid=(n_blocks,),
                in_specs=[
                    pl.BlockSpec((rows_q, dm_p), lambda i: (i, 0)),
                    pl.BlockSpec((rows_k, dm_p), lambda i: (i, 0)),
                    pl.BlockSpec((rows_k, dm_p), lambda i: (i, 0)),
                    wspec(wq_s), wspec(bq_s), wspec(wk_s), wspec(bk_s),
                    wspec(wv_s), wspec(bv_s), wspec(wo_s), wspec(bo_s),
                ],
                out_specs=pl.BlockSpec((rows_q, dm_p), lambda i: (i, 0)),
            ),
            compiler_params=pltpu.CompilerParams(
                dimension_semantics=("parallel",),
                vmem_limit_bytes=vmem_limit,
            ),
        )

    try:
        out2 = build(True)(*args)
    except Exception:
        # pl.Buffered(1) single-buffering not supported by this jax version;
        # fall back to default (double-buffered) resident weights.
        out2 = build(False)(*args)

    out = out2.reshape(b_s, nq, dm_p)
    if dm_p != d_model:
        out = out[:, :, :d_model]
    return out


def xavier_uniform(key, fan_in, fan_out, dtype=jnp.float32):
    # matches torch.nn.init.xavier_uniform_ on a (fan_out, fan_in) weight;
    # stored transposed as (fan_in, fan_out).
    bound = math.sqrt(6.0 / (fan_in + fan_out))
    return jax.random.uniform(key, (fan_in, fan_out), dtype, -bound, bound)


def init_params(key, d_model, d_k, d_v, h):
    k1, k2, k3, k4 = jax.random.split(key, 4)
    wq = xavier_uniform(k1, d_model, h * d_k)
    wk = xavier_uniform(k2, d_model, h * d_k)
    wv = xavier_uniform(k3, d_model, h * d_v)
    wo = xavier_uniform(k4, h * d_v, d_model)
    bq = jnp.zeros((1, h * d_k), jnp.float32)
    bk = jnp.zeros((1, h * d_k), jnp.float32)
    bv = jnp.zeros((1, h * d_v), jnp.float32)
    bo = jnp.zeros((1, d_model), jnp.float32)
    return (wq, bq, wk, bk, wv, bv, wo, bo)


def reference(queries, keys, values, params, *, h, d_k, d_v):
    wq, bq, wk, bk, wv, bv, wo, bo = params
    b_s, nq, d_model = queries.shape
    nk = keys.shape[1]
    q = (queries @ wq + bq).reshape(b_s, nq, h, d_k).transpose(0, 2, 1, 3)
    k = (keys @ wk + bk).reshape(b_s, nk, h, d_k).transpose(0, 2, 3, 1)
    v = (values @ wv + bv).reshape(b_s, nk, h, d_v).transpose(0, 2, 1, 3)
    att = jnp.matmul(q, k) / math.sqrt(d_k)
    att = jax.nn.softmax(att, axis=-1)
    out = jnp.matmul(att, v).transpose(0, 2, 1, 3).reshape(b_s, nq, h * d_v)
    return out @ wo + bo


if __name__ == "__main__":
    d_model, d_k, d_v, h = 32, 8, 8, 4
    b_s, nq, nk = 2, 8, 8

    key = jax.random.PRNGKey(0)
    kp, kq, kk, kv = jax.random.split(key, 4)
    params = init_params(kp, d_model, d_k, d_v, h)

    queries = jax.random.normal(kq, (b_s, nq, d_model), jnp.float32)
    keys = jax.random.normal(kk, (b_s, nk, d_model), jnp.float32)
    values = jax.random.normal(kv, (b_s, nk, d_model), jnp.float32)

    ref = reference(queries, keys, values, params, h=h, d_k=d_k, d_v=d_v)

    # f32 compute path: tight check against the pure-JAX reference.
    out_f32 = scaled_dot_product_attention(queries, keys, values, params,
                                           h=h, d_k=d_k, d_v=d_v,
                                           compute_dtype=jnp.float32)
    out_f32 = jax.block_until_ready(out_f32)
    assert out_f32.shape == (b_s, nq, d_model)
    assert jnp.allclose(out_f32, ref, atol=2e-4, rtol=2e-4)

    # bf16 MXU path (default): loose check (bf16 matmul rounding).
    out_bf16 = scaled_dot_product_attention(queries, keys, values, params,
                                            h=h, d_k=d_k, d_v=d_v)
    out_bf16 = jax.block_until_ready(out_bf16)
    assert out_bf16.shape == (b_s, nq, d_model)
    assert jnp.allclose(out_bf16, ref, atol=1e-1, rtol=1e-1)

    print("KERNEL_OK")
</pallas_src>

<mosaic_0001>
module attributes {stable_mosaic.version = 11 : i64} {
  func.func @_attention_kernel(%arg0: i32, %arg1: memref<8x128xf32, #tpu.memory_space<vmem>>, %arg2: memref<8x128xf32, #tpu.memory_space<vmem>>, %arg3: memref<8x128xf32, #tpu.memory_space<vmem>>, %arg4: memref<4x128x8xf32, #tpu.memory_space<vmem>>, %arg5: memref<4x1x8xf32, #tpu.memory_space<vmem>>, %arg6: memref<4x128x8xf32, #tpu.memory_space<vmem>>, %arg7: memref<4x1x8xf32, #tpu.memory_space<vmem>>, %arg8: memref<4x128x8xf32, #tpu.memory_space<vmem>>, %arg9: memref<4x1x8xf32, #tpu.memory_space<vmem>>, %arg10: memref<4x8x128xf32, #tpu.memory_space<vmem>>, %arg11: memref<1x128xf32, #tpu.memory_space<vmem>>, %arg12: memref<8x128xf32, #tpu.memory_space<vmem>>) attributes {dimension_semantics = [#tpu.dimension_semantics<parallel>], iteration_bounds = array<i64: 2>, scalar_prefetch = 0 : i64, scratch_operands = 0 : i64, tpu.core_type = #tpu.core_type<tc>, window_params = [{transform_indices = @transform_0, window_bounds = array<i64: 8, 128>}, {transform_indices = @transform_1, window_bounds = array<i64: 8, 128>}, {transform_indices = @transform_2, window_bounds = array<i64: 8, 128>}, {pipeline_mode = #tpu.pipeline_mode<synchronous>, transform_indices = @transform_3, window_bounds = array<i64: 4, 128, 8>}, {pipeline_mode = #tpu.pipeline_mode<synchronous>, transform_indices = @transform_4, window_bounds = array<i64: 4, 1, 8>}, {pipeline_mode = #tpu.pipeline_mode<synchronous>, transform_indices = @transform_5, window_bounds = array<i64: 4, 128, 8>}, {pipeline_mode = #tpu.pipeline_mode<synchronous>, transform_indices = @transform_6, window_bounds = array<i64: 4, 1, 8>}, {pipeline_mode = #tpu.pipeline_mode<synchronous>, transform_indices = @transform_7, window_bounds = array<i64: 4, 128, 8>}, {pipeline_mode = #tpu.pipeline_mode<synchronous>, transform_indices = @transform_8, window_bounds = array<i64: 4, 1, 8>}, {pipeline_mode = #tpu.pipeline_mode<synchronous>, transform_indices = @transform_9, window_bounds = array<i64: 4, 8, 128>}, {pipeline_mode = #tpu.pipeline_mode<synchronous>, transform_indices = @transform_10, window_bounds = array<i64: 1, 128>}, {transform_indices = @transform_11, window_bounds = array<i64: 8, 128>}]} {
    %cst = arith.constant 0.000000e+00 : f32
    %0 = vector.broadcast %cst : f32 to vector<8x128xf32>
    %c0 = arith.constant 0 : index
    %c0_0 = arith.constant 0 : index
    %c0_1 = arith.constant 0 : index
    %1 = vector.load %arg4[%c0, %c0_0, %c0_1] : memref<4x128x8xf32, #tpu.memory_space<vmem>>, vector<1x128x8xf32>
    %2 = vector.shape_cast %1 : vector<1x128x8xf32> to vector<128x8xf32>
    %c0_2 = arith.constant 0 : index
    %c0_3 = arith.constant 0 : index
    %c0_4 = arith.constant 0 : index
    %3 = vector.load %arg6[%c0_2, %c0_3, %c0_4] : memref<4x128x8xf32, #tpu.memory_space<vmem>>, vector<1x128x8xf32>
    %4 = vector.shape_cast %3 : vector<1x128x8xf32> to vector<128x8xf32>
    %c0_5 = arith.constant 0 : index
    %c0_6 = arith.constant 0 : index
    %c0_7 = arith.constant 0 : index
    %5 = vector.load %arg8[%c0_5, %c0_6, %c0_7] : memref<4x128x8xf32, #tpu.memory_space<vmem>>, vector<1x128x8xf32>
    %6 = vector.shape_cast %5 : vector<1x128x8xf32> to vector<128x8xf32>
    %c0_8 = arith.constant 0 : index
    %c0_9 = arith.constant 0 : index
    %c0_10 = arith.constant 0 : index
    %7 = vector.load %arg10[%c0_8, %c0_9, %c0_10] : memref<4x8x128xf32, #tpu.memory_space<vmem>>, vector<1x8x128xf32>
    %8 = vector.shape_cast %7 : vector<1x8x128xf32> to vector<8x128xf32>
    %c0_11 = arith.constant 0 : index
    %c0_12 = arith.constant 0 : index
    %9 = vector.load %arg1[%c0_11, %c0_12] : memref<8x128xf32, #tpu.memory_space<vmem>>, vector<8x128xf32>
    %cst_13 = arith.constant dense<0.000000e+00> : vector<8x8xf32>
    %10 = tpu.matmul %9, %2, %cst_13 {dimension_numbers = #tpu.dot_dimension_numbers<[1], [0], [0], [1], [0, 0, 1, 1], [], []>} : vector<8x128xf32>, vector<128x8xf32>, vector<8x8xf32> -> vector<8x8xf32>
    %c0_14 = arith.constant 0 : index
    %c0_15 = arith.constant 0 : index
    %c0_16 = arith.constant 0 : index
    %11 = vector.load %arg5[%c0_14, %c0_15, %c0_16] : memref<4x1x8xf32, #tpu.memory_space<vmem>>, vector<1x1x8xf32>
    %12 = vector.shape_cast %11 : vector<1x1x8xf32> to vector<1x8xf32>
    %13 = vector.broadcast %12 : vector<1x8xf32> to vector<8x8xf32>
    %14 = arith.addf %10, %13 : vector<8x8xf32>
    %c0_17 = arith.constant 0 : index
    %c0_18 = arith.constant 0 : index
    %15 = vector.load %arg2[%c0_17, %c0_18] : memref<8x128xf32, #tpu.memory_space<vmem>>, vector<8x128xf32>
    %cst_19 = arith.constant dense<0.000000e+00> : vector<8x8xf32>
    %16 = tpu.matmul %15, %4, %cst_19 {dimension_numbers = #tpu.dot_dimension_numbers<[1], [0], [0], [1], [0, 0, 1, 1], [], []>} : vector<8x128xf32>, vector<128x8xf32>, vector<8x8xf32> -> vector<8x8xf32>
    %c0_20 = arith.constant 0 : index
    %c0_21 = arith.constant 0 : index
    %c0_22 = arith.constant 0 : index
    %17 = vector.load %arg7[%c0_20, %c0_21, %c0_22] : memref<4x1x8xf32, #tpu.memory_space<vmem>>, vector<1x1x8xf32>
    %18 = vector.shape_cast %17 : vector<1x1x8xf32> to vector<1x8xf32>
    %19 = vector.broadcast %18 : vector<1x8xf32> to vector<8x8xf32>
    %20 = arith.addf %16, %19 : vector<8x8xf32>
    %c0_23 = arith.constant 0 : index
    %c0_24 = arith.constant 0 : index
    %21 = vector.load %arg3[%c0_23, %c0_24] : memref<8x128xf32, #tpu.memory_space<vmem>>, vector<8x128xf32>
    %cst_25 = arith.constant dense<0.000000e+00> : vector<8x8xf32>
    %22 = tpu.matmul %21, %6, %cst_25 {dimension_numbers = #tpu.dot_dimension_numbers<[1], [0], [0], [1], [0, 0, 1, 1], [], []>} : vector<8x128xf32>, vector<128x8xf32>, vector<8x8xf32> -> vector<8x8xf32>
    %c0_26 = arith.constant 0 : index
    %c0_27 = arith.constant 0 : index
    %c0_28 = arith.constant 0 : index
    %23 = vector.load %arg9[%c0_26, %c0_27, %c0_28] : memref<4x1x8xf32, #tpu.memory_space<vmem>>, vector<1x1x8xf32>
    %24 = vector.shape_cast %23 : vector<1x1x8xf32> to vector<1x8xf32>
    %25 = vector.broadcast %24 : vector<1x8xf32> to vector<8x8xf32>
    %26 = arith.addf %22, %25 : vector<8x8xf32>
    %27 = vector.shape_cast %14 : vector<8x8xf32> to vector<1x8x8xf32>
    %28 = vector.shape_cast %20 : vector<8x8xf32> to vector<1x8x8xf32>
    %29 = vector.shape_cast %26 : vector<8x8xf32> to vector<1x8x8xf32>
    %cst_29 = arith.constant dense<0.000000e+00> : vector<1x8x8xf32>
    %30 = tpu.matmul %27, %28, %cst_29 {dimension_numbers = #tpu.dot_dimension_numbers<[2], [2], [1], [1], [0, 0, 0, 1, 1, 1], [0], [0]>} : vector<1x8x8xf32>, vector<1x8x8xf32>, vector<1x8x8xf32> -> vector<1x8x8xf32>
    %cst_30 = arith.constant dense<0xFF800000> : vector<1x8xf32>
    %31 = vector.multi_reduction <maximumf>, %30, %cst_30 [2] : vector<1x8x8xf32> to vector<1x8xf32>
    %32 = vector.shape_cast %31 : vector<1x8xf32> to vector<1x8x1xf32>
    %33 = vector.broadcast %32 : vector<1x8x1xf32> to vector<1x8x8xf32>
    %34 = arith.subf %30, %33 : vector<1x8x8xf32>
    %35 = math.exp %34 : vector<1x8x8xf32>
    %cst_31 = arith.constant dense<0.000000e+00> : vector<1x8xf32>
    %36 = vector.multi_reduction <add>, %35, %cst_31 [2] : vector<1x8x8xf32> to vector<1x8xf32>
    %37 = vector.shape_cast %36 : vector<1x8xf32> to vector<1x8x1xf32>
    %38 = tpu.reciprocal %37 {approx = true} : vector<1x8x1xf32> -> vector<1x8x1xf32>
    %39 = arith.mulf %37, %38 : vector<1x8x1xf32>
    %cst_32 = arith.constant 2.000000e+00 : f32
    %40 = vector.broadcast %cst_32 : f32 to vector<1x8x1xf32>
    %41 = arith.subf %40, %39 : vector<1x8x1xf32>
    %42 = arith.mulf %38, %41 : vector<1x8x1xf32>
    %43 = vector.broadcast %42 : vector<1x8x1xf32> to vector<1x8x8xf32>
    %44 = arith.mulf %35, %43 : vector<1x8x8xf32>
    %cst_33 = arith.constant dense<0.000000e+00> : vector<1x8x8xf32>
    %45 = tpu.matmul %44, %29, %cst_33 {dimension_numbers = #tpu.dot_dimension_numbers<[2], [1], [1], [2], [0, 0, 0, 1, 1, 2], [0], [0]>} : vector<1x8x8xf32>, vector<1x8x8xf32>, vector<1x8x8xf32> -> vector<1x8x8xf32>
    %46 = vector.shape_cast %45 : vector<1x8x8xf32> to vector<8x8xf32>
    %cst_34 = arith.constant dense<0.000000e+00> : vector<8x128xf32>
    %47 = tpu.matmul %46, %8, %cst_34 {dimension_numbers = #tpu.dot_dimension_numbers<[1], [0], [0], [1], [0, 0, 1, 1], [], []>} : vector<8x8xf32>, vector<8x128xf32>, vector<8x128xf32> -> vector<8x128xf32>
    %48 = arith.addf %0, %47 : vector<8x128xf32>
    %c1 = arith.constant 1 : index
    %c0_35 = arith.constant 0 : index
    %c0_36 = arith.constant 0 : index
    %49 = vector.load %arg4[%c1, %c0_35, %c0_36] : memref<4x128x8xf32, #tpu.memory_space<vmem>>, vector<1x128x8xf32>
    %50 = vector.shape_cast %49 : vector<1x128x8xf32> to vector<128x8xf32>
    %c1_37 = arith.constant 1 : index
    %c0_38 = arith.constant 0 : index
    %c0_39 = arith.constant 0 : index
    %51 = vector.load %arg6[%c1_37, %c0_38, %c0_39] : memref<4x128x8xf32, #tpu.memory_space<vmem>>, vector<1x128x8xf32>
    %52 = vector.shape_cast %51 : vector<1x128x8xf32> to vector<128x8xf32>
    %c1_40 = arith.constant 1 : index
    %c0_41 = arith.constant 0 : index
    %c0_42 = arith.constant 0 : index
    %53 = vector.load %arg8[%c1_40, %c0_41, %c0_42] : memref<4x128x8xf32, #tpu.memory_space<vmem>>, vector<1x128x8xf32>
    %54 = vector.shape_cast %53 : vector<1x128x8xf32> to vector<128x8xf32>
    %c1_43 = arith.constant 1 : index
    %c0_44 = arith.constant 0 : index
    %c0_45 = arith.constant 0 : index
    %55 = vector.load %arg10[%c1_43, %c0_44, %c0_45] : memref<4x8x128xf32, #tpu.memory_space<vmem>>, vector<1x8x128xf32>
    %56 = vector.shape_cast %55 : vector<1x8x128xf32> to vector<8x128xf32>
    %c0_46 = arith.constant 0 : index
    %c0_47 = arith.constant 0 : index
    %57 = vector.load %arg1[%c0_46, %c0_47] : memref<8x128xf32, #tpu.memory_space<vmem>>, vector<8x128xf32>
    %cst_48 = arith.constant dense<0.000000e+00> : vector<8x8xf32>
    %58 = tpu.matmul %57, %50, %cst_48 {dimension_numbers = #tpu.dot_dimension_numbers<[1], [0], [0], [1], [0, 0, 1, 1], [], []>} : vector<8x128xf32>, vector<128x8xf32>, vector<8x8xf32> -> vector<8x8xf32>
    %c1_49 = arith.constant 1 : index
    %c0_50 = arith.constant 0 : index
    %c0_51 = arith.constant 0 : index
    %59 = vector.load %arg5[%c1_49, %c0_50, %c0_51] : memref<4x1x8xf32, #tpu.memory_space<vmem>>, vector<1x1x8xf32>
    %60 = vector.shape_cast %59 : vector<1x1x8xf32> to vector<1x8xf32>
    %61 = vector.broadcast %60 : vector<1x8xf32> to vector<8x8xf32>
    %62 = arith.addf %58, %61 : vector<8x8xf32>
    %c0_52 = arith.constant 0 : index
    %c0_53 = arith.constant 0 : index
    %63 = vector.load %arg2[%c0_52, %c0_53] : memref<8x128xf32, #tpu.memory_space<vmem>>, vector<8x128xf32>
    %cst_54 = arith.constant dense<0.000000e+00> : vector<8x8xf32>
    %64 = tpu.matmul %63, %52, %cst_54 {dimension_numbers = #tpu.dot_dimension_numbers<[1], [0], [0], [1], [0, 0, 1, 1], [], []>} : vector<8x128xf32>, vector<128x8xf32>, vector<8x8xf32> -> vector<8x8xf32>
    %c1_55 = arith.constant 1 : index
    %c0_56 = arith.constant 0 : index
    %c0_57 = arith.constant 0 : index
    %65 = vector.load %arg7[%c1_55, %c0_56, %c0_57] : memref<4x1x8xf32, #tpu.memory_space<vmem>>, vector<1x1x8xf32>
    %66 = vector.shape_cast %65 : vector<1x1x8xf32> to vector<1x8xf32>
    %67 = vector.broadcast %66 : vector<1x8xf32> to vector<8x8xf32>
    %68 = arith.addf %64, %67 : vector<8x8xf32>
    %c0_58 = arith.constant 0 : index
    %c0_59 = arith.constant 0 : index
    %69 = vector.load %arg3[%c0_58, %c0_59] : memref<8x128xf32, #tpu.memory_space<vmem>>, vector<8x128xf32>
    %cst_60 = arith.constant dense<0.000000e+00> : vector<8x8xf32>
    %70 = tpu.matmul %69, %54, %cst_60 {dimension_numbers = #tpu.dot_dimension_numbers<[1], [0], [0], [1], [0, 0, 1, 1], [], []>} : vector<8x128xf32>, vector<128x8xf32>, vector<8x8xf32> -> vector<8x8xf32>
    %c1_61 = arith.constant 1 : index
    %c0_62 = arith.constant 0 : index
    %c0_63 = arith.constant 0 : index
    %71 = vector.load %arg9[%c1_61, %c0_62, %c0_63] : memref<4x1x8xf32, #tpu.memory_space<vmem>>, vector<1x1x8xf32>
    %72 = vector.shape_cast %71 : vector<1x1x8xf32> to vector<1x8xf32>
    %73 = vector.broadcast %72 : vector<1x8xf32> to vector<8x8xf32>
    %74 = arith.addf %70, %73 : vector<8x8xf32>
    %75 = vector.shape_cast %62 : vector<8x8xf32> to vector<1x8x8xf32>
    %76 = vector.shape_cast %68 : vector<8x8xf32> to vector<1x8x8xf32>
    %77 = vector.shape_cast %74 : vector<8x8xf32> to vector<1x8x8xf32>
    %cst_64 = arith.constant dense<0.000000e+00> : vector<1x8x8xf32>
    %78 = tpu.matmul %75, %76, %cst_64 {dimension_numbers = #tpu.dot_dimension_numbers<[2], [2], [1], [1], [0, 0, 0, 1, 1, 1], [0], [0]>} : vector<1x8x8xf32>, vector<1x8x8xf32>, vector<1x8x8xf32> -> vector<1x8x8xf32>
    %cst_65 = arith.constant dense<0xFF800000> : vector<1x8xf32>
    %79 = vector.multi_reduction <maximumf>, %78, %cst_65 [2] : vector<1x8x8xf32> to vector<1x8xf32>
    %80 = vector.shape_cast %79 : vector<1x8xf32> to vector<1x8x1xf32>
    %81 = vector.broadcast %80 : vector<1x8x1xf32> to vector<1x8x8xf32>
    %82 = arith.subf %78, %81 : vector<1x8x8xf32>
    %83 = math.exp %82 : vector<1x8x8xf32>
    %cst_66 = arith.constant dense<0.000000e+00> : vector<1x8xf32>
    %84 = vector.multi_reduction <add>, %83, %cst_66 [2] : vector<1x8x8xf32> to vector<1x8xf32>
    %85 = vector.shape_cast %84 : vector<1x8xf32> to vector<1x8x1xf32>
    %86 = tpu.reciprocal %85 {approx = true} : vector<1x8x1xf32> -> vector<1x8x1xf32>
    %87 = arith.mulf %85, %86 : vector<1x8x1xf32>
    %cst_67 = arith.constant 2.000000e+00 : f32
    %88 = vector.broadcast %cst_67 : f32 to vector<1x8x1xf32>
    %89 = arith.subf %88, %87 : vector<1x8x1xf32>
    %90 = arith.mulf %86, %89 : vector<1x8x1xf32>
    %91 = vector.broadcast %90 : vector<1x8x1xf32> to vector<1x8x8xf32>
    %92 = arith.mulf %83, %91 : vector<1x8x8xf32>
    %cst_68 = arith.constant dense<0.000000e+00> : vector<1x8x8xf32>
    %93 = tpu.matmul %92, %77, %cst_68 {dimension_numbers = #tpu.dot_dimension_numbers<[2], [1], [1], [2], [0, 0, 0, 1, 1, 2], [0], [0]>} : vector<1x8x8xf32>, vector<1x8x8xf32>, vector<1x8x8xf32> -> vector<1x8x8xf32>
    %94 = vector.shape_cast %93 : vector<1x8x8xf32> to vector<8x8xf32>
    %cst_69 = arith.constant dense<0.000000e+00> : vector<8x128xf32>
    %95 = tpu.matmul %94, %56, %cst_69 {dimension_numbers = #tpu.dot_dimension_numbers<[1], [0], [0], [1], [0, 0, 1, 1], [], []>} : vector<8x8xf32>, vector<8x128xf32>, vector<8x128xf32> -> vector<8x128xf32>
    %96 = arith.addf %48, %95 : vector<8x128xf32>
    %c2 = arith.constant 2 : index
    %c0_70 = arith.constant 0 : index
    %c0_71 = arith.constant 0 : index
    %97 = vector.load %arg4[%c2, %c0_70, %c0_71] : memref<4x128x8xf32, #tpu.memory_space<vmem>>, vector<1x128x8xf32>
    %98 = vector.shape_cast %97 : vector<1x128x8xf32> to vector<128x8xf32>
    %c2_72 = arith.constant 2 : index
    %c0_73 = arith.constant 0 : index
    %c0_74 = arith.constant 0 : index
    %99 = vector.load %arg6[%c2_72, %c0_73, %c0_74] : memref<4x128x8xf32, #tpu.memory_space<vmem>>, vector<1x128x8xf32>
    %100 = vector.shape_cast %99 : vector<1x128x8xf32> to vector<128x8xf32>
    %c2_75 = arith.constant 2 : index
    %c0_76 = arith.constant 0 : index
    %c0_77 = arith.constant 0 : index
    %101 = vector.load %arg8[%c2_75, %c0_76, %c0_77] : memref<4x128x8xf32, #tpu.memory_space<vmem>>, vector<1x128x8xf32>
    %102 = vector.shape_cast %101 : vector<1x128x8xf32> to vector<128x8xf32>
    %c2_78 = arith.constant 2 : index
    %c0_79 = arith.constant 0 : index
    %c0_80 = arith.constant 0 : index
    %103 = vector.load %arg10[%c2_78, %c0_79, %c0_80] : memref<4x8x128xf32, #tpu.memory_space<vmem>>, vector<1x8x128xf32>
    %104 = vector.shape_cast %103 : vector<1x8x128xf32> to vector<8x128xf32>
    %c0_81 = arith.constant 0 : index
    %c0_82 = arith.constant 0 : index
    %105 = vector.load %arg1[%c0_81, %c0_82] : memref<8x128xf32, #tpu.memory_space<vmem>>, vector<8x128xf32>
    %cst_83 = arith.constant dense<0.000000e+00> : vector<8x8xf32>
    %106 = tpu.matmul %105, %98, %cst_83 {dimension_numbers = #tpu.dot_dimension_numbers<[1], [0], [0], [1], [0, 0, 1, 1], [], []>} : vector<8x128xf32>, vector<128x8xf32>, vector<8x8xf32> -> vector<8x8xf32>
    %c2_84 = arith.constant 2 : index
    %c0_85 = arith.constant 0 : index
    %c0_86 = arith.constant 0 : index
    %107 = vector.load %arg5[%c2_84, %c0_85, %c0_86] : memref<4x1x8xf32, #tpu.memory_space<vmem>>, vector<1x1x8xf32>
    %108 = vector.shape_cast %107 : vector<1x1x8xf32> to vector<1x8xf32>
    %109 = vector.broadcast %108 : vector<1x8xf32> to vector<8x8xf32>
    %110 = arith.addf %106, %109 : vector<8x8xf32>
    %c0_87 = arith.constant 0 : index
    %c0_88 = arith.constant 0 : index
    %111 = vector.load %arg2[%c0_87, %c0_88] : memref<8x128xf32, #tpu.memory_space<vmem>>, vector<8x128xf32>
    %cst_89 = arith.constant dense<0.000000e+00> : vector<8x8xf32>
    %112 = tpu.matmul %111, %100, %cst_89 {dimension_numbers = #tpu.dot_dimension_numbers<[1], [0], [0], [1], [0, 0, 1, 1], [], []>} : vector<8x128xf32>, vector<128x8xf32>, vector<8x8xf32> -> vector<8x8xf32>
    %c2_90 = arith.constant 2 : index
    %c0_91 = arith.constant 0 : index
    %c0_92 = arith.constant 0 : index
    %113 = vector.load %arg7[%c2_90, %c0_91, %c0_92] : memref<4x1x8xf32, #tpu.memory_space<vmem>>, vector<1x1x8xf32>
    %114 = vector.shape_cast %113 : vector<1x1x8xf32> to vector<1x8xf32>
    %115 = vector.broadcast %114 : vector<1x8xf32> to vector<8x8xf32>
    %116 = arith.addf %112, %115 : vector<8x8xf32>
    %c0_93 = arith.constant 0 : index
    %c0_94 = arith.constant 0 : index
    %117 = vector.load %arg3[%c0_93, %c0_94] : memref<8x128xf32, #tpu.memory_space<vmem>>, vector<8x128xf32>
    %cst_95 = arith.constant dense<0.000000e+00> : vector<8x8xf32>
    %118 = tpu.matmul %117, %102, %cst_95 {dimension_numbers = #tpu.dot_dimension_numbers<[1], [0], [0], [1], [0, 0, 1, 1], [], []>} : vector<8x128xf32>, vector<128x8xf32>, vector<8x8xf32> -> vector<8x8xf32>
    %c2_96 = arith.constant 2 : index
    %c0_97 = arith.constant 0 : index
    %c0_98 = arith.constant 0 : index
    %119 = vector.load %arg9[%c2_96, %c0_97, %c0_98] : memref<4x1x8xf32, #tpu.memory_space<vmem>>, vector<1x1x8xf32>
    %120 = vector.shape_cast %119 : vector<1x1x8xf32> to vector<1x8xf32>
    %121 = vector.broadcast %120 : vector<1x8xf32> to vector<8x8xf32>
    %122 = arith.addf %118, %121 : vector<8x8xf32>
    %123 = vector.shape_cast %110 : vector<8x8xf32> to vector<1x8x8xf32>
    %124 = vector.shape_cast %116 : vector<8x8xf32> to vector<1x8x8xf32>
    %125 = vector.shape_cast %122 : vector<8x8xf32> to vector<1x8x8xf32>
    %cst_99 = arith.constant dense<0.000000e+00> : vector<1x8x8xf32>
    %126 = tpu.matmul %123, %124, %cst_99 {dimension_numbers = #tpu.dot_dimension_numbers<[2], [2], [1], [1], [0, 0, 0, 1, 1, 1], [0], [0]>} : vector<1x8x8xf32>, vector<1x8x8xf32>, vector<1x8x8xf32> -> vector<1x8x8xf32>
    %cst_100 = arith.constant dense<0xFF800000> : vector<1x8xf32>
    %127 = vector.multi_reduction <maximumf>, %126, %cst_100 [2] : vector<1x8x8xf32> to vector<1x8xf32>
    %128 = vector.shape_cast %127 : vector<1x8xf32> to vector<1x8x1xf32>
    %129 = vector.broadcast %128 : vector<1x8x1xf32> to vector<1x8x8xf32>
    %130 = arith.subf %126, %129 : vector<1x8x8xf32>
    %131 = math.exp %130 : vector<1x8x8xf32>
    %cst_101 = arith.constant dense<0.000000e+00> : vector<1x8xf32>
    %132 = vector.multi_reduction <add>, %131, %cst_101 [2] : vector<1x8x8xf32> to vector<1x8xf32>
    %133 = vector.shape_cast %132 : vector<1x8xf32> to vector<1x8x1xf32>
    %134 = tpu.reciprocal %133 {approx = true} : vector<1x8x1xf32> -> vector<1x8x1xf32>
    %135 = arith.mulf %133, %134 : vector<1x8x1xf32>
    %cst_102 = arith.constant 2.000000e+00 : f32
    %136 = vector.broadcast %cst_102 : f32 to vector<1x8x1xf32>
    %137 = arith.subf %136, %135 : vector<1x8x1xf32>
    %138 = arith.mulf %134, %137 : vector<1x8x1xf32>
    %139 = vector.broadcast %138 : vector<1x8x1xf32> to vector<1x8x8xf32>
    %140 = arith.mulf %131, %139 : vector<1x8x8xf32>
    %cst_103 = arith.constant dense<0.000000e+00> : vector<1x8x8xf32>
    %141 = tpu.matmul %140, %125, %cst_103 {dimension_numbers = #tpu.dot_dimension_numbers<[2], [1], [1], [2], [0, 0, 0, 1, 1, 2], [0], [0]>} : vector<1x8x8xf32>, vector<1x8x8xf32>, vector<1x8x8xf32> -> vector<1x8x8xf32>
    %142 = vector.shape_cast %141 : vector<1x8x8xf32> to vector<8x8xf32>
    %cst_104 = arith.constant dense<0.000000e+00> : vector<8x128xf32>
    %143 = tpu.matmul %142, %104, %cst_104 {dimension_numbers = #tpu.dot_dimension_numbers<[1], [0], [0], [1], [0, 0, 1, 1], [], []>} : vector<8x8xf32>, vector<8x128xf32>, vector<8x128xf32> -> vector<8x128xf32>
    %144 = arith.addf %96, %143 : vector<8x128xf32>
    %c3 = arith.constant 3 : index
    %c0_105 = arith.constant 0 : index
    %c0_106 = arith.constant 0 : index
    %145 = vector.load %arg4[%c3, %c0_105, %c0_106] : memref<4x128x8xf32, #tpu.memory_space<vmem>>, vector<1x128x8xf32>
    %146 = vector.shape_cast %145 : vector<1x128x8xf32> to vector<128x8xf32>
    %c3_107 = arith.constant 3 : index
    %c0_108 = arith.constant 0 : index
    %c0_109 = arith.constant 0 : index
    %147 = vector.load %arg6[%c3_107, %c0_108, %c0_109] : memref<4x128x8xf32, #tpu.memory_space<vmem>>, vector<1x128x8xf32>
    %148 = vector.shape_cast %147 : vector<1x128x8xf32> to vector<128x8xf32>
    %c3_110 = arith.constant 3 : index
    %c0_111 = arith.constant 0 : index
    %c0_112 = arith.constant 0 : index
    %149 = vector.load %arg8[%c3_110, %c0_111, %c0_112] : memref<4x128x8xf32, #tpu.memory_space<vmem>>, vector<1x128x8xf32>
    %150 = vector.shape_cast %149 : vector<1x128x8xf32> to vector<128x8xf32>
    %c3_113 = arith.constant 3 : index
    %c0_114 = arith.constant 0 : index
    %c0_115 = arith.constant 0 : index
    %151 = vector.load %arg10[%c3_113, %c0_114, %c0_115] : memref<4x8x128xf32, #tpu.memory_space<vmem>>, vector<1x8x128xf32>
    %152 = vector.shape_cast %151 : vector<1x8x128xf32> to vector<8x128xf32>
    %c0_116 = arith.constant 0 : index
    %c0_117 = arith.constant 0 : index
    %153 = vector.load %arg1[%c0_116, %c0_117] : memref<8x128xf32, #tpu.memory_space<vmem>>, vector<8x128xf32>
    %cst_118 = arith.constant dense<0.000000e+00> : vector<8x8xf32>
    %154 = tpu.matmul %153, %146, %cst_118 {dimension_numbers = #tpu.dot_dimension_numbers<[1], [0], [0], [1], [0, 0, 1, 1], [], []>} : vector<8x128xf32>, vector<128x8xf32>, vector<8x8xf32> -> vector<8x8xf32>
    %c3_119 = arith.constant 3 : index
    %c0_120 = arith.constant 0 : index
    %c0_121 = arith.constant 0 : index
    %155 = vector.load %arg5[%c3_119, %c0_120, %c0_121] : memref<4x1x8xf32, #tpu.memory_space<vmem>>, vector<1x1x8xf32>
    %156 = vector.shape_cast %155 : vector<1x1x8xf32> to vector<1x8xf32>
    %157 = vector.broadcast %156 : vector<1x8xf32> to vector<8x8xf32>
    %158 = arith.addf %154, %157 : vector<8x8xf32>
    %c0_122 = arith.constant 0 : index
    %c0_123 = arith.constant 0 : index
    %159 = vector.load %arg2[%c0_122, %c0_123] : memref<8x128xf32, #tpu.memory_space<vmem>>, vector<8x128xf32>
    %cst_124 = arith.constant dense<0.000000e+00> : vector<8x8xf32>
    %160 = tpu.matmul %159, %148, %cst_124 {dimension_numbers = #tpu.dot_dimension_numbers<[1], [0], [0], [1], [0, 0, 1, 1], [], []>} : vector<8x128xf32>, vector<128x8xf32>, vector<8x8xf32> -> vector<8x8xf32>
    %c3_125 = arith.constant 3 : index
    %c0_126 = arith.constant 0 : index
    %c0_127 = arith.constant 0 : index
    %161 = vector.load %arg7[%c3_125, %c0_126, %c0_127] : memref<4x1x8xf32, #tpu.memory_space<vmem>>, vector<1x1x8xf32>
    %162 = vector.shape_cast %161 : vector<1x1x8xf32> to vector<1x8xf32>
    %163 = vector.broadcast %162 : vector<1x8xf32> to vector<8x8xf32>
    %164 = arith.addf %160, %163 : vector<8x8xf32>
    %c0_128 = arith.constant 0 : index
    %c0_129 = arith.constant 0 : index
    %165 = vector.load %arg3[%c0_128, %c0_129] : memref<8x128xf32, #tpu.memory_space<vmem>>, vector<8x128xf32>
    %cst_130 = arith.constant dense<0.000000e+00> : vector<8x8xf32>
    %166 = tpu.matmul %165, %150, %cst_130 {dimension_numbers = #tpu.dot_dimension_numbers<[1], [0], [0], [1], [0, 0, 1, 1], [], []>} : vector<8x128xf32>, vector<128x8xf32>, vector<8x8xf32> -> vector<8x8xf32>
    %c3_131 = arith.constant 3 : index
    %c0_132 = arith.constant 0 : index
    %c0_133 = arith.constant 0 : index
    %167 = vector.load %arg9[%c3_131, %c0_132, %c0_133] : memref<4x1x8xf32, #tpu.memory_space<vmem>>, vector<1x1x8xf32>
    %168 = vector.shape_cast %167 : vector<1x1x8xf32> to vector<1x8xf32>
    %169 = vector.broadcast %168 : vector<1x8xf32> to vector<8x8xf32>
    %170 = arith.addf %166, %169 : vector<8x8xf32>
    %171 = vector.shape_cast %158 : vector<8x8xf32> to vector<1x8x8xf32>
    %172 = vector.shape_cast %164 : vector<8x8xf32> to vector<1x8x8xf32>
    %173 = vector.shape_cast %170 : vector<8x8xf32> to vector<1x8x8xf32>
    %cst_134 = arith.constant dense<0.000000e+00> : vector<1x8x8xf32>
    %174 = tpu.matmul %171, %172, %cst_134 {dimension_numbers = #tpu.dot_dimension_numbers<[2], [2], [1], [1], [0, 0, 0, 1, 1, 1], [0], [0]>} : vector<1x8x8xf32>, vector<1x8x8xf32>, vector<1x8x8xf32> -> vector<1x8x8xf32>
    %cst_135 = arith.constant dense<0xFF800000> : vector<1x8xf32>
    %175 = vector.multi_reduction <maximumf>, %174, %cst_135 [2] : vector<1x8x8xf32> to vector<1x8xf32>
    %176 = vector.shape_cast %175 : vector<1x8xf32> to vector<1x8x1xf32>
    %177 = vector.broadcast %176 : vector<1x8x1xf32> to vector<1x8x8xf32>
    %178 = arith.subf %174, %177 : vector<1x8x8xf32>
    %179 = math.exp %178 : vector<1x8x8xf32>
    %cst_136 = arith.constant dense<0.000000e+00> : vector<1x8xf32>
    %180 = vector.multi_reduction <add>, %179, %cst_136 [2] : vector<1x8x8xf32> to vector<1x8xf32>
    %181 = vector.shape_cast %180 : vector<1x8xf32> to vector<1x8x1xf32>
    %182 = tpu.reciprocal %181 {approx = true} : vector<1x8x1xf32> -> vector<1x8x1xf32>
    %183 = arith.mulf %181, %182 : vector<1x8x1xf32>
    %cst_137 = arith.constant 2.000000e+00 : f32
    %184 = vector.broadcast %cst_137 : f32 to vector<1x8x1xf32>
    %185 = arith.subf %184, %183 : vector<1x8x1xf32>
    %186 = arith.mulf %182, %185 : vector<1x8x1xf32>
    %187 = vector.broadcast %186 : vector<1x8x1xf32> to vector<1x8x8xf32>
    %188 = arith.mulf %179, %187 : vector<1x8x8xf32>
    %cst_138 = arith.constant dense<0.000000e+00> : vector<1x8x8xf32>
    %189 = tpu.matmul %188, %173, %cst_138 {dimension_numbers = #tpu.dot_dimension_numbers<[2], [1], [1], [2], [0, 0, 0, 1, 1, 2], [0], [0]>} : vector<1x8x8xf32>, vector<1x8x8xf32>, vector<1x8x8xf32> -> vector<1x8x8xf32>
    %190 = vector.shape_cast %189 : vector<1x8x8xf32> to vector<8x8xf32>
    %cst_139 = arith.constant dense<0.000000e+00> : vector<8x128xf32>
    %191 = tpu.matmul %190, %152, %cst_139 {dimension_numbers = #tpu.dot_dimension_numbers<[1], [0], [0], [1], [0, 0, 1, 1], [], []>} : vector<8x8xf32>, vector<8x128xf32>, vector<8x128xf32> -> vector<8x128xf32>
    %192 = arith.addf %144, %191 : vector<8x128xf32>
    %c0_140 = arith.constant 0 : index
    %c0_141 = arith.constant 0 : index
    %193 = vector.load %arg11[%c0_140, %c0_141] : memref<1x128xf32, #tpu.memory_space<vmem>>, vector<1x128xf32>
    %194 = vector.broadcast %193 : vector<1x128xf32> to vector<8x128xf32>
    %195 = arith.addf %192, %194 : vector<8x128xf32>
    %c0_142 = arith.constant 0 : index
    %c0_143 = arith.constant 0 : index
    %196 = vector.load %arg12[%c0_142, %c0_143] : memref<8x128xf32, #tpu.memory_space<vmem>>, vector<8x128xf32>
    tpu.vector_store %arg12[%c0_142, %c0_143], %195 {strides = array<i32>} : memref<8x128xf32, #tpu.memory_space<vmem>>, vector<8x128xf32>,
    return
  }
  func.func @transform_0(%arg0: i32) -> (i32, i32) {
    %c0_i32 = arith.constant 0 : i32
    %c0_i32_0 = arith.constant 0 : i32
    return %arg0, %c0_i32 : i32, i32
  }
  func.func @transform_1(%arg0: i32) -> (i32, i32) {
    %c0_i32 = arith.constant 0 : i32
    %c0_i32_0 = arith.constant 0 : i32
    return %arg0, %c0_i32 : i32, i32
  }
  func.func @transform_2(%arg0: i32) -> (i32, i32) {
    %c0_i32 = arith.constant 0 : i32
    %c0_i32_0 = arith.constant 0 : i32
    return %arg0, %c0_i32 : i32, i32
  }
  func.func @transform_3(%arg0: i32) -> (i32, i32, i32) {
    %c0_i32 = arith.constant 0 : i32
    %c0_i32_0 = arith.constant 0 : i32
    %c0_i32_1 = arith.constant 0 : i32
    %c0_i32_2 = arith.constant 0 : i32
    return %c0_i32, %c0_i32_0, %c0_i32_1 : i32, i32, i32
  }
  func.func @transform_4(%arg0: i32) -> (i32, i32, i32) {
    %c0_i32 = arith.constant 0 : i32
    %c0_i32_0 = arith.constant 0 : i32
    %c0_i32_1 = arith.constant 0 : i32
    %c0_i32_2 = arith.constant 0 : i32
    return %c0_i32, %c0_i32_0, %c0_i32_1 : i32, i32, i32
  }
  func.func @transform_5(%arg0: i32) -> (i32, i32, i32) {
    %c0_i32 = arith.constant 0 : i32
    %c0_i32_0 = arith.constant 0 : i32
    %c0_i32_1 = arith.constant 0 : i32
    %c0_i32_2 = arith.constant 0 : i32
    return %c0_i32, %c0_i32_0, %c0_i32_1 : i32, i32, i32
  }
  func.func @transform_6(%arg0: i32) -> (i32, i32, i32) {
    %c0_i32 = arith.constant 0 : i32
    %c0_i32_0 = arith.constant 0 : i32
    %c0_i32_1 = arith.constant 0 : i32
    %c0_i32_2 = arith.constant 0 : i32
    return %c0_i32, %c0_i32_0, %c0_i32_1 : i32, i32, i32
  }
  func.func @transform_7(%arg0: i32) -> (i32, i32, i32) {
    %c0_i32 = arith.constant 0 : i32
    %c0_i32_0 = arith.constant 0 : i32
    %c0_i32_1 = arith.constant 0 : i32
    %c0_i32_2 = arith.constant 0 : i32
    return %c0_i32, %c0_i32_0, %c0_i32_1 : i32, i32, i32
  }
  func.func @transform_8(%arg0: i32) -> (i32, i32, i32) {
    %c0_i32 = arith.constant 0 : i32
    %c0_i32_0 = arith.constant 0 : i32
    %c0_i32_1 = arith.constant 0 : i32
    %c0_i32_2 = arith.constant 0 : i32
    return %c0_i32, %c0_i32_0, %c0_i32_1 : i32, i32, i32
  }
  func.func @transform_9(%arg0: i32) -> (i32, i32, i32) {
    %c0_i32 = arith.constant 0 : i32
    %c0_i32_0 = arith.constant 0 : i32
    %c0_i32_1 = arith.constant 0 : i32
    %c0_i32_2 = arith.constant 0 : i32
    return %c0_i32, %c0_i32_0, %c0_i32_1 : i32, i32, i32
  }
  func.func @transform_10(%arg0: i32) -> (i32, i32) {
    %c0_i32 = arith.constant 0 : i32
    %c0_i32_0 = arith.constant 0 : i32
    %c0_i32_1 = arith.constant 0 : i32
    return %c0_i32, %c0_i32_0 : i32, i32
  }
  func.func @transform_11(%arg0: i32) -> (i32, i32) {
    %c0_i32 = arith.constant 0 : i32
    %c0_i32_0 = arith.constant 0 : i32
    return %arg0, %c0_i32 : i32, i32
  }
}

module attributes {stable_mosaic.version = 11 : i64} {
  func.func @_attention_kernel(%arg0: i32, %arg1: memref<8x128xf32, #tpu.memory_space<vmem>>, %arg2: memref<8x128xf32, #tpu.memory_space<vmem>>, %arg3: memref<8x128xf32, #tpu.memory_space<vmem>>, %arg4: memref<4x128x8xf32, #tpu.memory_space<vmem>>, %arg5: memref<4x1x8xf32, #tpu.memory_space<vmem>>, %arg6: memref<4x128x8xf32, #tpu.memory_space<vmem>>, %arg7: memref<4x1x8xf32, #tpu.memory_space<vmem>>, %arg8: memref<4x128x8xf32, #tpu.memory_space<vmem>>, %arg9: memref<4x1x8xf32, #tpu.memory_space<vmem>>, %arg10: memref<4x8x128xf32, #tpu.memory_space<vmem>>, %arg11: memref<1x128xf32, #tpu.memory_space<vmem>>, %arg12: memref<8x128xf32, #tpu.memory_space<vmem>>) attributes {dimension_semantics = [#tpu.dimension_semantics<parallel>], iteration_bounds = array<i64: 2>, scalar_prefetch = 0 : i64, scratch_operands = 0 : i64, tpu.core_type = #tpu.core_type<tc>, window_params = [{transform_indices = @transform_0, window_bounds = array<i64: 8, 128>}, {transform_indices = @transform_1, window_bounds = array<i64: 8, 128>}, {transform_indices = @transform_2, window_bounds = array<i64: 8, 128>}, {pipeline_mode = #tpu.pipeline_mode<synchronous>, transform_indices = @transform_3, window_bounds = array<i64: 4, 128, 8>}, {pipeline_mode = #tpu.pipeline_mode<synchronous>, transform_indices = @transform_4, window_bounds = array<i64: 4, 1, 8>}, {pipeline_mode = #tpu.pipeline_mode<synchronous>, transform_indices = @transform_5, window_bounds = array<i64: 4, 128, 8>}, {pipeline_mode = #tpu.pipeline_mode<synchronous>, transform_indices = @transform_6, window_bounds = array<i64: 4, 1, 8>}, {pipeline_mode = #tpu.pipeline_mode<synchronous>, transform_indices = @transform_7, window_bounds = array<i64: 4, 128, 8>}, {pipeline_mode = #tpu.pipeline_mode<synchronous>, transform_indices = @transform_8, window_bounds = array<i64: 4, 1, 8>}, {pipeline_mode = #tpu.pipeline_mode<synchronous>, transform_indices = @transform_9, window_bounds = array<i64: 4, 8, 128>}, {pipeline_mode = #tpu.pipeline_mode<synchronous>, transform_indices = @transform_10, window_bounds = array<i64: 1, 128>}, {transform_indices = @transform_11, window_bounds = array<i64: 8, 128>}]} {
    %cst = arith.constant 0.000000e+00 : f32
    %0 = vector.broadcast %cst : f32 to vector<8x128xf32>
    %c0 = arith.constant 0 : index
    %c0_0 = arith.constant 0 : index
    %c0_1 = arith.constant 0 : index
    %1 = vector.load %arg4[%c0, %c0_0, %c0_1] : memref<4x128x8xf32, #tpu.memory_space<vmem>>, vector<1x128x8xf32>
    %2 = vector.shape_cast %1 : vector<1x128x8xf32> to vector<128x8xf32>
    %c0_2 = arith.constant 0 : index
    %c0_3 = arith.constant 0 : index
    %c0_4 = arith.constant 0 : index
    %3 = vector.load %arg6[%c0_2, %c0_3, %c0_4] : memref<4x128x8xf32, #tpu.memory_space<vmem>>, vector<1x128x8xf32>
    %4 = vector.shape_cast %3 : vector<1x128x8xf32> to vector<128x8xf32>
    %c0_5 = arith.constant 0 : index
    %c0_6 = arith.constant 0 : index
    %c0_7 = arith.constant 0 : index
    %5 = vector.load %arg8[%c0_5, %c0_6, %c0_7] : memref<4x128x8xf32, #tpu.memory_space<vmem>>, vector<1x128x8xf32>
    %6 = vector.shape_cast %5 : vector<1x128x8xf32> to vector<128x8xf32>
    %c0_8 = arith.constant 0 : index
    %c0_9 = arith.constant 0 : index
    %c0_10 = arith.constant 0 : index
    %7 = vector.load %arg10[%c0_8, %c0_9, %c0_10] : memref<4x8x128xf32, #tpu.memory_space<vmem>>, vector<1x8x128xf32>
    %8 = vector.shape_cast %7 : vector<1x8x128xf32> to vector<8x128xf32>
    %c0_11 = arith.constant 0 : index
    %c0_12 = arith.constant 0 : index
    %9 = vector.load %arg1[%c0_11, %c0_12] : memref<8x128xf32, #tpu.memory_space<vmem>>, vector<8x128xf32>
    %cst_13 = arith.constant dense<0.000000e+00> : vector<8x8xf32>
    %10 = tpu.matmul %9, %2, %cst_13 {dimension_numbers = #tpu.dot_dimension_numbers<[1], [0], [0], [1], [0, 0, 1, 1], [], []>} : vector<8x128xf32>, vector<128x8xf32>, vector<8x8xf32> -> vector<8x8xf32>
    %c0_14 = arith.constant 0 : index
    %c0_15 = arith.constant 0 : index
    %c0_16 = arith.constant 0 : index
    %11 = vector.load %arg5[%c0_14, %c0_15, %c0_16] : memref<4x1x8xf32, #tpu.memory_space<vmem>>, vector<1x1x8xf32>
    %12 = vector.shape_cast %11 : vector<1x1x8xf32> to vector<1x8xf32>
    %13 = vector.broadcast %12 : vector<1x8xf32> to vector<8x8xf32>
    %14 = arith.addf %10, %13 : vector<8x8xf32>
    %c0_17 = arith.constant 0 : index
    %c0_18 = arith.constant 0 : index
    %15 = vector.load %arg2[%c0_17, %c0_18] : memref<8x128xf32, #tpu.memory_space<vmem>>, vector<8x128xf32>
    %cst_19 = arith.constant dense<0.000000e+00> : vector<8x8xf32>
    %16 = tpu.matmul %15, %4, %cst_19 {dimension_numbers = #tpu.dot_dimension_numbers<[1], [0], [0], [1], [0, 0, 1, 1], [], []>} : vector<8x128xf32>, vector<128x8xf32>, vector<8x8xf32> -> vector<8x8xf32>
    %c0_20 = arith.constant 0 : index
    %c0_21 = arith.constant 0 : index
    %c0_22 = arith.constant 0 : index
    %17 = vector.load %arg7[%c0_20, %c0_21, %c0_22] : memref<4x1x8xf32, #tpu.memory_space<vmem>>, vector<1x1x8xf32>
    %18 = vector.shape_cast %17 : vector<1x1x8xf32> to vector<1x8xf32>
    %19 = vector.broadcast %18 : vector<1x8xf32> to vector<8x8xf32>
    %20 = arith.addf %16, %19 : vector<8x8xf32>
    %c0_23 = arith.constant 0 : index
    %c0_24 = arith.constant 0 : index
    %21 = vector.load %arg3[%c0_23, %c0_24] : memref<8x128xf32, #tpu.memory_space<vmem>>, vector<8x128xf32>
    %cst_25 = arith.constant dense<0.000000e+00> : vector<8x8xf32>
    %22 = tpu.matmul %21, %6, %cst_25 {dimension_numbers = #tpu.dot_dimension_numbers<[1], [0], [0], [1], [0, 0, 1, 1], [], []>} : vector<8x128xf32>, vector<128x8xf32>, vector<8x8xf32> -> vector<8x8xf32>
    %c0_26 = arith.constant 0 : index
    %c0_27 = arith.constant 0 : index
    %c0_28 = arith.constant 0 : index
    %23 = vector.load %arg9[%c0_26, %c0_27, %c0_28] : memref<4x1x8xf32, #tpu.memory_space<vmem>>, vector<1x1x8xf32>
    %24 = vector.shape_cast %23 : vector<1x1x8xf32> to vector<1x8xf32>
    %25 = vector.broadcast %24 : vector<1x8xf32> to vector<8x8xf32>
    %26 = arith.addf %22, %25 : vector<8x8xf32>
    %27 = vector.shape_cast %14 : vector<8x8xf32> to vector<1x8x8xf32>
    %28 = vector.shape_cast %20 : vector<8x8xf32> to vector<1x8x8xf32>
    %29 = vector.shape_cast %26 : vector<8x8xf32> to vector<1x8x8xf32>
    %cst_29 = arith.constant dense<0.000000e+00> : vector<1x8x8xf32>
    %30 = tpu.matmul %27, %28, %cst_29 {dimension_numbers = #tpu.dot_dimension_numbers<[2], [2], [1], [1], [0, 0, 0, 1, 1, 1], [0], [0]>} : vector<1x8x8xf32>, vector<1x8x8xf32>, vector<1x8x8xf32> -> vector<1x8x8xf32>
    %cst_30 = arith.constant dense<0xFF800000> : vector<1x8xf32>
    %31 = vector.multi_reduction <maximumf>, %30, %cst_30 [2] : vector<1x8x8xf32> to vector<1x8xf32>
    %32 = vector.shape_cast %31 : vector<1x8xf32> to vector<1x8x1xf32>
    %33 = vector.broadcast %32 : vector<1x8x1xf32> to vector<1x8x8xf32>
    %34 = arith.subf %30, %33 : vector<1x8x8xf32>
    %35 = math.exp %34 : vector<1x8x8xf32>
    %cst_31 = arith.constant dense<0.000000e+00> : vector<1x8xf32>
    %36 = vector.multi_reduction <add>, %35, %cst_31 [2] : vector<1x8x8xf32> to vector<1x8xf32>
    %37 = vector.shape_cast %36 : vector<1x8xf32> to vector<1x8x1xf32>
    %38 = tpu.reciprocal %37 {approx = true} : vector<1x8x1xf32> -> vector<1x8x1xf32>
    %39 = arith.mulf %37, %38 : vector<1x8x1xf32>
    %cst_32 = arith.constant 2.000000e+00 : f32
    %40 = vector.broadcast %cst_32 : f32 to vector<1x8x1xf32>
    %41 = arith.subf %40, %39 : vector<1x8x1xf32>
    %42 = arith.mulf %38, %41 : vector<1x8x1xf32>
    %43 = vector.broadcast %42 : vector<1x8x1xf32> to vector<1x8x8xf32>
    %44 = arith.mulf %35, %43 : vector<1x8x8xf32>
    %cst_33 = arith.constant dense<0.000000e+00> : vector<1x8x8xf32>
    %45 = tpu.matmul %44, %29, %cst_33 {dimension_numbers = #tpu.dot_dimension_numbers<[2], [1], [1], [2], [0, 0, 0, 1, 1, 2], [0], [0]>} : vector<1x8x8xf32>, vector<1x8x8xf32>, vector<1x8x8xf32> -> vector<1x8x8xf32>
    %46 = vector.shape_cast %45 : vector<1x8x8xf32> to vector<8x8xf32>
    %cst_34 = arith.constant dense<0.000000e+00> : vector<8x128xf32>
    %47 = tpu.matmul %46, %8, %cst_34 {dimension_numbers = #tpu.dot_dimension_numbers<[1], [0], [0], [1], [0, 0, 1, 1], [], []>} : vector<8x8xf32>, vector<8x128xf32>, vector<8x128xf32> -> vector<8x128xf32>
    %48 = arith.addf %0, %47 : vector<8x128xf32>
    %c1 = arith.constant 1 : index
    %c0_35 = arith.constant 0 : index
    %c0_36 = arith.constant 0 : index
    %49 = vector.load %arg4[%c1, %c0_35, %c0_36] : memref<4x128x8xf32, #tpu.memory_space<vmem>>, vector<1x128x8xf32>
    %50 = vector.shape_cast %49 : vector<1x128x8xf32> to vector<128x8xf32>
    %c1_37 = arith.constant 1 : index
    %c0_38 = arith.constant 0 : index
    %c0_39 = arith.constant 0 : index
    %51 = vector.load %arg6[%c1_37, %c0_38, %c0_39] : memref<4x128x8xf32, #tpu.memory_space<vmem>>, vector<1x128x8xf32>
    %52 = vector.shape_cast %51 : vector<1x128x8xf32> to vector<128x8xf32>
    %c1_40 = arith.constant 1 : index
    %c0_41 = arith.constant 0 : index
    %c0_42 = arith.constant 0 : index
    %53 = vector.load %arg8[%c1_40, %c0_41, %c0_42] : memref<4x128x8xf32, #tpu.memory_space<vmem>>, vector<1x128x8xf32>
    %54 = vector.shape_cast %53 : vector<1x128x8xf32> to vector<128x8xf32>
    %c1_43 = arith.constant 1 : index
    %c0_44 = arith.constant 0 : index
    %c0_45 = arith.constant 0 : index
    %55 = vector.load %arg10[%c1_43, %c0_44, %c0_45] : memref<4x8x128xf32, #tpu.memory_space<vmem>>, vector<1x8x128xf32>
    %56 = vector.shape_cast %55 : vector<1x8x128xf32> to vector<8x128xf32>
    %c0_46 = arith.constant 0 : index
    %c0_47 = arith.constant 0 : index
    %57 = vector.load %arg1[%c0_46, %c0_47] : memref<8x128xf32, #tpu.memory_space<vmem>>, vector<8x128xf32>
    %cst_48 = arith.constant dense<0.000000e+00> : vector<8x8xf32>
    %58 = tpu.matmul %57, %50, %cst_48 {dimension_numbers = #tpu.dot_dimension_numbers<[1], [0], [0], [1], [0, 0, 1, 1], [], []>} : vector<8x128xf32>, vector<128x8xf32>, vector<8x8xf32> -> vector<8x8xf32>
    %c1_49 = arith.constant 1 : index
    %c0_50 = arith.constant 0 : index
    %c0_51 = arith.constant 0 : index
    %59 = vector.load %arg5[%c1_49, %c0_50, %c0_51] : memref<4x1x8xf32, #tpu.memory_space<vmem>>, vector<1x1x8xf32>
    %60 = vector.shape_cast %59 : vector<1x1x8xf32> to vector<1x8xf32>
    %61 = vector.broadcast %60 : vector<1x8xf32> to vector<8x8xf32>
    %62 = arith.addf %58, %61 : vector<8x8xf32>
    %c0_52 = arith.constant 0 : index
    %c0_53 = arith.constant 0 : index
    %63 = vector.load %arg2[%c0_52, %c0_53] : memref<8x128xf32, #tpu.memory_space<vmem>>, vector<8x128xf32>
    %cst_54 = arith.constant dense<0.000000e+00> : vector<8x8xf32>
    %64 = tpu.matmul %63, %52, %cst_54 {dimension_numbers = #tpu.dot_dimension_numbers<[1], [0], [0], [1], [0, 0, 1, 1], [], []>} : vector<8x128xf32>, vector<128x8xf32>, vector<8x8xf32> -> vector<8x8xf32>
    %c1_55 = arith.constant 1 : index
    %c0_56 = arith.constant 0 : index
    %c0_57 = arith.constant 0 : index
    %65 = vector.load %arg7[%c1_55, %c0_56, %c0_57] : memref<4x1x8xf32, #tpu.memory_space<vmem>>, vector<1x1x8xf32>
    %66 = vector.shape_cast %65 : vector<1x1x8xf32> to vector<1x8xf32>
    %67 = vector.broadcast %66 : vector<1x8xf32> to vector<8x8xf32>
    %68 = arith.addf %64, %67 : vector<8x8xf32>
    %c0_58 = arith.constant 0 : index
    %c0_59 = arith.constant 0 : index
    %69 = vector.load %arg3[%c0_58, %c0_59] : memref<8x128xf32, #tpu.memory_space<vmem>>, vector<8x128xf32>
    %cst_60 = arith.constant dense<0.000000e+00> : vector<8x8xf32>
    %70 = tpu.matmul %69, %54, %cst_60 {dimension_numbers = #tpu.dot_dimension_numbers<[1], [0], [0], [1], [0, 0, 1, 1], [], []>} : vector<8x128xf32>, vector<128x8xf32>, vector<8x8xf32> -> vector<8x8xf32>
    %c1_61 = arith.constant 1 : index
    %c0_62 = arith.constant 0 : index
    %c0_63 = arith.constant 0 : index
    %71 = vector.load %arg9[%c1_61, %c0_62, %c0_63] : memref<4x1x8xf32, #tpu.memory_space<vmem>>, vector<1x1x8xf32>
    %72 = vector.shape_cast %71 : vector<1x1x8xf32> to vector<1x8xf32>
    %73 = vector.broadcast %72 : vector<1x8xf32> to vector<8x8xf32>
    %74 = arith.addf %70, %73 : vector<8x8xf32>
    %75 = vector.shape_cast %62 : vector<8x8xf32> to vector<1x8x8xf32>
    %76 = vector.shape_cast %68 : vector<8x8xf32> to vector<1x8x8xf32>
    %77 = vector.shape_cast %74 : vector<8x8xf32> to vector<1x8x8xf32>
    %cst_64 = arith.constant dense<0.000000e+00> : vector<1x8x8xf32>
    %78 = tpu.matmul %75, %76, %cst_64 {dimension_numbers = #tpu.dot_dimension_numbers<[2], [2], [1], [1], [0, 0, 0, 1, 1, 1], [0], [0]>} : vector<1x8x8xf32>, vector<1x8x8xf32>, vector<1x8x8xf32> -> vector<1x8x8xf32>
    %cst_65 = arith.constant dense<0xFF800000> : vector<1x8xf32>
    %79 = vector.multi_reduction <maximumf>, %78, %cst_65 [2] : vector<1x8x8xf32> to vector<1x8xf32>
    %80 = vector.shape_cast %79 : vector<1x8xf32> to vector<1x8x1xf32>
    %81 = vector.broadcast %80 : vector<1x8x1xf32> to vector<1x8x8xf32>
    %82 = arith.subf %78, %81 : vector<1x8x8xf32>
    %83 = math.exp %82 : vector<1x8x8xf32>
    %cst_66 = arith.constant dense<0.000000e+00> : vector<1x8xf32>
    %84 = vector.multi_reduction <add>, %83, %cst_66 [2] : vector<1x8x8xf32> to vector<1x8xf32>
    %85 = vector.shape_cast %84 : vector<1x8xf32> to vector<1x8x1xf32>
    %86 = tpu.reciprocal %85 {approx = true} : vector<1x8x1xf32> -> vector<1x8x1xf32>
    %87 = arith.mulf %85, %86 : vector<1x8x1xf32>
    %cst_67 = arith.constant 2.000000e+00 : f32
    %88 = vector.broadcast %cst_67 : f32 to vector<1x8x1xf32>
    %89 = arith.subf %88, %87 : vector<1x8x1xf32>
    %90 = arith.mulf %86, %89 : vector<1x8x1xf32>
    %91 = vector.broadcast %90 : vector<1x8x1xf32> to vector<1x8x8xf32>
    %92 = arith.mulf %83, %91 : vector<1x8x8xf32>
    %cst_68 = arith.constant dense<0.000000e+00> : vector<1x8x8xf32>
    %93 = tpu.matmul %92, %77, %cst_68 {dimension_numbers = #tpu.dot_dimension_numbers<[2], [1], [1], [2], [0, 0, 0, 1, 1, 2], [0], [0]>} : vector<1x8x8xf32>, vector<1x8x8xf32>, vector<1x8x8xf32> -> vector<1x8x8xf32>
    %94 = vector.shape_cast %93 : vector<1x8x8xf32> to vector<8x8xf32>
    %cst_69 = arith.constant dense<0.000000e+00> : vector<8x128xf32>
    %95 = tpu.matmul %94, %56, %cst_69 {dimension_numbers = #tpu.dot_dimension_numbers<[1], [0], [0], [1], [0, 0, 1, 1], [], []>} : vector<8x8xf32>, vector<8x128xf32>, vector<8x128xf32> -> vector<8x128xf32>
    %96 = arith.addf %48, %95 : vector<8x128xf32>
    %c2 = arith.constant 2 : index
    %c0_70 = arith.constant 0 : index
    %c0_71 = arith.constant 0 : index
    %97 = vector.load %arg4[%c2, %c0_70, %c0_71] : memref<4x128x8xf32, #tpu.memory_space<vmem>>, vector<1x128x8xf32>
    %98 = vector.shape_cast %97 : vector<1x128x8xf32> to vector<128x8xf32>
    %c2_72 = arith.constant 2 : index
    %c0_73 = arith.constant 0 : index
    %c0_74 = arith.constant 0 : index
    %99 = vector.load %arg6[%c2_72, %c0_73, %c0_74] : memref<4x128x8xf32, #tpu.memory_space<vmem>>, vector<1x128x8xf32>
    %100 = vector.shape_cast %99 : vector<1x128x8xf32> to vector<128x8xf32>
    %c2_75 = arith.constant 2 : index
    %c0_76 = arith.constant 0 : index
    %c0_77 = arith.constant 0 : index
    %101 = vector.load %arg8[%c2_75, %c0_76, %c0_77] : memref<4x128x8xf32, #tpu.memory_space<vmem>>, vector<1x128x8xf32>
    %102 = vector.shape_cast %101 : vector<1x128x8xf32> to vector<128x8xf32>
    %c2_78 = arith.constant 2 : index
    %c0_79 = arith.constant 0 : index
    %c0_80 = arith.constant 0 : index
    %103 = vector.load %arg10[%c2_78, %c0_79, %c0_80] : memref<4x8x128xf32, #tpu.memory_space<vmem>>, vector<1x8x128xf32>
    %104 = vector.shape_cast %103 : vector<1x8x128xf32> to vector<8x128xf32>
    %c0_81 = arith.constant 0 : index
    %c0_82 = arith.constant 0 : index
    %105 = vector.load %arg1[%c0_81, %c0_82] : memref<8x128xf32, #tpu.memory_space<vmem>>, vector<8x128xf32>
    %cst_83 = arith.constant dense<0.000000e+00> : vector<8x8xf32>
    %106 = tpu.matmul %105, %98, %cst_83 {dimension_numbers = #tpu.dot_dimension_numbers<[1], [0], [0], [1], [0, 0, 1, 1], [], []>} : vector<8x128xf32>, vector<128x8xf32>, vector<8x8xf32> -> vector<8x8xf32>
    %c2_84 = arith.constant 2 : index
    %c0_85 = arith.constant 0 : index
    %c0_86 = arith.constant 0 : index
    %107 = vector.load %arg5[%c2_84, %c0_85, %c0_86] : memref<4x1x8xf32, #tpu.memory_space<vmem>>, vector<1x1x8xf32>
    %108 = vector.shape_cast %107 : vector<1x1x8xf32> to vector<1x8xf32>
    %109 = vector.broadcast %108 : vector<1x8xf32> to vector<8x8xf32>
    %110 = arith.addf %106, %109 : vector<8x8xf32>
    %c0_87 = arith.constant 0 : index
    %c0_88 = arith.constant 0 : index
    %111 = vector.load %arg2[%c0_87, %c0_88] : memref<8x128xf32, #tpu.memory_space<vmem>>, vector<8x128xf32>
    %cst_89 = arith.constant dense<0.000000e+00> : vector<8x8xf32>
    %112 = tpu.matmul %111, %100, %cst_89 {dimension_numbers = #tpu.dot_dimension_numbers<[1], [0], [0], [1], [0, 0, 1, 1], [], []>} : vector<8x128xf32>, vector<128x8xf32>, vector<8x8xf32> -> vector<8x8xf32>
    %c2_90 = arith.constant 2 : index
    %c0_91 = arith.constant 0 : index
    %c0_92 = arith.constant 0 : index
    %113 = vector.load %arg7[%c2_90, %c0_91, %c0_92] : memref<4x1x8xf32, #tpu.memory_space<vmem>>, vector<1x1x8xf32>
    %114 = vector.shape_cast %113 : vector<1x1x8xf32> to vector<1x8xf32>
    %115 = vector.broadcast %114 : vector<1x8xf32> to vector<8x8xf32>
    %116 = arith.addf %112, %115 : vector<8x8xf32>
    %c0_93 = arith.constant 0 : index
    %c0_94 = arith.constant 0 : index
    %117 = vector.load %arg3[%c0_93, %c0_94] : memref<8x128xf32, #tpu.memory_space<vmem>>, vector<8x128xf32>
    %cst_95 = arith.constant dense<0.000000e+00> : vector<8x8xf32>
    %118 = tpu.matmul %117, %102, %cst_95 {dimension_numbers = #tpu.dot_dimension_numbers<[1], [0], [0], [1], [0, 0, 1, 1], [], []>} : vector<8x128xf32>, vector<128x8xf32>, vector<8x8xf32> -> vector<8x8xf32>
    %c2_96 = arith.constant 2 : index
    %c0_97 = arith.constant 0 : index
    %c0_98 = arith.constant 0 : index
    %119 = vector.load %arg9[%c2_96, %c0_97, %c0_98] : memref<4x1x8xf32, #tpu.memory_space<vmem>>, vector<1x1x8xf32>
    %120 = vector.shape_cast %119 : vector<1x1x8xf32> to vector<1x8xf32>
    %121 = vector.broadcast %120 : vector<1x8xf32> to vector<8x8xf32>
    %122 = arith.addf %118, %121 : vector<8x8xf32>
    %123 = vector.shape_cast %110 : vector<8x8xf32> to vector<1x8x8xf32>
    %124 = vector.shape_cast %116 : vector<8x8xf32> to vector<1x8x8xf32>
    %125 = vector.shape_cast %122 : vector<8x8xf32> to vector<1x8x8xf32>
    %cst_99 = arith.constant dense<0.000000e+00> : vector<1x8x8xf32>
    %126 = tpu.matmul %123, %124, %cst_99 {dimension_numbers = #tpu.dot_dimension_numbers<[2], [2], [1], [1], [0, 0, 0, 1, 1, 1], [0], [0]>} : vector<1x8x8xf32>, vector<1x8x8xf32>, vector<1x8x8xf32> -> vector<1x8x8xf32>
    %cst_100 = arith.constant dense<0xFF800000> : vector<1x8xf32>
    %127 = vector.multi_reduction <maximumf>, %126, %cst_100 [2] : vector<1x8x8xf32> to vector<1x8xf32>
    %128 = vector.shape_cast %127 : vector<1x8xf32> to vector<1x8x1xf32>
    %129 = vector.broadcast %128 : vector<1x8x1xf32> to vector<1x8x8xf32>
    %130 = arith.subf %126, %129 : vector<1x8x8xf32>
    %131 = math.exp %130 : vector<1x8x8xf32>
    %cst_101 = arith.constant dense<0.000000e+00> : vector<1x8xf32>
    %132 = vector.multi_reduction <add>, %131, %cst_101 [2] : vector<1x8x8xf32> to vector<1x8xf32>
    %133 = vector.shape_cast %132 : vector<1x8xf32> to vector<1x8x1xf32>
    %134 = tpu.reciprocal %133 {approx = true} : vector<1x8x1xf32> -> vector<1x8x1xf32>
    %135 = arith.mulf %133, %134 : vector<1x8x1xf32>
    %cst_102 = arith.constant 2.000000e+00 : f32
    %136 = vector.broadcast %cst_102 : f32 to vector<1x8x1xf32>
    %137 = arith.subf %136, %135 : vector<1x8x1xf32>
    %138 = arith.mulf %134, %137 : vector<1x8x1xf32>
    %139 = vector.broadcast %138 : vector<1x8x1xf32> to vector<1x8x8xf32>
    %140 = arith.mulf %131, %139 : vector<1x8x8xf32>
    %cst_103 = arith.constant dense<0.000000e+00> : vector<1x8x8xf32>
    %141 = tpu.matmul %140, %125, %cst_103 {dimension_numbers = #tpu.dot_dimension_numbers<[2], [1], [1], [2], [0, 0, 0, 1, 1, 2], [0], [0]>} : vector<1x8x8xf32>, vector<1x8x8xf32>, vector<1x8x8xf32> -> vector<1x8x8xf32>
    %142 = vector.shape_cast %141 : vector<1x8x8xf32> to vector<8x8xf32>
    %cst_104 = arith.constant dense<0.000000e+00> : vector<8x128xf32>
    %143 = tpu.matmul %142, %104, %cst_104 {dimension_numbers = #tpu.dot_dimension_numbers<[1], [0], [0], [1], [0, 0, 1, 1], [], []>} : vector<8x8xf32>, vector<8x128xf32>, vector<8x128xf32> -> vector<8x128xf32>
    %144 = arith.addf %96, %143 : vector<8x128xf32>
    %c3 = arith.constant 3 : index
    %c0_105 = arith.constant 0 : index
    %c0_106 = arith.constant 0 : index
    %145 = vector.load %arg4[%c3, %c0_105, %c0_106] : memref<4x128x8xf32, #tpu.memory_space<vmem>>, vector<1x128x8xf32>
    %146 = vector.shape_cast %145 : vector<1x128x8xf32> to vector<128x8xf32>
    %c3_107 = arith.constant 3 : index
    %c0_108 = arith.constant 0 : index
    %c0_109 = arith.constant 0 : index
    %147 = vector.load %arg6[%c3_107, %c0_108, %c0_109] : memref<4x128x8xf32, #tpu.memory_space<vmem>>, vector<1x128x8xf32>
    %148 = vector.shape_cast %147 : vector<1x128x8xf32> to vector<128x8xf32>
    %c3_110 = arith.constant 3 : index
    %c0_111 = arith.constant 0 : index
    %c0_112 = arith.constant 0 : index
    %149 = vector.load %arg8[%c3_110, %c0_111, %c0_112] : memref<4x128x8xf32, #tpu.memory_space<vmem>>, vector<1x128x8xf32>
    %150 = vector.shape_cast %149 : vector<1x128x8xf32> to vector<128x8xf32>
    %c3_113 = arith.constant 3 : index
    %c0_114 = arith.constant 0 : index
    %c0_115 = arith.constant 0 : index
    %151 = vector.load %arg10[%c3_113, %c0_114, %c0_115] : memref<4x8x128xf32, #tpu.memory_space<vmem>>, vector<1x8x128xf32>
    %152 = vector.shape_cast %151 : vector<1x8x128xf32> to vector<8x128xf32>
    %c0_116 = arith.constant 0 : index
    %c0_117 = arith.constant 0 : index
    %153 = vector.load %arg1[%c0_116, %c0_117] : memref<8x128xf32, #tpu.memory_space<vmem>>, vector<8x128xf32>
    %cst_118 = arith.constant dense<0.000000e+00> : vector<8x8xf32>
    %154 = tpu.matmul %153, %146, %cst_118 {dimension_numbers = #tpu.dot_dimension_numbers<[1], [0], [0], [1], [0, 0, 1, 1], [], []>} : vector<8x128xf32>, vector<128x8xf32>, vector<8x8xf32> -> vector<8x8xf32>
    %c3_119 = arith.constant 3 : index
    %c0_120 = arith.constant 0 : index
    %c0_121 = arith.constant 0 : index
    %155 = vector.load %arg5[%c3_119, %c0_120, %c0_121] : memref<4x1x8xf32, #tpu.memory_space<vmem>>, vector<1x1x8xf32>
    %156 = vector.shape_cast %155 : vector<1x1x8xf32> to vector<1x8xf32>
    %157 = vector.broadcast %156 : vector<1x8xf32> to vector<8x8xf32>
    %158 = arith.addf %154, %157 : vector<8x8xf32>
    %c0_122 = arith.constant 0 : index
    %c0_123 = arith.constant 0 : index
    %159 = vector.load %arg2[%c0_122, %c0_123] : memref<8x128xf32, #tpu.memory_space<vmem>>, vector<8x128xf32>
    %cst_124 = arith.constant dense<0.000000e+00> : vector<8x8xf32>
    %160 = tpu.matmul %159, %148, %cst_124 {dimension_numbers = #tpu.dot_dimension_numbers<[1], [0], [0], [1], [0, 0, 1, 1], [], []>} : vector<8x128xf32>, vector<128x8xf32>, vector<8x8xf32> -> vector<8x8xf32>
    %c3_125 = arith.constant 3 : index
    %c0_126 = arith.constant 0 : index
    %c0_127 = arith.constant 0 : index
    %161 = vector.load %arg7[%c3_125, %c0_126, %c0_127] : memref<4x1x8xf32, #tpu.memory_space<vmem>>, vector<1x1x8xf32>
    %162 = vector.shape_cast %161 : vector<1x1x8xf32> to vector<1x8xf32>
    %163 = vector.broadcast %162 : vector<1x8xf32> to vector<8x8xf32>
    %164 = arith.addf %160, %163 : vector<8x8xf32>
    %c0_128 = arith.constant 0 : index
    %c0_129 = arith.constant 0 : index
    %165 = vector.load %arg3[%c0_128, %c0_129] : memref<8x128xf32, #tpu.memory_space<vmem>>, vector<8x128xf32>
    %cst_130 = arith.constant dense<0.000000e+00> : vector<8x8xf32>
    %166 = tpu.matmul %165, %150, %cst_130 {dimension_numbers = #tpu.dot_dimension_numbers<[1], [0], [0], [1], [0, 0, 1, 1], [], []>} : vector<8x128xf32>, vector<128x8xf32>, vector<8x8xf32> -> vector<8x8xf32>
    %c3_131 = arith.constant 3 : index
    %c0_132 = arith.constant 0 : index
    %c0_133 = arith.constant 0 : index
    %167 = vector.load %arg9[%c3_131, %c0_132, %c0_133] : memref<4x1x8xf32, #tpu.memory_space<vmem>>, vector<1x1x8xf32>
    %168 = vector.shape_cast %167 : vector<1x1x8xf32> to vector<1x8xf32>
    %169 = vector.broadcast %168 : vector<1x8xf32> to vector<8x8xf32>
    %170 = arith.addf %166, %169 : vector<8x8xf32>
    %171 = vector.shape_cast %158 : vector<8x8xf32> to vector<1x8x8xf32>
    %172 = vector.shape_cast %164 : vector<8x8xf32> to vector<1x8x8xf32>
    %173 = vector.shape_cast %170 : vector<8x8xf32> to vector<1x8x8xf32>
    %cst_134 = arith.constant dense<0.000000e+00> : vector<1x8x8xf32>
    %174 = tpu.matmul %171, %172, %cst_134 {dimension_numbers = #tpu.dot_dimension_numbers<[2], [2], [1], [1], [0, 0, 0, 1, 1, 1], [0], [0]>} : vector<1x8x8xf32>, vector<1x8x8xf32>, vector<1x8x8xf32> -> vector<1x8x8xf32>
    %cst_135 = arith.constant dense<0xFF800000> : vector<1x8xf32>
    %175 = vector.multi_reduction <maximumf>, %174, %cst_135 [2] : vector<1x8x8xf32> to vector<1x8xf32>
    %176 = vector.shape_cast %175 : vector<1x8xf32> to vector<1x8x1xf32>
    %177 = vector.broadcast %176 : vector<1x8x1xf32> to vector<1x8x8xf32>
    %178 = arith.subf %174, %177 : vector<1x8x8xf32>
    %179 = math.exp %178 : vector<1x8x8xf32>
    %cst_136 = arith.constant dense<0.000000e+00> : vector<1x8xf32>
    %180 = vector.multi_reduction <add>, %179, %cst_136 [2] : vector<1x8x8xf32> to vector<1x8xf32>
    %181 = vector.shape_cast %180 : vector<1x8xf32> to vector<1x8x1xf32>
    %182 = tpu.reciprocal %181 {approx = true} : vector<1x8x1xf32> -> vector<1x8x1xf32>
    %183 = arith.mulf %181, %182 : vector<1x8x1xf32>
    %cst_137 = arith.constant 2.000000e+00 : f32
    %184 = vector.broadcast %cst_137 : f32 to vector<1x8x1xf32>
    %185 = arith.subf %184, %183 : vector<1x8x1xf32>
    %186 = arith.mulf %182, %185 : vector<1x8x1xf32>
    %187 = vector.broadcast %186 : vector<1x8x1xf32> to vector<1x8x8xf32>
    %188 = arith.mulf %179, %187 : vector<1x8x8xf32>
    %cst_138 = arith.constant dense<0.000000e+00> : vector<1x8x8xf32>
    %189 = tpu.matmul %188, %173, %cst_138 {dimension_numbers = #tpu.dot_dimension_numbers<[2], [1], [1], [2], [0, 0, 0, 1, 1, 2], [0], [0]>} : vector<1x8x8xf32>, vector<1x8x8xf32>, vector<1x8x8xf32> -> vector<1x8x8xf32>
    %190 = vector.shape_cast %189 : vector<1x8x8xf32> to vector<8x8xf32>
    %cst_139 = arith.constant dense<0.000000e+00> : vector<8x128xf32>
    %191 = tpu.matmul %190, %152, %cst_139 {dimension_numbers = #tpu.dot_dimension_numbers<[1], [0], [0], [1], [0, 0, 1, 1], [], []>} : vector<8x8xf32>, vector<8x128xf32>, vector<8x128xf32> -> vector<8x128xf32>
    %192 = arith.addf %144, %191 : vector<8x128xf32>
    %c0_140 = arith.constant 0 : index
    %c0_141 = arith.constant 0 : index
    %193 = vector.load %arg11[%c0_140, %c0_141] : memref<1x128xf32, #tpu.memory_space<vmem>>, vector<1x128xf32>
    %194 = vector.broadcast %193 : vector<1x128xf32> to vector<8x128xf32>
    %195 = arith.addf %192, %194 : vector<8x128xf32>
    %c0_142 = arith.constant 0 : index
    %c0_143 = arith.constant 0 : index
    %196 = vector.load %arg12[%c0_142, %c0_143] : memref<8x128xf32, #tpu.memory_space<vmem>>, vector<8x128xf32>
    tpu.vector_store %arg12[%c0_142, %c0_143], %195 {strides = array<i32>} : memref<8x128xf32, #tpu.memory_space<vmem>>, vector<8x128xf32>,
    return
  }
  func.func @transform_0(%arg0: i32) -> (i32, i32) {
    %c0_i32 = arith.constant 0 : i32
    %c0_i32_0 = arith.constant 0 : i32
    return %arg0, %c0_i32 : i32, i32
  }
  func.func @transform_1(%arg0: i32) -> (i32, i32) {
    %c0_i32 = arith.constant 0 : i32
    %c0_i32_0 = arith.constant 0 : i32
    return %arg0, %c0_i32 : i32, i32
  }
  func.func @transform_2(%arg0: i32) -> (i32, i32) {
    %c0_i32 = arith.constant 0 : i32
    %c0_i32_0 = arith.constant 0 : i32
    return %arg0, %c0_i32 : i32, i32
  }
  func.func @transform_3(%arg0: i32) -> (i32, i32, i32) {
    %c0_i32 = arith.constant 0 : i32
    %c0_i32_0 = arith.constant 0 : i32
    %c0_i32_1 = arith.constant 0 : i32
    %c0_i32_2 = arith.constant 0 : i32
    return %c0_i32, %c0_i32_0, %c0_i32_1 : i32, i32, i32
  }
  func.func @transform_4(%arg0: i32) -> (i32, i32, i32) {
    %c0_i32 = arith.constant 0 : i32
    %c0_i32_0 = arith.constant 0 : i32
    %c0_i32_1 = arith.constant 0 : i32
    %c0_i32_2 = arith.constant 0 : i32
    return %c0_i32, %c0_i32_0, %c0_i32_1 : i32, i32, i32
  }
  func.func @transform_5(%arg0: i32) -> (i32, i32, i32) {
    %c0_i32 = arith.constant 0 : i32
    %c0_i32_0 = arith.constant 0 : i32
    %c0_i32_1 = arith.constant 0 : i32
    %c0_i32_2 = arith.constant 0 : i32
    return %c0_i32, %c0_i32_0, %c0_i32_1 : i32, i32, i32
  }
  func.func @transform_6(%arg0: i32) -> (i32, i32, i32) {
    %c0_i32 = arith.constant 0 : i32
    %c0_i32_0 = arith.constant 0 : i32
    %c0_i32_1 = arith.constant 0 : i32
    %c0_i32_2 = arith.constant 0 : i32
    return %c0_i32, %c0_i32_0, %c0_i32_1 : i32, i32, i32
  }
  func.func @transform_7(%arg0: i32) -> (i32, i32, i32) {
    %c0_i32 = arith.constant 0 : i32
    %c0_i32_0 = arith.constant 0 : i32
    %c0_i32_1 = arith.constant 0 : i32
    %c0_i32_2 = arith.constant 0 : i32
    return %c0_i32, %c0_i32_0, %c0_i32_1 : i32, i32, i32
  }
  func.func @transform_8(%arg0: i32) -> (i32, i32, i32) {
    %c0_i32 = arith.constant 0 : i32
    %c0_i32_0 = arith.constant 0 : i32
    %c0_i32_1 = arith.constant 0 : i32
    %c0_i32_2 = arith.constant 0 : i32
    return %c0_i32, %c0_i32_0, %c0_i32_1 : i32, i32, i32
  }
  func.func @transform_9(%arg0: i32) -> (i32, i32, i32) {
    %c0_i32 = arith.constant 0 : i32
    %c0_i32_0 = arith.constant 0 : i32
    %c0_i32_1 = arith.constant 0 : i32
    %c0_i32_2 = arith.constant 0 : i32
    return %c0_i32, %c0_i32_0, %c0_i32_1 : i32, i32, i32
  }
  func.func @transform_10(%arg0: i32) -> (i32, i32) {
    %c0_i32 = arith.constant 0 : i32
    %c0_i32_0 = arith.constant 0 : i32
    %c0_i32_1 = arith.constant 0 : i32
    return %c0_i32, %c0_i32_0 : i32, i32
  }
  func.func @transform_11(%arg0: i32) -> (i32, i32) {
    %c0_i32 = arith.constant 0 : i32
    %c0_i32_0 = arith.constant 0 : i32
    return %arg0, %c0_i32 : i32, i32
  }
}

</mosaic_0001>

<bundles_post_ra>
// kernel: tpu_custom_call.1
= control target key start
LH: loop header
LB: loop body
LE: loop exit
PB: predicated region body
PF: predicated region fallthrough
CT: control target
= control target key end

     0   :  { %s4945_s0 = inlined_call_operand.vmem [shape: f32[16,128], index: 0, kind: input, shape index: {}]   ;;  %s4946_s1 = inlined_call_operand.vmem [shape: f32[16,128], index: 1, kind: input, shape index: {}]   ;;  %s4947_s2 = inlined_call_operand.vmem [shape: f32[16,128], index: 2, kind: input, shape index: {}]   ;;  %s4948_s3 = inlined_call_operand.vmem [shape: f32[4,128,8], index: 3, kind: input, shape index: {}]   ;;  %s4949_s4 = inlined_call_operand.vmem [shape: f32[4,1,8], index: 4, kind: input, shape index: {}]   ;;  %s4950_s5 = inlined_call_operand.vmem [shape: f32[4,128,8], index: 5, kind: input, shape index: {}]   ;;  %s4951_s6 = inlined_call_operand.vmem [shape: f32[4,1,8], index: 6, kind: input, shape index: {}]   ;;  %s4952_s7 = inlined_call_operand.vmem [shape: f32[4,128,8], index: 7, kind: input, shape index: {}]   ;;  %s4953_s8 = inlined_call_operand.vmem [shape: f32[4,1,8], index: 8, kind: input, shape index: {}]   ;;  %s4954_s9 = inlined_call_operand.vmem [shape: f32[4,8,128], index: 9, kind: input, shape index: {}]   ;;  %s4955_s10 = inlined_call_operand.vmem [shape: f32[1,128], index: 10, kind: input, shape index: {}]   ;;  %s4956_s11 = inlined_call_operand.hbm [shape: f32[16,128], index: 11, kind: output, shape index: {}]  }
   0x1   :  { %4957 = sst [smem:[#allocation5_spill]] %s4945_s0 }
   0x2   :  { %16 = vsyncpa [#allocation3], 0 }
   0x3   :  { %18 = vsyncpa [#allocation3 + $0x1], 0  ;;  %s3994_s17 = smov 0   ;;  %s3996_s18 = smov 0  }
   0x4   :  { %s3998_s19 = smov 0   ;;  %s4000_s20 = smov 0  }
   0x5 LB: > { %s4015_s21 = sadd.s32 4294967295, %s3928_s20   ;;  %s2613_s22 = sadd.s32 4294967294, %s3928_s20   ;;  %s3928_s20 = sphi %s4000_s20, %s4964_s20   ;;  %s3924_s19 = sphi %s3998_s19, %s4963_s19   ;;  %s3920_s18 = sphi %s3996_s18, %s4962_s18   ;;  %s3916_s17 = sphi %s3994_s17, %s4961_s17  }
   0x6   : > { %s4019_s23 = sadd.s32 1, %s3928_s20   ;;  %s277_s24 = sadd.s32 1, %s3924_s19 }
   0x7   : > { %s274_s25 = ssub.s32 %s3928_s20, %s4019_s23  ;;  %p287_p0 = scmp.ne.s32.totalorder %s3924_s19, %s3920_s18 }
   0x8   : > { %p275_p1 = scmp.eq.s32.totalorder %s274_s25, 0  ;;  %p288_p2 = scmp.eq.s32.totalorder %s4015_s21, 1 }
   0x9   : > { %p293_p3 = scmp.ne.s32.totalorder %s3920_s18, %s3916_s17  ;;  %p294_p4 = scmp.eq.s32.totalorder %s2613_s22, 1 }
   0xa   : > { %s4030_s26 = scalar_select %p275_p1, %s3924_s19, %s277_s24  }
   0xb   : > { %p4032_p5 = por %p288_p2, %p287_p0  ;;  %p4036_p6 = por %p294_p4, %p293_p3 }
   0xc   : > { %p2616_p7 = scmp.ge.s32.totalorder %s3928_s20, 1  ;;  %p357_p8 = scmp.lt.s32.totalorder %s3928_s20, 3 }
   0xe   : > { %p358_p9 = pnand %p2616_p7, %p357_p8 }
   0xf   : > { %v432_v0 = vld [vmem:[%s4950_s5] sm:$0xff] (!%p358_p9)  ;;  %v433_v1 = vld [vmem:[%s4950_s5 + $0x8] sm:$0xff] (!%p358_p9)  ;;  %v3930_v3 = vmov (!%p358_p9), 0.0|0.0   ;;  %v434_v6 = vld [vmem:[%s4950_s5 + $0x10] sm:$0xff] (!%p358_p9)  ;;  %vm3931_vm0 = vmmov (!%p358_p9), 0   ;;  %v3932_v11 = vmov (!%p358_p9), 0.0  }
  0x10   : > { %361 = sbr.rel (%p358_p9) target bundleno = 3998 (0xf9e), region = 64  ;;  %v416_v2 = vld [vmem:[%s4948_s3] sm:$0xff] (!%p358_p9)  ;;  %3542 = vmatprep.subr.bf16.mxu1 (!%p358_p9), %v3930_v3  ;;  %v3543_v4 = vpack.c.bf16 (!%p358_p9), %v433_v1, %v432_v0  ;;  %3518 = vmatprep.subr.bf16.mxu0 (!%p358_p9), %v3930_v3  ;;  %v417_v5 = vld [vmem:[%s4948_s3 + $0x8] sm:$0xff] (!%p358_p9)  ;;  %v435_v7 = vld [vmem:[%s4950_s5 + $0x18] sm:$0xff] (!%p358_p9)  ;;  %p404_p10 = scmp.lt.s32.totalorder (!%p358_p9), %s4015_s21, 1  ;;  %vm699_vm1 = vcmask (!%p358_p9), 64512  }
  0x11   : > { %v3519_v8 = vpack.c.bf16 (!%p358_p9), %v417_v5, %v416_v2  ;;  %v418_v9 = vld [vmem:[%s4948_s3 + $0x10] sm:$0xff] (!%p358_p9)  ;;  %v419_v10 = vld [vmem:[%s4948_s3 + $0x18] sm:$0xff] (!%p358_p9)  ;;  %3105 = vmatprep.mubr.msk.f32.mxu1 (!%p358_p9), %vm3931_vm0, %v3932_v11  ;;  %3070 = vmatprep.mubr.msk.f32.mxu0 (!%p358_p9), %vm3931_vm0, %v3932_v11  ;;  %v3546_v12 = vpack.c.bf16 (!%p358_p9), %v435_v7, %v434_v6  ;;  %v436_v14 = vld [vmem:[%s4950_s5 + $0x20] sm:$0xff] (!%p358_p9)  ;;  %s4960_s0 = sld [smem:[#allocation5_spill]] (!%p358_p9)  ;;  %s401_s30 = sand.u32 (!%p358_p9), 1, %s3920_s18  }
  0x12   : > { %3544 = vmatpush3.bf16.msra.mxu1 (!%p358_p9), %v3543_v4  ;;  %v3522_v13 = vpack.c.bf16 (!%p358_p9), %v419_v10, %v418_v9  ;;  %v437_v15 = vld [vmem:[%s4950_s5 + $0x28] sm:$0xff] (!%p358_p9)  ;;  %v420_v16 = vld [vmem:[%s4948_s3 + $0x20] sm:$0xff] (!%p358_p9)  ;;  %v438_v20 = vld [vmem:[%s4950_s5 + $0x30] sm:$0xff] (!%p358_p9)  ;;  %s2807_s14 = sshll.u32 (!%p358_p9), %s4015_s21, 7  ;;  %s2517_s29 = scalar_lea.sflag (!%p358_p9), [#allocation3], %s401_s30 }
  0x13   : > { %3520 = vmatpush3.bf16.msra.mxu0 (!%p358_p9), %v3519_v8  ;;  %3545 = vmatprep.subr.bf16.mxu1 (!%p358_p9), %v3930_v3  ;;  %v421_v17 = vld [vmem:[%s4948_s3 + $0x28] sm:$0xff] (!%p358_p9)  ;;  %v3549_v18 = vpack.c.bf16 (!%p358_p9), %v437_v15, %v436_v14  ;;  %v439_v21 = vld [vmem:[%s4950_s5 + $0x38] sm:$0xff] (!%p358_p9)  ;;  %v422_v22 = vld [vmem:[%s4948_s3 + $0x30] sm:$0xff] (!%p358_p9) }
  0x14   : > { %3521 = vmatprep.subr.bf16.mxu0 (!%p358_p9), %v3930_v3  ;;  %v3525_v19 = vpack.c.bf16 (!%p358_p9), %v421_v17, %v420_v16  ;;  %v423_v23 = vld [vmem:[%s4948_s3 + $0x38] sm:$0xff] (!%p358_p9)  ;;  %v3552_v24 = vpack.c.bf16 (!%p358_p9), %v439_v21, %v438_v20  ;;  %v440_v26 = vld [vmem:[%s4950_s5 + $0x40] sm:$0xff] (!%p358_p9)  ;;  %v441_v27 = vld [vmem:[%s4950_s5 + $0x48] sm:$0xff] (!%p358_p9) }
  0x15   : > { %v3528_v25 = vpack.c.bf16 (!%p358_p9), %v423_v23, %v422_v22  ;;  %v424_v28 = vld [vmem:[%s4948_s3 + $0x40] sm:$0xff] (!%p358_p9)  ;;  %v425_v29 = vld [vmem:[%s4948_s3 + $0x48] sm:$0xff] (!%p358_p9)  ;;  %v3555_v30 = vpack.c.bf16 (!%p358_p9), %v441_v27, %v440_v26  ;;  %v442_v32 = vld [vmem:[%s4950_s5 + $0x50] sm:$0xff] (!%p358_p9) }
  0x16   : > { %3547 = vmatpush3.bf16.msra.mxu1 (!%p358_p9), %v3546_v12  ;;  %v3531_v31 = vpack.c.bf16 (!%p358_p9), %v425_v29, %v424_v28  ;;  %v443_v33 = vld [vmem:[%s4950_s5 + $0x58] sm:$0xff] (!%p358_p9)  ;;  %v426_v34 = vld [vmem:[%s4948_s3 + $0x50] sm:$0xff] (!%p358_p9)  ;;  %v444_v38 = vld [vmem:[%s4950_s5 + $0x60] sm:$0xff] (!%p358_p9) }
  0x17   : > { %3523 = vmatpush3.bf16.msra.mxu0 %v3522_v13  ;;  %3548 = vmatprep.subr.bf16.mxu1 %v3930_v3  ;;  %v427_v35 = vld [vmem:[%s4948_s3 + $0x58] sm:$0xff]  ;;  %v3558_v36 = vpack.c.bf16 %v443_v33, %v442_v32  ;;  %v445_v39 = vld [vmem:[%s4950_s5 + $0x68] sm:$0xff]  ;;  %v428_v40 = vld [vmem:[%s4948_s3 + $0x60] sm:$0xff]  ;;  %s405_s16 = scalar_select %p404_p10, %s4015_s21, 1 }
  0x18   : > { %3524 = vmatprep.subr.bf16.mxu0 %v3930_v3  ;;  %v3534_v37 = vpack.c.bf16 %v427_v35, %v426_v34  ;;  %v429_v41 = vld [vmem:[%s4948_s3 + $0x68] sm:$0xff]  ;;  %v3561_v42 = vpack.c.bf16 %v445_v39, %v444_v38  ;;  %v446_v44 = vld [vmem:[%s4950_s5 + $0x70] sm:$0xff]  ;;  %v447_v45 = vld [vmem:[%s4950_s5 + $0x78] sm:$0xff]  ;;  %s3933_s21 = smov [#allocation2]  }
  0x19   : > { %v3537_v43 = vpack.c.bf16 %v429_v41, %v428_v40  ;;  %v430_v46 = vld [vmem:[%s4948_s3 + $0x70] sm:$0xff]  ;;  %v431_v47 = vld [vmem:[%s4948_s3 + $0x78] sm:$0xff]  ;;  %s4158_s15 = sshll.u32 %s405_s16, 3  ;;  %v3564_v48 = vpack.c.bf16 %v447_v45, %v446_v44  ;;  %v2622_v52 = vld [vmem:[%s4951_s6] ss:$0 sm:$0xff]  ;;  %s2617_s16 = sshll.u32 %s401_s30, 3 }
  0x1a   : > { %3550 = vmatpush3.bf16.msra.mxu1 %v3549_v18  ;;  %v3540_v49 = vpack.c.bf16 %v431_v47, %v430_v46  ;;  %s411_s25 = scalar_lea.vmem %s4946_s1, %s4158_s15  ;;  %s4170_s12 = scalar_lea.vmem %s4960_s0, %s4158_s15  ;;  %v2621_v53 = vld [vmem:[%s4949_s4] ss:$0 sm:$0xff]  ;;  %v449_v61 = vld [vmem:[%s4952_s7 + $0x8] sm:$0xff]  ;;  %v450_v62 = vld [vmem:[%s4952_s7 + $0x10] sm:$0xff] }
  0x1b   : > { %3526 = vmatpush3.bf16.msra.mxu0 %v3525_v19  ;;  %3551 = vmatprep.subr.bf16.mxu1 %v3930_v3  ;;  %v4172_v50 = vld [vmem:[%s411_s25] sm:$0xff]  ;;  %v451_v0 = vld [vmem:[%s4952_s7 + $0x18] sm:$0xff]  ;;  %v453_v4 = vld [vmem:[%s4952_s7 + $0x28] sm:$0xff]  ;;  %s4255_s0 = scalar_lea.vmem %s4947_s2, %s4158_s15  ;;  %s403_s15 = scalar_lea.vmem [#allocation2], %s2617_s16 }
  0x1c   : > { %3527 = vmatprep.subr.bf16.mxu0 %v3930_v3  ;;  %v4175_v51 = vld [vmem:[%s4170_s12] sm:$0xff]  ;;  %v3570_v1 = vpack.c.bf16 %v451_v0, %v450_v62  ;;  %v454_v6 = vld [vmem:[%s4952_s7 + $0x30] sm:$0xff]  ;;  %v455_v7 = vld [vmem:[%s4952_s7 + $0x38] sm:$0xff]  ;;  %s2530_s22 = sshll.u32 %s403_s15, 4  ;;  %s3870_s16 = sshll.u32 %s3933_s21, 4  ;;  %s4905_s22 = int_to_ptr.vmem [resolvable:$true] %s2530_s22  ;;  %s3871_s16 = int_to_ptr.vmem [resolvable:$false] %s3870_s16 }
  0x1d   : > { %v448_v60 = vld [vmem:[%s4952_s7] sm:$0xff]  ;;  %v3576_v8 = vpack.c.bf16 %v455_v7, %v454_v6  ;;  %v457_v10 = vld [vmem:[%s4952_s7 + $0x48] sm:$0xff]  ;;  %v458_v13 = vld [vmem:[%s4952_s7 + $0x50] sm:$0xff]  ;;  %s3866_s13 = scalar_lea.vmem %s4905_s22, 128  ;;  %p3873_p0 = scmp.lt.s32.totalorder %s4905_s22, %s3871_s16 }
  0x1e   : > { %3553 = vmatpush3.bf16.msra.mxu1 %v3552_v24  ;;  %v3567_v63 = vpack.c.bf16 %v449_v61, %v448_v60  ;;  %v452_v2 = vld [vmem:[%s4952_s7 + $0x20] sm:$0xff]  ;;  %v459_v14 = vld [vmem:[%s4952_s7 + $0x58] sm:$0xff]  ;;  %v461_v17 = vld [vmem:[%s4952_s7 + $0x68] sm:$0xff]  ;;  %p3867_p11 = scmp.ne.s32.totalorder %s4905_s22, %s3866_s13 }
  0x1f   : > { %3529 = vmatpush3.bf16.msra.mxu0 %v3528_v25  ;;  %3554 = vmatprep.subr.bf16.mxu1 %v3930_v3  ;;  %v3573_v5 = vpack.c.bf16 %v453_v4, %v452_v2  ;;  %v456_v9 = vld [vmem:[%s4952_s7 + $0x40] sm:$0xff]  ;;  %v3582_v15 = vpack.c.bf16 %v459_v14, %v458_v13  ;;  %v462_v19 = vld [vmem:[%s4952_s7 + $0x70] sm:$0xff]  ;;  %v463_v20 = vld [vmem:[%s4952_s7 + $0x78] sm:$0xff] }
  0x20   : > { %3530 = vmatprep.subr.bf16.mxu0 %v3930_v3  ;;  %v3579_v12 = vpack.c.bf16 %v457_v10, %v456_v9  ;;  %v460_v16 = vld [vmem:[%s4952_s7 + $0x60] sm:$0xff]  ;;  %v3588_v21 = vpack.c.bf16 %v463_v20, %v462_v19  ;;  %v2644_v32 = vld [vmem:[%s4950_s5 + $0x88] sm:$0xff]  ;;  %v2645_v38 = vld [vmem:[%s4950_s5 + $0x90] sm:$0xff]  ;;  %p3868_p12 = pnand %p3867_p11, %p4032_p5 }
  0x21   : > { %v3585_v18 = vpack.c.bf16 %v461_v17, %v460_v16  ;;  %v4258_v22 = vld [vmem:[%s4255_s0] sm:$0xff]  ;;  %v2646_v39 = vld [vmem:[%s4950_s5 + $0x98] sm:$0xff]  ;;  %v2649_v44 = vld [vmem:[%s4950_s5 + $0xb0] sm:$0xff] }
  0x22   : > { %3556 = vmatpush3.bf16.msra.mxu1 %v3555_v30  ;;  %v2623_v35 = vld [vmem:[%s4953_s8] ss:$0 sm:$0xff]  ;;  %v3618_v40 = vpack.c.bf16 %v2646_v39, %v2645_v38  ;;  %v2650_v45 = vld [vmem:[%s4950_s5 + $0xb8] sm:$0xff]  ;;  %v2628_v2 = vld [vmem:[%s4948_s3 + $0x88] sm:$0xff]  ;;  %p3869_p13 = pneg %p3868_p12 }
  0x23   : > { %3532 = vmatpush3.bf16.msra.mxu0 %v3531_v31  ;;  %3557 = vmatprep.subr.bf16.mxu1 %v3930_v3  ;;  %v2643_v31 = vld [vmem:[%s4950_s5 + $0x80] sm:$0xff]  ;;  %v3624_v46 = vpack.c.bf16 %v2650_v45, %v2649_v44  ;;  %v2629_v7 = vld [vmem:[%s4948_s3 + $0x90] sm:$0xff] }
  0x24   : > { %3533 = vmatprep.subr.bf16.mxu0 %v3930_v3  ;;  %v3615_v34 = vpack.c.bf16 %v2644_v32, %v2643_v31  ;;  %v2647_v41 = vld [vmem:[%s4950_s5 + $0xa0] sm:$0xff]  ;;  %v2633_v14 = vld [vmem:[%s4948_s3 + $0xb0] sm:$0xff]  ;;  %v2660_v31 = vld [vmem:[%s4952_s7 + $0x88] sm:$0xff] }
  0x25   : > { %v2651_v47 = vld [vmem:[%s4950_s5 + $0xc0] sm:$0xff]  ;;  %v2637_v20 = vld [vmem:[%s4948_s3 + $0xd0] sm:$0xff] }
  0x26   : > { %3559 = vmatpush3.bf16.msra.mxu1 %v3558_v36  ;;  %v2631_v10 = vld [vmem:[%s4948_s3 + $0xa0] sm:$0xff]  ;;  %v2665_v39 = vld [vmem:[%s4952_s7 + $0xb0] sm:$0xff] }
  0x27   : > { %3535 = vmatpush3.bf16.msra.mxu0 %v3534_v37  ;;  %3560 = vmatprep.subr.bf16.mxu1 %v3930_v3  ;;  %v2635_v17 = vld [vmem:[%s4948_s3 + $0xc0] sm:$0xff]  ;;  %v2669_v45 = vld [vmem:[%s4952_s7 + $0xd0] sm:$0xff] }
  0x28   : > { %3536 = vmatprep.subr.bf16.mxu0 %v3930_v3 }
  0x2a   : > { %3562 = vmatpush3.bf16.msra.mxu1 %v3561_v42  ;;  %v2648_v42 = vld [vmem:[%s4950_s5 + $0xa8] sm:$0xff] }
  0x2b   : > { %3538 = vmatpush3.bf16.msra.mxu0 %v3537_v43  ;;  %3563 = vmatprep.subr.bf16.mxu1 %v3930_v3  ;;  %v3621_v43 = vpack.c.bf16 %v2648_v42, %v2647_v41  ;;  %v2667_v42 = vld [vmem:[%s4952_s7 + $0xc0] sm:$0xff] }
  0x2c   : > { %3539 = vmatprep.subr.bf16.mxu0 %v3930_v3 }
  0x2e   : > { %3565 = vmatpush3.bf16.msra.mxu1 %v3564_v48  ;;  %v2652_v48 = vld [vmem:[%s4950_s5 + $0xc8] sm:$0xff] }
  0x2f   : > { %3541 = vmatpush3.bf16.msra.mxu0 %v3540_v49  ;;  %3143 = vmatprep.subr.mxu1 %v3932_v11  ;;  %v3627_v49 = vpack.c.bf16 %v2652_v48, %v2651_v47  ;;  %v2671_v48 = vld [vmem:[%s4952_s7 + $0xe0] sm:$0xff] }
  0x30   : > { %3566 = vmatprep.subr.bf16.mxu0 %v3930_v3 }
  0x31   : > { %3106 = vmatmul.mubr.f32.vlgmr.msra.gmra.mrb[0].mxu1 %v4172_v50 }
  0x32   : > { %3071 = vmatmul.mubr.f32.vlgmr.msra.gmra.mrb[0].mxu0 %v4175_v51  ;;  %3145 = vmatprep.mubr.msk.f32.mxu1 %vm3931_vm0, %v3932_v11 }
  0x33   : > { %3140 = vmatprep.mubr.msk.f32.mxu0 %vm3931_vm0, %v3932_v11  ;;  %3568 = vmatpush3.bf16.msra.mxu0 %v3567_v63 }
  0x34   : > { %3569 = vmatprep.subr.bf16.mxu0 %v3930_v3 }
  0x37   : > { %3571 = vmatpush3.bf16.msra.mxu0 %v3570_v1  ;;  %v2627_v1 = vld [vmem:[%s4948_s3 + $0x80] sm:$0xff] }
  0x38   : > { %3572 = vmatprep.subr.bf16.mxu0 %v3930_v3 }
  0x3b   : > { %3574 = vmatpush3.bf16.msra.mxu0 %v3573_v5  ;;  %v3591_v5 = vpack.c.bf16 %v2628_v2, %v2627_v1 }
  0x3c   : > { %3575 = vmatprep.subr.bf16.mxu0 %v3930_v3 }
  0x3f   : > { %3577 = vmatpush3.bf16.msra.mxu0 %v3576_v8  ;;  %v2630_v8 = vld [vmem:[%s4948_s3 + $0x98] sm:$0xff] }
  0x40   : > { %3578 = vmatprep.subr.bf16.mxu0 %v3930_v3  ;;  %v3594_v9 = vpack.c.bf16 %v2630_v8, %v2629_v7 }
  0x43   : > { %3580 = vmatpush3.bf16.msra.mxu0 %v3579_v12  ;;  %v2632_v12 = vld [vmem:[%s4948_s3 + $0xa8] sm:$0xff] }
  0x44   : > { %3581 = vmatprep.subr.bf16.mxu0 %v3930_v3  ;;  %v3597_v13 = vpack.c.bf16 %v2632_v12, %v2631_v10 }
  0x47   : > { %3583 = vmatpush3.bf16.msra.mxu0 %v3582_v15  ;;  %v2634_v15 = vld [vmem:[%s4948_s3 + $0xb8] sm:$0xff] }
  0x48   : > { %3584 = vmatprep.subr.bf16.mxu0 %v3930_v3  ;;  %v3600_v16 = vpack.c.bf16 %v2634_v15, %v2633_v14 }
  0x4b   : > { %3586 = vmatpush3.bf16.msra.mxu0 %v3585_v18  ;;  %v2636_v18 = vld [vmem:[%s4948_s3 + $0xc8] sm:$0xff] }
  0x4c   : > { %3587 = vmatprep.subr.bf16.mxu0 %v3930_v3  ;;  %v3603_v19 = vpack.c.bf16 %v2636_v18, %v2635_v17 }
  0x4f   : > { %3589 = vmatpush3.bf16.msra.mxu0 %v3588_v21  ;;  %v2638_v21 = vld [vmem:[%s4948_s3 + $0xd8] sm:$0xff] }
  0x50   : > { %3614 = vmatprep.subr.bf16.mxu0 %v3930_v3 }
  0x52   : > { %3141 = vmatmul.mubr.f32.vlgmr.msra.gmra.mrb[2].mxu0 %v4258_v22 }
  0x53   : > { %3220 = vmatprep.mubr.msk.f32.mxu0 %vm3931_vm0, %v3932_v11  ;;  %3616 = vmatpush3.bf16.msra.mxu0 %v3615_v34  ;;  %v2662_v34 = vld [vmem:[%s4952_s7 + $0x98] sm:$0xff] }
  0x54   : > { %3617 = vmatprep.subr.bf16.mxu0 %v3930_v3 }
  0x57   : > { %3619 = vmatpush3.bf16.msra.mxu0 %v3618_v40  ;;  %v2666_v40 = vld [vmem:[%s4952_s7 + $0xb8] sm:$0xff] }
  0x58   : > { %3620 = vmatprep.subr.bf16.mxu0 %v3930_v3  ;;  %v3648_v41 = vpack.c.bf16 %v2666_v40, %v2665_v39  ;;  %v2711_v39 = vld [vmem:[%s4950_s5 + $0x140] sm:$0xff]  ;;  %v2712_v40 = vld [vmem:[%s4950_s5 + $0x148] sm:$0xff] }
  0x5b   : > { %3622 = vmatpush3.bf16.msra.mxu0 %v3621_v43  ;;  %v2668_v43 = vld [vmem:[%s4952_s7 + $0xc8] sm:$0xff] }
  0x5c   : > { %3623 = vmatprep.subr.bf16.mxu0 %v3930_v3  ;;  %v3651_v44 = vpack.c.bf16 %v2668_v43, %v2667_v42  ;;  %v2713_v42 = vld [vmem:[%s4950_s5 + $0x150] sm:$0xff]  ;;  %v2714_v43 = vld [vmem:[%s4950_s5 + $0x158] sm:$0xff] }
  0x5f   : > { %3625 = vmatpush3.bf16.msra.mxu0 %v3624_v46  ;;  %v2670_v46 = vld [vmem:[%s4952_s7 + $0xd8] sm:$0xff] }
  0x60   : > { %3626 = vmatprep.subr.bf16.mxu0 %v3930_v3  ;;  %v3654_v47 = vpack.c.bf16 %v2670_v46, %v2669_v45  ;;  %v2715_v45 = vld [vmem:[%s4950_s5 + $0x160] sm:$0xff]  ;;  %v2716_v46 = vld [vmem:[%s4950_s5 + $0x168] sm:$0xff] }
  0x63   : > { %3628 = vmatpush3.bf16.msra.mxu0 %v3627_v49  ;;  %v2672_v49 = vld [vmem:[%s4952_s7 + $0xe8] sm:$0xff] }
  0x64   : > { %3629 = vmatprep.subr.bf16.mxu0 %v3930_v3 }
 0x104   : > { %v617_v54 = vpop.f32.mrb[0].mxu1 }
 0x105   : > { %v618_v55 = vadd.f32 %v2622_v52, %v617_v54  ;;  %v3107_v56 = vpop.f32.mrb[1].mxu1  ;;  %v539_v57 = vpop.f32.mrb[0].mxu0  ;;  %v2653_v52 = vld [vmem:[%s4950_s5 + $0xd0] sm:$0xff] }
 0x106   : > { %v540_v58 = vadd.f32 %v2621_v53, %v539_v57  ;;  %v3072_v59 = vpop.f32.mrb[1].mxu0  ;;  %v2654_v53 = vld [vmem:[%s4950_s5 + $0xd8] sm:$0xff]  ;;  %v2656_v56 = vld [vmem:[%s4950_s5 + $0xe8] sm:$0xff] }
 0x107   : > { %3144 = vmatpush3.xpose.msk.msra.mxu1 %vm699_vm1, %v618_v55  ;;  %v3630_v54 = vpack.c.bf16 %v2654_v53, %v2653_v52  ;;  %v2655_v55 = vld [vmem:[%s4950_s5 + $0xe0] sm:$0xff]  ;;  %v2658_v59 = vld [vmem:[%s4950_s5 + $0xf8] sm:$0xff]  ;;  %v3657_v52 = vpack.c.bf16 %v2672_v49, %v2671_v48  ;;  %v2673_v53 = vld [vmem:[%s4952_s7 + $0xf0] sm:$0xff] }
 0x108   : > { %3148 = vmatprep.subr.mxu1 %v3932_v11  ;;  %v3633_v57 = vpack.c.bf16 %v2656_v56, %v2655_v55  ;;  %v464_v56 = vld [vmem:[%s4954_s9] sm:$0xff]  ;;  %v2717_v48 = vld [vmem:[%s4950_s5 + $0x170] sm:$0xff]  ;;  %v2718_v49 = vld [vmem:[%s4950_s5 + $0x178] sm:$0xff] }
 0x109   : > { %3631 = vmatpush3.bf16.msra.mxu0 %v3630_v54  ;;  %v2674_v54 = vld [vmem:[%s4952_s7 + $0xf8] sm:$0xff] }
 0x10a   : > { %3146 = vmatmul.mubr.msk.f32.vlgmr.msra.gmra.mrb[2].mxu1 %vm699_vm1, %v540_v58  ;;  %3632 = vmatprep.subr.bf16.mxu0 %v3930_v3  ;;  %v2657_v58 = vld [vmem:[%s4950_s5 + $0xf0] sm:$0xff]  ;;  %v3660_v55 = vpack.c.bf16 %v2674_v54, %v2673_v53  ;;  %v2687_v53 = vld [vmem:[%s4948_s3 + $0x100] sm:$0xff]  ;;  %v2688_v54 = vld [vmem:[%s4948_s3 + $0x108] sm:$0xff] }
 0x10b   : > { %3150 = vmatprep.mubr.msk.f32.mxu1 %vm3931_vm0, %v3932_v11  ;;  %v3636_v60 = vpack.c.bf16 %v2658_v59, %v2657_v58 }
 0x10d   : > { %3634 = vmatpush3.bf16.msra.mxu0 %v3633_v57  ;;  %v2679_v57 = vld [vmem:[%s4951_s6 + $0x1] ss:$0 sm:$0xff] }
 0x10e   : > { %3635 = vmatprep.subr.bf16.mxu0 %v3930_v3 }
 0x111   : > { %3637 = vmatpush3.bf16.msra.mxu0 %v3636_v60 }
 0x112   : > { %3258 = vmatprep.subr.mxu0 %v3932_v11 }
 0x114   : > { %3221 = vmatmul.mubr.f32.vlgmr.msra.gmra.mrb[4].mxu0 %v4172_v50 }
 0x115   : > { %3260 = vmatprep.mubr.msk.f32.mxu0 %vm3931_vm0, %v3932_v11 }
 0x125   : > { %v695_v33 = vpop.f32.mrb[2].mxu0 }
 0x126   : > { %v3142_v36 = vpop.f32.mrb[3].mxu0  ;;  %v696_v37 = vadd.f32 %v2623_v35, %v695_v33  ;;  %v2661_v33 = vld [vmem:[%s4952_s7 + $0x90] sm:$0xff] }
 0x127   : > { %v3642_v35 = vpack.c.bf16 %v2662_v34, %v2661_v33  ;;  %v2663_v36 = vld [vmem:[%s4952_s7 + $0xa0] sm:$0xff]  ;;  %v2708_v34 = vld [vmem:[%s4950_s5 + $0x128] sm:$0xff] }
 0x128   : > { %3149 = vmatpush3.msra.mxu1 %v696_v37  ;;  %v2664_v37 = vld [vmem:[%s4952_s7 + $0xa8] sm:$0xff]  ;;  %v2707_v33 = vld [vmem:[%s4950_s5 + $0x120] sm:$0xff] }
 0x129   : > { %3590 = vmatprep.subr.bf16.mxu1 %v3930_v3  ;;  %v3645_v38 = vpack.c.bf16 %v2664_v37, %v2663_v36  ;;  %v2709_v36 = vld [vmem:[%s4950_s5 + $0x130] sm:$0xff]  ;;  %v2710_v37 = vld [vmem:[%s4950_s5 + $0x138] sm:$0xff] }
 0x1dd   : > { %v772_v23 = vpop.f32.mrb[2].mxu1 }
 0x1de   : > { %v3147_v24 = vpop.f32.mrb[3].mxu1  ;;  %v776_v25 = vsel %vm699_vm1, %v772_v23, -inf }
 0x1df   : > { %777 = vmax.xlane.f32.xlu0 %v776_v25  ;;  %v2639_v24 = vld [vmem:[%s4948_s3 + $0xe0] sm:$0xff]  ;;  %v2640_v25 = vld [vmem:[%s4948_s3 + $0xe8] sm:$0xff] }
 0x1e7   : > { %v1068_v58 = vpop.f32.mrb[4].mxu0 }
 0x1e8   : > { %v1069_v59 = vadd.f32 %v2679_v57, %v1068_v58  ;;  %v3222_v60 = vpop.f32.mrb[5].mxu0  ;;  %v2690_v57 = vld [vmem:[%s4948_s3 + $0x118] sm:$0xff] }
 0x1ea   : > { %3259 = vmatpush3.xpose.msk.msra.mxu0 %vm699_vm1, %v1069_v59 }
 0x1eb   : > { %3263 = vmatprep.subr.mxu0 %v3932_v11 }
 0x26c   : > { %v778_v26 = vpop.xlane.xlu0 %777 }
 0x26d   : > { %v779_v27 = vsub.f32 %v772_v23, %v778_v26  ;;  %v3606_v23 = vpack.c.bf16 %v2638_v21, %v2637_v20  ;;  %v3609_v26 = vpack.c.bf16 %v2640_v25, %v2639_v24  ;;  %v2704_v20 = vld [vmem:[%s4950_s5 + $0x108] sm:$0xff] }
 0x26f   : > { %v780_v28 = vmul.f32 1.442695, %v779_v27  ;;  %v2641_v27 = vld [vmem:[%s4948_s3 + $0xf0] sm:$0xff] }
 0x271   : > { %3848 = vpow2.f32 %v780_v28  ;;  %v2642_v28 = vld [vmem:[%s4948_s3 + $0xf8] sm:$0xff] }
 0x27b   : > { %v3849_v29 = vpop.eup %3848 }
 0x27c   : > { %v782_v30 = vsel %vm699_vm1, %v3849_v29, 0.0 }
 0x27d   : > { %783 = vadd.xlane.f32.xlu0 %v782_v30  ;;  %v2659_v30 = vld [vmem:[%s4952_s7 + $0x80] sm:$0xff] }
 0x27e   : > { %v3639_v32 = vpack.c.bf16 %v2660_v31, %v2659_v30  ;;  %v2705_v30 = vld [vmem:[%s4950_s5 + $0x110] sm:$0xff]  ;;  %v2706_v31 = vld [vmem:[%s4950_s5 + $0x118] sm:$0xff] }
 0x30a   : > { %v784_v61 = vpop.xlane.xlu0 %783 }
 0x30b   : > { %3850 = vrcp.f32 %v784_v61 }
 0x315   : > { %v3851_v62 = vpop.eup %3850 }
 0x316   : > { %v786_v63 = vmul.f32 %v3851_v62, %v784_v61 }
 0x318   : > { %v787_v0 = vsub.f32 2.0, %v786_v63  ;;  %v2677_v63 = vld [vmem:[%s4949_s4 + $0x1] ss:$0 sm:$0xff] }
 0x31a   : > { %v788_v4 = vmul.f32 %v3851_v62, %v787_v0 }
 0x31c   : > { %v789_v6 = vmul.f32 %v3849_v29, %v788_v4  ;;  %v3612_v29 = vpack.c.bf16 %v2642_v28, %v2641_v27  ;;  %v2681_v4 = vld [vmem:[%s4953_s8 + $0x1] ss:$0 sm:$0xff] }
 0x31e   : > { %3151 = vmatmul.mubr.msk.f32.vlgmr.msra.gmra.mrb[4].mxu1 %vm699_vm1, %v789_v6 }
 0x31f   : > { %3592 = vmatpush3.bf16.msra.mxu1 %v3591_v5  ;;  %3185 = vmatprep.mubr.msk.f32.mxu1 %vm3931_vm0, %v3932_v11 }
 0x320   : > { %3593 = vmatprep.subr.bf16.mxu1 %v3930_v3 }
 0x323   : > { %3595 = vmatpush3.bf16.msra.mxu1 %v3594_v9 }
 0x324   : > { %3596 = vmatprep.subr.bf16.mxu1 %v3930_v3 }
 0x327   : > { %3598 = vmatpush3.bf16.msra.mxu1 %v3597_v13 }
 0x328   : > { %3599 = vmatprep.subr.bf16.mxu1 %v3930_v3 }
 0x32b   : > { %3601 = vmatpush3.bf16.msra.mxu1 %v3600_v16 }
 0x32c   : > { %3602 = vmatprep.subr.bf16.mxu1 %v3930_v3 }
 0x32f   : > { %3604 = vmatpush3.bf16.msra.mxu1 %v3603_v19  ;;  %v2703_v19 = vld [vmem:[%s4950_s5 + $0x100] sm:$0xff] }
 0x330   : > { %3605 = vmatprep.subr.bf16.mxu1 %v3930_v3  ;;  %v3687_v21 = vpack.c.bf16 %v2704_v20, %v2703_v19 }
 0x333   : > { %3607 = vmatpush3.bf16.msra.mxu1 %v3606_v23 }
 0x334   : > { %3608 = vmatprep.subr.bf16.mxu1 %v3930_v3 }
 0x337   : > { %3610 = vmatpush3.bf16.msra.mxu1 %v3609_v26 }
 0x338   : > { %3611 = vmatprep.subr.bf16.mxu1 %v3930_v3 }
 0x33b   : > { %3613 = vmatpush3.bf16.msra.mxu1 %v3612_v29  ;;  %v2675_v29 = vld [vmem:[%s4954_s9 + $0x8] sm:$0xff] }
 0x33c   : > { %3638 = vmatprep.subr.bf16.mxu1 %v3930_v3 }
 0x33e   : > { %3186 = vmatmul.mubr.f32.vlgmr.msra.gmra.mrb[6].mxu1 %v4175_v51 }
 0x33f   : > { %3640 = vmatpush3.bf16.msra.mxu1 %v3639_v32  ;;  %3255 = vmatprep.mubr.msk.f32.mxu1 %vm3931_vm0, %v3932_v11  ;;  %v3690_v32 = vpack.c.bf16 %v2706_v31, %v2705_v30  ;;  %v2721_v30 = vld [vmem:[%s4952_s7 + $0x110] sm:$0xff] }
 0x340   : > { %3641 = vmatprep.subr.bf16.mxu1 %v3930_v3 }
 0x343   : > { %3643 = vmatpush3.bf16.msra.mxu1 %v3642_v35  ;;  %v3693_v35 = vpack.c.bf16 %v2708_v34, %v2707_v33  ;;  %v2723_v34 = vld [vmem:[%s4952_s7 + $0x120] sm:$0xff] }
 0x344   : > { %3644 = vmatprep.subr.bf16.mxu1 %v3930_v3 }
 0x347   : > { %3646 = vmatpush3.bf16.msra.mxu1 %v3645_v38  ;;  %v3696_v38 = vpack.c.bf16 %v2710_v37, %v2709_v36  ;;  %v2725_v37 = vld [vmem:[%s4952_s7 + $0x130] sm:$0xff] }
 0x348   : > { %3647 = vmatprep.subr.bf16.mxu1 %v3930_v3 }
 0x34b   : > { %3649 = vmatpush3.bf16.msra.mxu1 %v3648_v41  ;;  %v3699_v41 = vpack.c.bf16 %v2712_v40, %v2711_v39  ;;  %v2727_v40 = vld [vmem:[%s4952_s7 + $0x140] sm:$0xff] }
 0x34c   : > { %3650 = vmatprep.subr.bf16.mxu1 %v3930_v3 }
 0x34f   : > { %3652 = vmatpush3.bf16.msra.mxu1 %v3651_v44  ;;  %v3702_v44 = vpack.c.bf16 %v2714_v43, %v2713_v42  ;;  %v2729_v43 = vld [vmem:[%s4952_s7 + $0x150] sm:$0xff] }
 0x350   : > { %3653 = vmatprep.subr.bf16.mxu1 %v3930_v3 }
 0x353   : > { %3655 = vmatpush3.bf16.msra.mxu1 %v3654_v47  ;;  %v3705_v47 = vpack.c.bf16 %v2716_v46, %v2715_v45  ;;  %v2731_v46 = vld [vmem:[%s4952_s7 + $0x160] sm:$0xff] }
 0x354   : > { %3656 = vmatprep.subr.bf16.mxu1 %v3930_v3 }
 0x357   : > { %3658 = vmatpush3.bf16.msra.mxu1 %v3657_v52  ;;  %v3708_v52 = vpack.c.bf16 %v2718_v49, %v2717_v48  ;;  %v2733_v49 = vld [vmem:[%s4952_s7 + $0x170] sm:$0xff] }
 0x358   : > { %3659 = vmatprep.subr.bf16.mxu1 %v3930_v3 }
 0x35b   : > { %3661 = vmatpush3.bf16.msra.mxu1 %v3660_v55  ;;  %v3663_v55 = vpack.c.bf16 %v2688_v54, %v2687_v53 }
 0x35c   : > { %3273 = vmatprep.subr.mxu1 %v3932_v11 }
 0x35e   : > { %3256 = vmatmul.mubr.f32.vlgmr.msra.gmra.mrb[8].mxu1 %v4258_v22 }
 0x35f   : > { %3275 = vmatprep.mubr.msk.f32.mxu1 %vm3931_vm0, %v3932_v11  ;;  %3274 = vmatpush3.msra.mxu1 %v464_v56  ;;  %v2689_v56 = vld [vmem:[%s4948_s3 + $0x110] sm:$0xff] }
 0x360   : > { %3686 = vmatprep.subr.bf16.mxu1 %v3930_v3  ;;  %v3666_v60 = vpack.c.bf16 %v2690_v57, %v2689_v56 }
 0x3f1   : > { %v859_v61 = vpop.f32.mrb[4].mxu1 }
 0x3f2   : > { %v3152_v62 = vpop.f32.mrb[5].mxu1  ;;  %3276 = vmatmul.mubr.msk.f32.vlgmr.msra.gmra.mrb[10].mxu1 %vm699_vm1, %v859_v61  ;;  %v2691_v61 = vld [vmem:[%s4948_s3 + $0x120] sm:$0xff] }
 0x3f3   : > { %3345 = vmatprep.mubr.msk.f32.mxu1 %vm3931_vm0, %v3932_v11  ;;  %3688 = vmatpush3.bf16.msra.mxu1 %v3687_v21  ;;  %v2692_v62 = vld [vmem:[%s4948_s3 + $0x128] sm:$0xff] }
 0x3f4   : > { %3689 = vmatprep.subr.bf16.mxu1 %v3930_v3 }
 0x3f7   : > { %3691 = vmatpush3.bf16.msra.mxu1 %v3690_v32  ;;  %v2722_v32 = vld [vmem:[%s4952_s7 + $0x118] sm:$0xff] }
 0x3f8   : > { %3692 = vmatprep.subr.bf16.mxu1 %v3930_v3  ;;  %v3714_v33 = vpack.c.bf16 %v2722_v32, %v2721_v30  ;;  %v2775_v30 = vld [vmem:[%s4950_s5 + $0x1e8] sm:$0xff]  ;;  %v2776_v32 = vld [vmem:[%s4950_s5 + $0x1f0] sm:$0xff] }
 0x3fb   : > { %3694 = vmatpush3.bf16.msra.mxu1 %v3693_v35  ;;  %v2724_v35 = vld [vmem:[%s4952_s7 + $0x128] sm:$0xff] }
 0x3fc   : > { %3695 = vmatprep.subr.bf16.mxu1 %v3930_v3  ;;  %v3717_v36 = vpack.c.bf16 %v2724_v35, %v2723_v34  ;;  %v2746_v35 = vld [vmem:[%s4948_s3 + $0x180] sm:$0xff] }
 0x3ff   : > { %3697 = vmatpush3.bf16.msra.mxu1 %v3696_v38  ;;  %v2726_v38 = vld [vmem:[%s4952_s7 + $0x138] sm:$0xff] }
 0x400   : > { %3698 = vmatprep.subr.bf16.mxu1 %v3930_v3  ;;  %v3720_v39 = vpack.c.bf16 %v2726_v38, %v2725_v37  ;;  %v2748_v38 = vld [vmem:[%s4948_s3 + $0x190] sm:$0xff] }
 0x403   : > { %3700 = vmatpush3.bf16.msra.mxu1 %v3699_v41  ;;  %v2728_v41 = vld [vmem:[%s4952_s7 + $0x148] sm:$0xff] }
 0x404   : > { %3701 = vmatprep.subr.bf16.mxu1 %v3930_v3  ;;  %v3723_v42 = vpack.c.bf16 %v2728_v41, %v2727_v40 }
 0x407   : > { %3703 = vmatpush3.bf16.msra.mxu1 %v3702_v44  ;;  %v2730_v44 = vld [vmem:[%s4952_s7 + $0x158] sm:$0xff] }
 0x408   : > { %3704 = vmatprep.subr.bf16.mxu1 %v3930_v3  ;;  %v3726_v45 = vpack.c.bf16 %v2730_v44, %v2729_v43  ;;  %v2751_v43 = vld [vmem:[%s4948_s3 + $0x1a8] sm:$0xff] }
 0x40b   : > { %3706 = vmatpush3.bf16.msra.mxu1 %v3705_v47  ;;  %v2732_v47 = vld [vmem:[%s4952_s7 + $0x168] sm:$0xff] }
 0x40c   : > { %3707 = vmatprep.subr.bf16.mxu1 %v3930_v3  ;;  %v3729_v48 = vpack.c.bf16 %v2732_v47, %v2731_v46  ;;  %v2753_v46 = vld [vmem:[%s4948_s3 + $0x1b8] sm:$0xff] }
 0x40f   : > { %3709 = vmatpush3.bf16.msra.mxu1 %v3708_v52  ;;  %v2734_v52 = vld [vmem:[%s4952_s7 + $0x178] sm:$0xff] }
 0x410   : > { %3383 = vmatprep.subr.mxu1 %v3932_v11  ;;  %v3732_v53 = vpack.c.bf16 %v2734_v52, %v2733_v49  ;;  %v2755_v49 = vld [vmem:[%s4948_s3 + $0x1c8] sm:$0xff] }
 0x411   : > { %v990_v0 = vpop.f32.mrb[6].mxu1 }
 0x412   : > { %v991_v1 = vadd.f32 %v2677_v63, %v990_v0  ;;  %v3187_v2 = vpop.f32.mrb[7].mxu1  ;;  %3346 = vmatmul.mubr.f32.vlgmr.msra.gmra.mrb[12].mxu1 %v4172_v50  ;;  %v3669_v63 = vpack.c.bf16 %v2692_v62, %v2691_v61  ;;  %v2693_v0 = vld [vmem:[%s4948_s3 + $0x130] sm:$0xff] }
 0x413   : > { %3385 = vmatprep.mubr.msk.f32.mxu1 %vm3931_vm0, %v3932_v11 }
 0x414   : > { %3261 = vmatmul.mubr.msk.f32.vlgmr.msra.gmra.mrb[6].mxu0 %vm699_vm1, %v991_v1  ;;  %v2694_v1 = vld [vmem:[%s4948_s3 + $0x138] sm:$0xff] }
 0x415   : > { %3265 = vmatprep.mubr.msk.f32.mxu0 %vm3931_vm0, %v3932_v11  ;;  %v3672_v2 = vpack.c.bf16 %v2694_v1, %v2693_v0  ;;  %v2762_v1 = vld [vmem:[%s4950_s5 + $0x180] sm:$0xff] }
 0x431   : > { %v1146_v5 = vpop.f32.mrb[8].mxu1 }
 0x432   : > { %v1147_v6 = vadd.f32 %v2681_v4, %v1146_v5  ;;  %v3257_v7 = vpop.f32.mrb[9].mxu1  ;;  %v2695_v4 = vld [vmem:[%s4948_s3 + $0x140] sm:$0xff]  ;;  %v2696_v5 = vld [vmem:[%s4948_s3 + $0x148] sm:$0xff] }
 0x433   : > { %v2697_v7 = vld [vmem:[%s4948_s3 + $0x150] sm:$0xff] }
 0x434   : > { %3264 = vmatpush3.msra.mxu0 %v1147_v6  ;;  %v3675_v6 = vpack.c.bf16 %v2696_v5, %v2695_v4 }
 0x435   : > { %3268 = vmatprep.subr.mxu0 %v3932_v11 }
 0x4c5   : > { %v4472_v8 = vpop.f32.mrb[10].mxu1 }
 0x4c6   : > { %v3277_v9 = vpop.f32.mrb[11].mxu1 }
 0x4c7   : > { %v2698_v9 = vld [vmem:[%s4948_s3 + $0x158] sm:$0xff] }
 0x4e5   : > { %v1664_v19 = vpop.f32.mrb[12].mxu1 }
 0x4e6   : > { %v3347_v21 = vpop.f32.mrb[13].mxu1 }
 0x4e7   : > { %v1222_v10 = vpop.f32.mrb[6].mxu0  ;;  %v2769_v21 = vld [vmem:[%s4950_s5 + $0x1b8] sm:$0xff] }
 0x4e8   : > { %v3262_v12 = vpop.f32.mrb[7].mxu0  ;;  %v1226_v13 = vsel %vm699_vm1, %v1222_v10, -inf }
 0x4e9   : > { %1227 = vmax.xlane.f32.xlu1 %v1226_v13  ;;  %v2699_v12 = vld [vmem:[%s4948_s3 + $0x160] sm:$0xff]  ;;  %v2700_v13 = vld [vmem:[%s4948_s3 + $0x168] sm:$0xff] }
 0x576   : > { %v1228_v14 = vpop.xlane.xlu1 %1227 }
 0x577   : > { %v1229_v15 = vsub.f32 %v1222_v10, %v1228_v14  ;;  %v3678_v10 = vpack.c.bf16 %v2698_v9, %v2697_v7  ;;  %v3681_v14 = vpack.c.bf16 %v2700_v13, %v2699_v12  ;;  %v2735_v13 = vld [vmem:[%s4954_s9 + $0x10] sm:$0xff] }
 0x579   : > { %v1230_v16 = vmul.f32 1.442695, %v1229_v15  ;;  %v2701_v15 = vld [vmem:[%s4948_s3 + $0x170] sm:$0xff] }
 0x57b   : > { %3852 = vpow2.f32 %v1230_v16  ;;  %v2702_v16 = vld [vmem:[%s4948_s3 + $0x178] sm:$0xff] }
 0x585   : > { %v3853_v17 = vpop.eup %3852 }
 0x586   : > { %v1232_v18 = vsel %vm699_vm1, %v3853_v17, 0.0 }
 0x587   : > { %1233 = vadd.xlane.f32.xlu1 %v1232_v18  ;;  %v2739_v18 = vld [vmem:[%s4951_s6 + $0x2] ss:$0 sm:$0xff] }
 0x588   : > { %v1665_v20 = vadd.f32 %v2739_v18, %v1664_v19  ;;  %v2767_v18 = vld [vmem:[%s4950_s5 + $0x1a8] sm:$0xff] }
 0x58a   : > { %3384 = vmatpush3.xpose.msk.msra.mxu1 %vm699_vm1, %v1665_v20  ;;  %v2768_v20 = vld [vmem:[%s4950_s5 + $0x1b0] sm:$0xff] }
 0x58b   : > { %3388 = vmatprep.subr.mxu1 %v3932_v11 }
 0x614   : > { %v1234_v23 = vpop.xlane.xlu1 %1233 }
 0x615   : > { %3854 = vrcp.f32 %v1234_v23 }
 0x61f   : > { %v3855_v24 = vpop.eup %3854 }
 0x620   : > { %v1236_v25 = vmul.f32 %v3855_v24, %v1234_v23 }
 0x622   : > { %v1237_v26 = vsub.f32 2.0, %v1236_v25 }
 0x624   : > { %v1238_v27 = vmul.f32 %v3855_v24, %v1237_v26 }
 0x626   : > { %v1239_v28 = vmul.f32 %v3853_v17, %v1238_v27  ;;  %v3684_v17 = vpack.c.bf16 %v2702_v16, %v2701_v15  ;;  %v2765_v15 = vld [vmem:[%s4950_s5 + $0x198] sm:$0xff] }
 0x628   : > { %3266 = vmatmul.mubr.msk.f32.vlgmr.msra.gmra.mrb[8].mxu0 %vm699_vm1, %v1239_v28 }
 0x629   : > { %3269 = vmatpush3.msra.mxu0 %v2675_v29  ;;  %3270 = vmatprep.mubr.msk.f32.mxu0 %vm3931_vm0, %v3932_v11  ;;  %v2719_v29 = vld [vmem:[%s4952_s7 + $0x100] sm:$0xff] }
 0x62a   : > { %3662 = vmatprep.subr.bf16.mxu0 %v3930_v3 }
 0x6fb   : > { %v1309_v58 = vpop.f32.mrb[8].mxu0 }
 0x6fc   : > { %v3267_v59 = vpop.f32.mrb[9].mxu0  ;;  %3271 = vmatmul.mubr.msk.f32.vlgmr.msra.gmra.mrb[10].mxu0 %vm699_vm1, %v1309_v58 }
 0x6fd   : > { %3664 = vmatpush3.bf16.msra.mxu0 %v3663_v55  ;;  %3310 = vmatprep.mubr.msk.f32.mxu0 %vm3931_vm0, %v3932_v11 }
 0x6fe   : > { %3665 = vmatprep.subr.bf16.mxu0 %v3930_v3 }
 0x701   : > { %3667 = vmatpush3.bf16.msra.mxu0 %v3666_v60 }
 0x702   : > { %3668 = vmatprep.subr.bf16.mxu0 %v3930_v3 }
 0x705   : > { %3670 = vmatpush3.bf16.msra.mxu0 %v3669_v63 }
 0x706   : > { %3671 = vmatprep.subr.bf16.mxu0 %v3930_v3 }
 0x709   : > { %3673 = vmatpush3.bf16.msra.mxu0 %v3672_v2  ;;  %v2763_v2 = vld [vmem:[%s4950_s5 + $0x188] sm:$0xff] }
 0x70a   : > { %3674 = vmatprep.subr.bf16.mxu0 %v3930_v3  ;;  %v3759_v4 = vpack.c.bf16 %v2763_v2, %v2762_v1 }
 0x70d   : > { %3676 = vmatpush3.bf16.msra.mxu0 %v3675_v6 }
 0x70e   : > { %3677 = vmatprep.subr.bf16.mxu0 %v3930_v3 }
 0x711   : > { %3679 = vmatpush3.bf16.msra.mxu0 %v3678_v10 }
 0x712   : > { %3680 = vmatprep.subr.bf16.mxu0 %v3930_v3 }
 0x715   : > { %3682 = vmatpush3.bf16.msra.mxu0 %v3681_v14  ;;  %v2764_v14 = vld [vmem:[%s4950_s5 + $0x190] sm:$0xff] }
 0x716   : > { %3683 = vmatprep.subr.bf16.mxu0 %v3930_v3  ;;  %v3762_v16 = vpack.c.bf16 %v2765_v15, %v2764_v14  ;;  %v2781_v15 = vld [vmem:[%s4952_s7 + $0x198] sm:$0xff] }
 0x719   : > { %3685 = vmatpush3.bf16.msra.mxu0 %v3684_v17  ;;  %v2766_v17 = vld [vmem:[%s4950_s5 + $0x1a0] sm:$0xff] }
 0x71a   : > { %3710 = vmatprep.subr.bf16.mxu0 %v3930_v3  ;;  %v3765_v19 = vpack.c.bf16 %v2767_v18, %v2766_v17  ;;  %v2782_v17 = vld [vmem:[%s4952_s7 + $0x1a0] sm:$0xff]  ;;  %v2783_v18 = vld [vmem:[%s4952_s7 + $0x1a8] sm:$0xff] }
 0x71c   : > { %3311 = vmatmul.mubr.f32.vlgmr.msra.gmra.mrb[12].mxu0 %v4175_v51  ;;  %v2737_v51 = vld [vmem:[%s4949_s4 + $0x2] ss:$0 sm:$0xff] }
 0x71d   : > { %3380 = vmatprep.mubr.msk.f32.mxu0 %vm3931_vm0, %v3932_v11 }
 0x7cf   : > { %v1382_v23 = vpop.f32.mrb[10].mxu0 }
 0x7d0   : > { %v4610_v24 = vadd.f32 %v4472_v8, %v1382_v23  ;;  %v3272_v25 = vpop.f32.mrb[11].mxu0  ;;  %v2720_v8 = vld [vmem:[%s4952_s7 + $0x108] sm:$0xff]  ;;  %v3768_v23 = vpack.c.bf16 %v2769_v21, %v2768_v20  ;;  %v2784_v20 = vld [vmem:[%s4952_s7 + $0x1b0] sm:$0xff]  ;;  %v2785_v21 = vld [vmem:[%s4952_s7 + $0x1b8] sm:$0xff] }
 0x7d1   : > { %v3711_v31 = vpack.c.bf16 %v2720_v8, %v2719_v29  ;;  %v2770_v25 = vld [vmem:[%s4950_s5 + $0x1c0] sm:$0xff] }
 0x7d2   : > { %v2774_v8 = vld [vmem:[%s4950_s5 + $0x1e0] sm:$0xff] }
 0x7d3   : > { %3712 = vmatpush3.bf16.msra.mxu0 %v3711_v31  ;;  %v3777_v31 = vpack.c.bf16 %v2775_v30, %v2774_v8  ;;  %v2790_v8 = vld [vmem:[%s4952_s7 + $0x1e0] sm:$0xff]  ;;  %v2791_v30 = vld [vmem:[%s4952_s7 + $0x1e8] sm:$0xff] }
 0x7d4   : > { %3713 = vmatprep.subr.bf16.mxu0 %v3930_v3 }
 0x7d7   : > { %3715 = vmatpush3.bf16.msra.mxu0 %v3714_v33  ;;  %v2777_v33 = vld [vmem:[%s4950_s5 + $0x1f8] sm:$0xff] }
 0x7d8   : > { %3716 = vmatprep.subr.bf16.mxu0 %v3930_v3  ;;  %v3780_v34 = vpack.c.bf16 %v2777_v33, %v2776_v32  ;;  %v2792_v32 = vld [vmem:[%s4952_s7 + $0x1f0] sm:$0xff]  ;;  %v2793_v33 = vld [vmem:[%s4952_s7 + $0x1f8] sm:$0xff] }
 0x7db   : > { %3718 = vmatpush3.bf16.msra.mxu0 %v3717_v36  ;;  %v2747_v36 = vld [vmem:[%s4948_s3 + $0x188] sm:$0xff] }
 0x7dc   : > { %3719 = vmatprep.subr.bf16.mxu0 %v3930_v3  ;;  %v3735_v37 = vpack.c.bf16 %v2747_v36, %v2746_v35  ;;  %v3865_v35 = vld [vmem:[%s4255_s0] sm:$0xff]  ;;  %s4903_s0 = scalar_lea.hbm %s4956_s11, %s2807_s14 }
 0x7df   : > { %3721 = vmatpush3.bf16.msra.mxu0 %v3720_v39 }
 0x7e0   : > { %3722 = vmatprep.subr.bf16.mxu0 %v3930_v3 }
 0x7e3   : > { %3724 = vmatpush3.bf16.msra.mxu0 %v3723_v42  ;;  %v2750_v42 = vld [vmem:[%s4948_s3 + $0x1a0] sm:$0xff] }
 0x7e4   : > { %3725 = vmatprep.subr.bf16.mxu0 %v3930_v3  ;;  %v3741_v44 = vpack.c.bf16 %v2751_v43, %v2750_v42 }
 0x7e7   : > { %3727 = vmatpush3.bf16.msra.mxu0 %v3726_v45  ;;  %v2752_v45 = vld [vmem:[%s4948_s3 + $0x1b0] sm:$0xff] }
 0x7e8   : > { %3728 = vmatprep.subr.bf16.mxu0 %v3930_v3  ;;  %v3744_v47 = vpack.c.bf16 %v2753_v46, %v2752_v45 }
 0x7eb   : > { %3730 = vmatpush3.bf16.msra.mxu0 %v3729_v48  ;;  %v2754_v48 = vld [vmem:[%s4948_s3 + $0x1c0] sm:$0xff] }
 0x7ec   : > { %3731 = vmatprep.subr.bf16.mxu0 %v3930_v3  ;;  %v3747_v52 = vpack.c.bf16 %v2755_v49, %v2754_v48 }
 0x7ef   : > { %v1586_v26 = vpop.f32.mrb[12].mxu0  ;;  %3733 = vmatpush3.bf16.msra.mxu0 %v3732_v53  ;;  %v2756_v53 = vld [vmem:[%s4948_s3 + $0x1d0] sm:$0xff] }
 0x7f0   : > { %v1587_v27 = vadd.f32 %v2737_v51, %v1586_v26  ;;  %v3312_v28 = vpop.f32.mrb[13].mxu0  ;;  %3758 = vmatprep.subr.bf16.mxu0 %v3930_v3  ;;  %v2771_v51 = vld [vmem:[%s4950_s5 + $0x1c8] sm:$0xff] }
 0x7f1   : > { %v3771_v26 = vpack.c.bf16 %v2771_v51, %v2770_v25  ;;  %v2773_v28 = vld [vmem:[%s4950_s5 + $0x1d8] sm:$0xff]  ;;  %v2786_v25 = vld [vmem:[%s4952_s7 + $0x1c0] sm:$0xff]  ;;  %v2787_v51 = vld [vmem:[%s4952_s7 + $0x1c8] sm:$0xff] }
 0x7f2   : > { %3386 = vmatmul.mubr.msk.f32.vlgmr.msra.gmra.mrb[14].mxu1 %vm699_vm1, %v1587_v27  ;;  %3381 = vmatmul.mubr.f32.vlgmr.msra.gmra.mrb[14].mxu0 %v4258_v22  ;;  %v2741_v22 = vld [vmem:[%s4953_s8 + $0x2] ss:$0 sm:$0xff]  ;;  %v2772_v27 = vld [vmem:[%s4950_s5 + $0x1d0] sm:$0xff] }
 0x7f3   : > { %3390 = vmatprep.mubr.msk.f32.mxu1 %vm3931_vm0, %v3932_v11  ;;  %3465 = vmatprep.mubr.msk.f32.mxu0 %vm3931_vm0, %v3932_v11  ;;  %v3774_v29 = vpack.c.bf16 %v2773_v28, %v2772_v27  ;;  %v2788_v27 = vld [vmem:[%s4952_s7 + $0x1d0] sm:$0xff]  ;;  %v2789_v28 = vld [vmem:[%s4952_s7 + $0x1d8] sm:$0xff] }
 0x7f4   : > { %3760 = vmatpush3.bf16.msra.mxu0 %v3759_v4 }
 0x7f5   : > { %3761 = vmatprep.subr.bf16.mxu0 %v3930_v3 }
 0x7f8   : > { %3763 = vmatpush3.bf16.msra.mxu0 %v3762_v16 }
 0x7f9   : > { %3764 = vmatprep.subr.bf16.mxu0 %v3930_v3 }
 0x7fc   : > { %3766 = vmatpush3.bf16.msra.mxu0 %v3765_v19  ;;  %v3789_v19 = vpack.c.bf16 %v2783_v18, %v2782_v17 }
 0x7fd   : > { %3767 = vmatprep.subr.bf16.mxu0 %v3930_v3 }
 0x800   : > { %3769 = vmatpush3.bf16.msra.mxu0 %v3768_v23  ;;  %v3792_v23 = vpack.c.bf16 %v2785_v21, %v2784_v20 }
 0x801   : > { %3770 = vmatprep.subr.bf16.mxu0 %v3930_v3 }
 0x804   : > { %3772 = vmatpush3.bf16.msra.mxu0 %v3771_v26  ;;  %v3795_v26 = vpack.c.bf16 %v2787_v51, %v2786_v25 }
 0x805   : > { %3773 = vmatprep.subr.bf16.mxu0 %v3930_v3 }
 0x808   : > { %3775 = vmatpush3.bf16.msra.mxu0 %v3774_v29  ;;  %v3798_v29 = vpack.c.bf16 %v2789_v28, %v2788_v27 }
 0x809   : > { %3776 = vmatprep.subr.bf16.mxu0 %v3930_v3 }
 0x80c   : > { %3778 = vmatpush3.bf16.msra.mxu0 %v3777_v31  ;;  %v3801_v31 = vpack.c.bf16 %v2791_v30, %v2790_v8 }
 0x80d   : > { %3779 = vmatprep.subr.bf16.mxu0 %v3930_v3 }
 0x810   : > { %3781 = vmatpush3.bf16.msra.mxu0 %v3780_v34  ;;  %v3804_v34 = vpack.c.bf16 %v2793_v33, %v2792_v32 }
 0x811   : > { %3503 = vmatprep.subr.mxu0 %v3932_v11 }
 0x813   : > { %3466 = vmatmul.mubr.f32.vlgmr.msra.gmra.mrb[16].mxu0 %v4172_v50  ;;  %v2749_v50 = vld [vmem:[%s4948_s3 + $0x198] sm:$0xff] }
 0x814   : > { %3505 = vmatprep.mubr.msk.f32.mxu0 %vm3931_vm0, %v3932_v11  ;;  %v3738_v41 = vpack.c.bf16 %v2749_v50, %v2748_v38 }
 0x8c5   : > { %v1818_v54 = vpop.f32.mrb[14].mxu1  ;;  %v1742_v62 = vpop.f32.mrb[14].mxu0 }
 0x8c6   : > { %v3387_v55 = vpop.f32.mrb[15].mxu1  ;;  %v1822_v56 = vsel %vm699_vm1, %v1818_v54, -inf  ;;  %v3382_v63 = vpop.f32.mrb[15].mxu0  ;;  %v1743_v0 = vadd.f32 %v2741_v22, %v1742_v62  ;;  %v3864_v62 = vld [vmem:[%s4170_s12] sm:$0xff]  ;;  %s3872_s12 = scalar_lea.vmem %s3871_s16, 256 }
 0x8c7   : > { %1823 = vmax.xlane.f32.xlu0 %v1822_v56  ;;  %v2758_v56 = vld [vmem:[%s4948_s3 + $0x1e0] sm:$0xff]  ;;  %p3874_p1 = scmp.lt.s32.totalorder %s3872_s12, %s3866_s13 }
 0x8c8   : > { %3389 = vmatpush3.msra.mxu1 %v1743_v0  ;;  %v2798_v22 = vld [vmem:[%s4951_s6 + $0x3] ss:$0 sm:$0xff] }
 0x8c9   : > { %3393 = vmatprep.subr.mxu1 %v3932_v11  ;;  %p3875_p2 = por %p3874_p1, %p3873_p0 }
 0x8cb   : > { %p3876_p3 = pnand %p3875_p2, %p3869_p13 }
 0x8e6   : > { %v2188_v63 = vpop.f32.mrb[16].mxu0 }
 0x8e7   : > { %v2189_v0 = vadd.f32 %v2798_v22, %v2188_v63  ;;  %v3467_v1 = vpop.f32.mrb[17].mxu0 }
 0x8e9   : > { %3504 = vmatpush3.xpose.msk.msra.mxu0 %vm699_vm1, %v2189_v0 }
 0x8ea   : > { %3508 = vmatprep.subr.mxu0 %v3932_v11 }
 0x954   : > { %v1824_v57 = vpop.xlane.xlu0 %1823 }
 0x955   : > { %v1825_v58 = vsub.f32 %v1818_v54, %v1824_v57  ;;  %v2757_v54 = vld [vmem:[%s4948_s3 + $0x1d8] sm:$0xff]  ;;  %v2759_v57 = vld [vmem:[%s4948_s3 + $0x1e8] sm:$0xff] }
 0x956   : > { %v3750_v55 = vpack.c.bf16 %v2757_v54, %v2756_v53  ;;  %v2794_v54 = vld [vmem:[%s4954_s9 + $0x18] sm:$0xff] }
 0x957   : > { %v1826_v59 = vmul.f32 1.442695, %v1825_v58  ;;  %v3753_v58 = vpack.c.bf16 %v2759_v57, %v2758_v56 }
 0x959   : > { %3856 = vpow2.f32 %v1826_v59  ;;  %v2760_v59 = vld [vmem:[%s4948_s3 + $0x1f0] sm:$0xff] }
 0x963   : > { %v3857_v60 = vpop.eup %3856 }
 0x964   : > { %v1828_v61 = vsel %vm699_vm1, %v3857_v60, 0.0 }
 0x965   : > { %1829 = vadd.xlane.f32.xlu1 %v1828_v61 }
 0x9f2   : > { %v1830_v5 = vpop.xlane.xlu1 %1829 }
 0x9f3   : > { %3858 = vrcp.f32 %v1830_v5 }
 0x9fd   : > { %v3859_v6 = vpop.eup %3858 }
 0x9fe   : > { %v1832_v7 = vmul.f32 %v3859_v6, %v1830_v5 }
 0xa00   : > { %v1833_v9 = vsub.f32 2.0, %v1832_v7 }
 0xa02   : > { %v1834_v10 = vmul.f32 %v3859_v6, %v1833_v9  ;;  %v2796_v6 = vld [vmem:[%s4949_s4 + $0x3] ss:$0 sm:$0xff] }
 0xa04   : > { %v1835_v12 = vmul.f32 %v3857_v60, %v1834_v10  ;;  %v2761_v60 = vld [vmem:[%s4948_s3 + $0x1f8] sm:$0xff] }
 0xa05   : > { %v3756_v61 = vpack.c.bf16 %v2761_v60, %v2760_v59 }
 0xa06   : > { %3391 = vmatmul.mubr.msk.f32.vlgmr.msra.gmra.mrb[16].mxu1 %vm699_vm1, %v1835_v12  ;;  %v2778_v12 = vld [vmem:[%s4952_s7 + $0x180] sm:$0xff] }
 0xa07   : > { %3394 = vmatpush3.msra.mxu1 %v2735_v13  ;;  %3395 = vmatprep.mubr.msk.f32.mxu1 %vm3931_vm0, %v3932_v11  ;;  %v2780_v13 = vld [vmem:[%s4952_s7 + $0x190] sm:$0xff] }
 0xa08   : > { %3734 = vmatprep.subr.bf16.mxu1 %v3930_v3  ;;  %v3786_v16 = vpack.c.bf16 %v2781_v15, %v2780_v13 }
 0xad9   : > { %v1905_v39 = vpop.f32.mrb[16].mxu1 }
 0xada   : > { %v3392_v40 = vpop.f32.mrb[17].mxu1  ;;  %3396 = vmatmul.mubr.msk.f32.vlgmr.msra.gmra.mrb[18].mxu1 %vm699_vm1, %v1905_v39 }
 0xadb   : > { %3736 = vmatpush3.bf16.msra.mxu1 %v3735_v37  ;;  %3430 = vmatprep.mubr.msk.f32.mxu1 %vm3931_vm0, %v3932_v11 }
 0xadc   : > { %3737 = vmatprep.subr.bf16.mxu1 %v3930_v3 }
 0xadf   : > { %3739 = vmatpush3.bf16.msra.mxu1 %v3738_v41 }
 0xae0   : > { %3740 = vmatprep.subr.bf16.mxu1 %v3930_v3 }
 0xae3   : > { %3742 = vmatpush3.bf16.msra.mxu1 %v3741_v44 }
 0xae4   : > { %3743 = vmatprep.subr.bf16.mxu1 %v3930_v3 }
 0xae7   : > { %3745 = vmatpush3.bf16.msra.mxu1 %v3744_v47 }
 0xae8   : > { %3746 = vmatprep.subr.bf16.mxu1 %v3930_v3 }
 0xaeb   : > { %3748 = vmatpush3.bf16.msra.mxu1 %v3747_v52 }
 0xaec   : > { %3749 = vmatprep.subr.bf16.mxu1 %v3930_v3 }
 0xaef   : > { %3751 = vmatpush3.bf16.msra.mxu1 %v3750_v55 }
 0xaf0   : > { %3752 = vmatprep.subr.bf16.mxu1 %v3930_v3 }
 0xaf3   : > { %3754 = vmatpush3.bf16.msra.mxu1 %v3753_v58  ;;  %v2805_v58 = vld [vmem:[%s4955_s10] ss:$0 sm:$0xff] }
 0xaf4   : > { %3755 = vmatprep.subr.bf16.mxu1 %v3930_v3 }
 0xaf7   : > { %3757 = vmatpush3.bf16.msra.mxu1 %v3756_v61 }
 0xaf8   : > { %3782 = vmatprep.subr.bf16.mxu1 %v3930_v3 }
 0xafa   : > { %3431 = vmatmul.mubr.f32.vlgmr.msra.gmra.mrb[20].mxu1 %v3864_v62 }
 0xafb   : > { %3500 = vmatprep.mubr.msk.f32.mxu1 %vm3931_vm0, %v3932_v11 }
 0xbad   : > { %v1978_v2 = vpop.f32.mrb[18].mxu1 }
 0xbae   : > { %v4817_v4 = vadd.f32 %v1978_v2, %v4610_v24  ;;  %v3397_v5 = vpop.f32.mrb[19].mxu1  ;;  %v2779_v24 = vld [vmem:[%s4952_s7 + $0x188] sm:$0xff] }
 0xbaf   : > { %v3783_v14 = vpack.c.bf16 %v2779_v24, %v2778_v12 }
 0xbb1   : > { %3784 = vmatpush3.bf16.msra.mxu1 %v3783_v14 }
 0xbb2   : > { %3785 = vmatprep.subr.bf16.mxu1 %v3930_v3 }
 0xbb5   : > { %3787 = vmatpush3.bf16.msra.mxu1 %v3786_v16 }
 0xbb6   : > { %3788 = vmatprep.subr.bf16.mxu1 %v3930_v3 }
 0xbb9   : > { %3790 = vmatpush3.bf16.msra.mxu1 %v3789_v19 }
 0xbba   : > { %3791 = vmatprep.subr.bf16.mxu1 %v3930_v3 }
 0xbbd   : > { %3793 = vmatpush3.bf16.msra.mxu1 %v3792_v23 }
 0xbbe   : > { %3794 = vmatprep.subr.bf16.mxu1 %v3930_v3 }
 0xbc1   : > { %3796 = vmatpush3.bf16.msra.mxu1 %v3795_v26 }
 0xbc2   : > { %3797 = vmatprep.subr.bf16.mxu1 %v3930_v3 }
 0xbc5   : > { %3799 = vmatpush3.bf16.msra.mxu1 %v3798_v29 }
 0xbc6   : > { %3800 = vmatprep.subr.bf16.mxu1 %v3930_v3 }
 0xbc9   : > { %3802 = vmatpush3.bf16.msra.mxu1 %v3801_v31 }
 0xbca   : > { %3803 = vmatprep.subr.bf16.mxu1 %v3930_v3  ;;  %v2800_v3 = vld [vmem:[%s4953_s8 + $0x3] ss:$0 sm:$0xff] }
 0xbcd   : > { %v2110_v7 = vpop.f32.mrb[20].mxu1  ;;  %3805 = vmatpush3.bf16.msra.mxu1 %v3804_v34 }
 0xbce   : > { %v2111_v9 = vadd.f32 %v2796_v6, %v2110_v7  ;;  %v3432_v10 = vpop.f32.mrb[21].mxu1 }
 0xbd0   : > { %3506 = vmatmul.mubr.msk.f32.vlgmr.msra.gmra.mrb[18].mxu0 %vm699_vm1, %v2111_v9  ;;  %3501 = vmatmul.mubr.f32.vlgmr.msra.gmra.mrb[22].mxu1 %v3865_v35 }
 0xbd1   : > { %3510 = vmatprep.mubr.msk.f32.mxu0 %vm3931_vm0, %v3932_v11 }
 0xca3   : > { %v2342_v36 = vpop.f32.mrb[18].mxu0  ;;  %v2266_v43 = vpop.f32.mrb[22].mxu1 }
 0xca4   : > { %v3507_v37 = vpop.f32.mrb[19].mxu0  ;;  %v2346_v38 = vsel %vm699_vm1, %v2342_v36, -inf  ;;  %v3502_v44 = vpop.f32.mrb[23].mxu1  ;;  %v2267_v45 = vadd.f32 %v2800_v3, %v2266_v43 }
 0xca5   : > { %2347 = vmax.xlane.f32.xlu0 %v2346_v38 }
 0xca6   : > { %3509 = vmatpush3.msra.mxu0 %v2267_v45 }
 0xca7   : > { %3513 = vmatprep.subr.mxu0 %v3932_v11 }
 0xd32   : > { %v2348_v50 = vpop.xlane.xlu0 %2347 }
 0xd33   : > { %v2349_v39 = vsub.f32 %v2342_v36, %v2348_v50 }
 0xd35   : > { %v2350_v40 = vmul.f32 1.442695, %v2349_v39 }
 0xd37   : > { %3860 = vpow2.f32 %v2350_v40 }
 0xd41   : > { %v3861_v41 = vpop.eup %3860 }
 0xd42   : > { %v2352_v42 = vsel %vm699_vm1, %v3861_v41, 0.0 }
 0xd43   : > { %2353 = vadd.xlane.f32.xlu1 %v2352_v42 }
 0xdd0   : > { %v2354_v46 = vpop.xlane.xlu1 %2353 }
 0xdd1   : > { %3862 = vrcp.f32 %v2354_v46 }
 0xddb   : > { %v3863_v47 = vpop.eup %3862 }
 0xddc   : > { %v2356_v48 = vmul.f32 %v3863_v47, %v2354_v46 }
 0xdde   : > { %v2357_v49 = vsub.f32 2.0, %v2356_v48 }
 0xde0   : > { %v2358_v52 = vmul.f32 %v3863_v47, %v2357_v49 }
 0xde2   : > { %v2359_v53 = vmul.f32 %v3861_v41, %v2358_v52 }
 0xde4   : > { %3511 = vmatmul.mubr.msk.f32.vlgmr.msra.gmra.mrb[20].mxu0 %vm699_vm1, %v2359_v53 }
 0xde5   : > { %3514 = vmatpush3.msra.mxu0 %v2794_v54  ;;  %3515 = vmatprep.mubr.msk.f32.mxu0 %vm3931_vm0, %v3932_v11 }
 0xeb7   : > { %v2429_v55 = vpop.f32.mrb[20].mxu0 }
 0xeb8   : > { %v3512_v56 = vpop.f32.mrb[21].mxu0  ;;  %3516 = vmatmul.mubr.msk.f32.vlgmr.msra.gmra.mrb[22].mxu0 %vm699_vm1, %v2429_v55 }
 0xf8b   : > { %v2502_v57 = vpop.f32.mrb[22].mxu0 }
 0xf8c   : > { %v2506_v59 = vadd.f32 %v2502_v57, %v4817_v4  ;;  %v3517_v60 = vpop.f32.mrb[23].mxu0 }
 0xf8e   : > { %v2514_v61 = vadd.f32 %v2805_v58, %v2506_v59 }
 0xf90   : > { %2515 = vst [vmem:[%s403_s15] sm:$0xff] %v2514_v61 }
 0xf91   : > { %3879 = shalt.err (!%p3876_p3)
}
 0xf92   : > { %s3880_s30 = scalar_lea.hbm %s4903_s0, 128  ;;  %s3884_s24 = scalar_lea.hbm %s4956_s11, 256 }
 0xf93   : > { %p3881_p4 = scmp.ne.s32.totalorder %s4903_s0, %s3880_s30  ;;  %p3885_p9 = scmp.lt.u32.totalorder %s4903_s0, %s4956_s11 }
 0xf94   : > { %p3886_p10 = scmp.lt.u32.totalorder %s3884_s24, %s3880_s30  ;;  %p3888_p12 = scmp.lt.u32.totalorder %s3880_s30, %s4903_s0 }
 0xf95   : > { %p3882_p7 = pnand %p3881_p4, %p4032_p5 }
 0xf96   : > { %p3887_p11 = por %p3886_p10, %p3885_p9 }
 0xf97   : > { %p3883_p8 = pneg %p3882_p7 }
 0xf98   : > { %p3889_p13 = por %p3888_p12, %p3887_p11 }
 0xf9a   : > { %p3890_p0 = pnand %p3889_p13, %p3883_p8 }
 0xf9c   : > { %3893 = shalt.err (!%p3890_p0)
}
 0xf9d   : > { %3806 = dma.vmem_to_hbm [thread:$0]  (%p4032_p5), %s4905_s22, 128, %s4903_s0, %s2517_s29  }
 0xf9e PF: > { %p3812_p1 = scmp.ge.s32.totalorder %s3928_s20, 2  ;;  %s2542_s13 = sand.u32 1, %s3916_s17  }
 0xf9f   : > { %s2543_s16 = scalar_lea.sflag [#allocation3], %s2542_s13 }
 0xfa0   : > { %p3809_p2 = pnand %p3812_p1, %p4036_p6 }
 0xfa2   : > { %3911 = dma.done.wait (!%p3809_p2), %s2543_s16, 128  }
 0xfa3   : > { %3913 = vsyncadd (!%p3809_p2), %s2543_s16, 4294967168  ;;  %p21_p3 = scmp.ge.s32.totalorder %s4019_s23, 4   ;;  %s4961_s17 = smov %s3920_s18 }
 0xfa4   : > { %s4962_s18 = smov %s3924_s19  ;;  %s4963_s19 = smov %s4030_s26 }
 0xfa5   : > { %s4964_s20 = smov %s4019_s23  ;;  %23 = sbr.rel (!%p21_p3) target bundleno = 5 (0x5), region = 126 }
 0xfac   :  { %2548 = vsyncpa [#allocation3], 1 }
 0xfad   :  { %2550 = vsyncpa [#allocation3 + $0x1], 1 }

// kernel: tpu_custom_call.1
= control target key start
LH: loop header
LB: loop body
LE: loop exit
PB: predicated region body
PF: predicated region fallthrough
CT: control target
= control target key end

     0   :  { %s4945_s0 = inlined_call_operand.vmem [shape: f32[16,128], index: 0, kind: input, shape index: {}]   ;;  %s4946_s1 = inlined_call_operand.vmem [shape: f32[16,128], index: 1, kind: input, shape index: {}]   ;;  %s4947_s2 = inlined_call_operand.vmem [shape: f32[16,128], index: 2, kind: input, shape index: {}]   ;;  %s4948_s3 = inlined_call_operand.vmem [shape: f32[4,128,8], index: 3, kind: input, shape index: {}]   ;;  %s4949_s4 = inlined_call_operand.vmem [shape: f32[4,1,8], index: 4, kind: input, shape index: {}]   ;;  %s4950_s5 = inlined_call_operand.vmem [shape: f32[4,128,8], index: 5, kind: input, shape index: {}]   ;;  %s4951_s6 = inlined_call_operand.vmem [shape: f32[4,1,8], index: 6, kind: input, shape index: {}]   ;;  %s4952_s7 = inlined_call_operand.vmem [shape: f32[4,128,8], index: 7, kind: input, shape index: {}]   ;;  %s4953_s8 = inlined_call_operand.vmem [shape: f32[4,1,8], index: 8, kind: input, shape index: {}]   ;;  %s4954_s9 = inlined_call_operand.vmem [shape: f32[4,8,128], index: 9, kind: input, shape index: {}]   ;;  %s4955_s10 = inlined_call_operand.vmem [shape: f32[1,128], index: 10, kind: input, shape index: {}]   ;;  %s4956_s11 = inlined_call_operand.hbm [shape: f32[16,128], index: 11, kind: output, shape index: {}]  }
   0x1   :  { %4957 = sst [smem:[#allocation5_spill]] %s4945_s0 }
   0x2   :  { %16 = vsyncpa [#allocation3], 0 }
   0x3   :  { %18 = vsyncpa [#allocation3 + $0x1], 0  ;;  %s3994_s17 = smov 0   ;;  %s3996_s18 = smov 0  }
   0x4   :  { %s3998_s19 = smov 0   ;;  %s4000_s20 = smov 0  }
   0x5 LB: > { %s4015_s21 = sadd.s32 4294967295, %s3928_s20   ;;  %s2613_s22 = sadd.s32 4294967294, %s3928_s20   ;;  %s3928_s20 = sphi %s4000_s20, %s4964_s20   ;;  %s3924_s19 = sphi %s3998_s19, %s4963_s19   ;;  %s3920_s18 = sphi %s3996_s18, %s4962_s18   ;;  %s3916_s17 = sphi %s3994_s17, %s4961_s17  }
   0x6   : > { %s4019_s23 = sadd.s32 1, %s3928_s20   ;;  %s277_s24 = sadd.s32 1, %s3924_s19 }
   0x7   : > { %s274_s25 = ssub.s32 %s3928_s20, %s4019_s23  ;;  %p287_p0 = scmp.ne.s32.totalorder %s3924_s19, %s3920_s18 }
   0x8   : > { %p275_p1 = scmp.eq.s32.totalorder %s274_s25, 0  ;;  %p288_p2 = scmp.eq.s32.totalorder %s4015_s21, 1 }
   0x9   : > { %p293_p3 = scmp.ne.s32.totalorder %s3920_s18, %s3916_s17  ;;  %p294_p4 = scmp.eq.s32.totalorder %s2613_s22, 1 }
   0xa   : > { %s4030_s26 = scalar_select %p275_p1, %s3924_s19, %s277_s24  }
   0xb   : > { %p4032_p5 = por %p288_p2, %p287_p0  ;;  %p4036_p6 = por %p294_p4, %p293_p3 }
   0xc   : > { %p2616_p7 = scmp.ge.s32.totalorder %s3928_s20, 1  ;;  %p357_p8 = scmp.lt.s32.totalorder %s3928_s20, 3 }
   0xe   : > { %p358_p9 = pnand %p2616_p7, %p357_p8 }
   0xf   : > { %v432_v0 = vld [vmem:[%s4950_s5] sm:$0xff] (!%p358_p9)  ;;  %v433_v1 = vld [vmem:[%s4950_s5 + $0x8] sm:$0xff] (!%p358_p9)  ;;  %v3930_v3 = vmov (!%p358_p9), 0.0|0.0   ;;  %v434_v6 = vld [vmem:[%s4950_s5 + $0x10] sm:$0xff] (!%p358_p9)  ;;  %vm3931_vm0 = vmmov (!%p358_p9), 0   ;;  %v3932_v11 = vmov (!%p358_p9), 0.0  }
  0x10   : > { %361 = sbr.rel (%p358_p9) target bundleno = 3998 (0xf9e), region = 64  ;;  %v416_v2 = vld [vmem:[%s4948_s3] sm:$0xff] (!%p358_p9)  ;;  %3542 = vmatprep.subr.bf16.mxu1 (!%p358_p9), %v3930_v3  ;;  %v3543_v4 = vpack.c.bf16 (!%p358_p9), %v433_v1, %v432_v0  ;;  %3518 = vmatprep.subr.bf16.mxu0 (!%p358_p9), %v3930_v3  ;;  %v417_v5 = vld [vmem:[%s4948_s3 + $0x8] sm:$0xff] (!%p358_p9)  ;;  %v435_v7 = vld [vmem:[%s4950_s5 + $0x18] sm:$0xff] (!%p358_p9)  ;;  %p404_p10 = scmp.lt.s32.totalorder (!%p358_p9), %s4015_s21, 1  ;;  %vm699_vm1 = vcmask (!%p358_p9), 64512  }
  0x11   : > { %v3519_v8 = vpack.c.bf16 (!%p358_p9), %v417_v5, %v416_v2  ;;  %v418_v9 = vld [vmem:[%s4948_s3 + $0x10] sm:$0xff] (!%p358_p9)  ;;  %v419_v10 = vld [vmem:[%s4948_s3 + $0x18] sm:$0xff] (!%p358_p9)  ;;  %3105 = vmatprep.mubr.msk.f32.mxu1 (!%p358_p9), %vm3931_vm0, %v3932_v11  ;;  %3070 = vmatprep.mubr.msk.f32.mxu0 (!%p358_p9), %vm3931_vm0, %v3932_v11  ;;  %v3546_v12 = vpack.c.bf16 (!%p358_p9), %v435_v7, %v434_v6  ;;  %v436_v14 = vld [vmem:[%s4950_s5 + $0x20] sm:$0xff] (!%p358_p9)  ;;  %s4960_s0 = sld [smem:[#allocation5_spill]] (!%p358_p9)  ;;  %s401_s30 = sand.u32 (!%p358_p9), 1, %s3920_s18  }
  0x12   : > { %3544 = vmatpush3.bf16.msra.mxu1 (!%p358_p9), %v3543_v4  ;;  %v3522_v13 = vpack.c.bf16 (!%p358_p9), %v419_v10, %v418_v9  ;;  %v437_v15 = vld [vmem:[%s4950_s5 + $0x28] sm:$0xff] (!%p358_p9)  ;;  %v420_v16 = vld [vmem:[%s4948_s3 + $0x20] sm:$0xff] (!%p358_p9)  ;;  %v438_v20 = vld [vmem:[%s4950_s5 + $0x30] sm:$0xff] (!%p358_p9)  ;;  %s2807_s14 = sshll.u32 (!%p358_p9), %s4015_s21, 7  ;;  %s2517_s29 = scalar_lea.sflag (!%p358_p9), [#allocation3], %s401_s30 }
  0x13   : > { %3520 = vmatpush3.bf16.msra.mxu0 (!%p358_p9), %v3519_v8  ;;  %3545 = vmatprep.subr.bf16.mxu1 (!%p358_p9), %v3930_v3  ;;  %v421_v17 = vld [vmem:[%s4948_s3 + $0x28] sm:$0xff] (!%p358_p9)  ;;  %v3549_v18 = vpack.c.bf16 (!%p358_p9), %v437_v15, %v436_v14  ;;  %v439_v21 = vld [vmem:[%s4950_s5 + $0x38] sm:$0xff] (!%p358_p9)  ;;  %v422_v22 = vld [vmem:[%s4948_s3 + $0x30] sm:$0xff] (!%p358_p9) }
  0x14   : > { %3521 = vmatprep.subr.bf16.mxu0 (!%p358_p9), %v3930_v3  ;;  %v3525_v19 = vpack.c.bf16 (!%p358_p9), %v421_v17, %v420_v16  ;;  %v423_v23 = vld [vmem:[%s4948_s3 + $0x38] sm:$0xff] (!%p358_p9)  ;;  %v3552_v24 = vpack.c.bf16 (!%p358_p9), %v439_v21, %v438_v20  ;;  %v440_v26 = vld [vmem:[%s4950_s5 + $0x40] sm:$0xff] (!%p358_p9)  ;;  %v441_v27 = vld [vmem:[%s4950_s5 + $0x48] sm:$0xff] (!%p358_p9) }
  0x15   : > { %v3528_v25 = vpack.c.bf16 (!%p358_p9), %v423_v23, %v422_v22  ;;  %v424_v28 = vld [vmem:[%s4948_s3 + $0x40] sm:$0xff] (!%p358_p9)  ;;  %v425_v29 = vld [vmem:[%s4948_s3 + $0x48] sm:$0xff] (!%p358_p9)  ;;  %v3555_v30 = vpack.c.bf16 (!%p358_p9), %v441_v27, %v440_v26  ;;  %v442_v32 = vld [vmem:[%s4950_s5 + $0x50] sm:$0xff] (!%p358_p9) }
  0x16   : > { %3547 = vmatpush3.bf16.msra.mxu1 (!%p358_p9), %v3546_v12  ;;  %v3531_v31 = vpack.c.bf16 (!%p358_p9), %v425_v29, %v424_v28  ;;  %v443_v33 = vld [vmem:[%s4950_s5 + $0x58] sm:$0xff] (!%p358_p9)  ;;  %v426_v34 = vld [vmem:[%s4948_s3 + $0x50] sm:$0xff] (!%p358_p9)  ;;  %v444_v38 = vld [vmem:[%s4950_s5 + $0x60] sm:$0xff] (!%p358_p9) }
  0x17   : > { %3523 = vmatpush3.bf16.msra.mxu0 %v3522_v13  ;;  %3548 = vmatprep.subr.bf16.mxu1 %v3930_v3  ;;  %v427_v35 = vld [vmem:[%s4948_s3 + $0x58] sm:$0xff]  ;;  %v3558_v36 = vpack.c.bf16 %v443_v33, %v442_v32  ;;  %v445_v39 = vld [vmem:[%s4950_s5 + $0x68] sm:$0xff]  ;;  %v428_v40 = vld [vmem:[%s4948_s3 + $0x60] sm:$0xff]  ;;  %s405_s16 = scalar_select %p404_p10, %s4015_s21, 1 }
  0x18   : > { %3524 = vmatprep.subr.bf16.mxu0 %v3930_v3  ;;  %v3534_v37 = vpack.c.bf16 %v427_v35, %v426_v34  ;;  %v429_v41 = vld [vmem:[%s4948_s3 + $0x68] sm:$0xff]  ;;  %v3561_v42 = vpack.c.bf16 %v445_v39, %v444_v38  ;;  %v446_v44 = vld [vmem:[%s4950_s5 + $0x70] sm:$0xff]  ;;  %v447_v45 = vld [vmem:[%s4950_s5 + $0x78] sm:$0xff]  ;;  %s3933_s21 = smov [#allocation2]  }
  0x19   : > { %v3537_v43 = vpack.c.bf16 %v429_v41, %v428_v40  ;;  %v430_v46 = vld [vmem:[%s4948_s3 + $0x70] sm:$0xff]  ;;  %v431_v47 = vld [vmem:[%s4948_s3 + $0x78] sm:$0xff]  ;;  %s4158_s15 = sshll.u32 %s405_s16, 3  ;;  %v3564_v48 = vpack.c.bf16 %v447_v45, %v446_v44  ;;  %v2622_v52 = vld [vmem:[%s4951_s6] ss:$0 sm:$0xff]  ;;  %s2617_s16 = sshll.u32 %s401_s30, 3 }
  0x1a   : > { %3550 = vmatpush3.bf16.msra.mxu1 %v3549_v18  ;;  %v3540_v49 = vpack.c.bf16 %v431_v47, %v430_v46  ;;  %s411_s25 = scalar_lea.vmem %s4946_s1, %s4158_s15  ;;  %s4170_s12 = scalar_lea.vmem %s4960_s0, %s4158_s15  ;;  %v2621_v53 = vld [vmem:[%s4949_s4] ss:$0 sm:$0xff]  ;;  %v449_v61 = vld [vmem:[%s4952_s7 + $0x8] sm:$0xff]  ;;  %v450_v62 = vld [vmem:[%s4952_s7 + $0x10] sm:$0xff] }
  0x1b   : > { %3526 = vmatpush3.bf16.msra.mxu0 %v3525_v19  ;;  %3551 = vmatprep.subr.bf16.mxu1 %v3930_v3  ;;  %v4172_v50 = vld [vmem:[%s411_s25] sm:$0xff]  ;;  %v451_v0 = vld [vmem:[%s4952_s7 + $0x18] sm:$0xff]  ;;  %v453_v4 = vld [vmem:[%s4952_s7 + $0x28] sm:$0xff]  ;;  %s4255_s0 = scalar_lea.vmem %s4947_s2, %s4158_s15  ;;  %s403_s15 = scalar_lea.vmem [#allocation2], %s2617_s16 }
  0x1c   : > { %3527 = vmatprep.subr.bf16.mxu0 %v3930_v3  ;;  %v4175_v51 = vld [vmem:[%s4170_s12] sm:$0xff]  ;;  %v3570_v1 = vpack.c.bf16 %v451_v0, %v450_v62  ;;  %v454_v6 = vld [vmem:[%s4952_s7 + $0x30] sm:$0xff]  ;;  %v455_v7 = vld [vmem:[%s4952_s7 + $0x38] sm:$0xff]  ;;  %s2530_s22 = sshll.u32 %s403_s15, 4  ;;  %s3870_s16 = sshll.u32 %s3933_s21, 4  ;;  %s4905_s22 = int_to_ptr.vmem [resolvable:$true] %s2530_s22  ;;  %s3871_s16 = int_to_ptr.vmem [resolvable:$false] %s3870_s16 }
  0x1d   : > { %v448_v60 = vld [vmem:[%s4952_s7] sm:$0xff]  ;;  %v3576_v8 = vpack.c.bf16 %v455_v7, %v454_v6  ;;  %v457_v10 = vld [vmem:[%s4952_s7 + $0x48] sm:$0xff]  ;;  %v458_v13 = vld [vmem:[%s4952_s7 + $0x50] sm:$0xff]  ;;  %s3866_s13 = scalar_lea.vmem %s4905_s22, 128  ;;  %p3873_p0 = scmp.lt.s32.totalorder %s4905_s22, %s3871_s16 }
  0x1e   : > { %3553 = vmatpush3.bf16.msra.mxu1 %v3552_v24  ;;  %v3567_v63 = vpack.c.bf16 %v449_v61, %v448_v60  ;;  %v452_v2 = vld [vmem:[%s4952_s7 + $0x20] sm:$0xff]  ;;  %v459_v14 = vld [vmem:[%s4952_s7 + $0x58] sm:$0xff]  ;;  %v461_v17 = vld [vmem:[%s4952_s7 + $0x68] sm:$0xff]  ;;  %p3867_p11 = scmp.ne.s32.totalorder %s4905_s22, %s3866_s13 }
  0x1f   : > { %3529 = vmatpush3.bf16.msra.mxu0 %v3528_v25  ;;  %3554 = vmatprep.subr.bf16.mxu1 %v3930_v3  ;;  %v3573_v5 = vpack.c.bf16 %v453_v4, %v452_v2  ;;  %v456_v9 = vld [vmem:[%s4952_s7 + $0x40] sm:$0xff]  ;;  %v3582_v15 = vpack.c.bf16 %v459_v14, %v458_v13  ;;  %v462_v19 = vld [vmem:[%s4952_s7 + $0x70] sm:$0xff]  ;;  %v463_v20 = vld [vmem:[%s4952_s7 + $0x78] sm:$0xff] }
  0x20   : > { %3530 = vmatprep.subr.bf16.mxu0 %v3930_v3  ;;  %v3579_v12 = vpack.c.bf16 %v457_v10, %v456_v9  ;;  %v460_v16 = vld [vmem:[%s4952_s7 + $0x60] sm:$0xff]  ;;  %v3588_v21 = vpack.c.bf16 %v463_v20, %v462_v19  ;;  %v2644_v32 = vld [vmem:[%s4950_s5 + $0x88] sm:$0xff]  ;;  %v2645_v38 = vld [vmem:[%s4950_s5 + $0x90] sm:$0xff]  ;;  %p3868_p12 = pnand %p3867_p11, %p4032_p5 }
  0x21   : > { %v3585_v18 = vpack.c.bf16 %v461_v17, %v460_v16  ;;  %v4258_v22 = vld [vmem:[%s4255_s0] sm:$0xff]  ;;  %v2646_v39 = vld [vmem:[%s4950_s5 + $0x98] sm:$0xff]  ;;  %v2649_v44 = vld [vmem:[%s4950_s5 + $0xb0] sm:$0xff] }
  0x22   : > { %3556 = vmatpush3.bf16.msra.mxu1 %v3555_v30  ;;  %v2623_v35 = vld [vmem:[%s4953_s8] ss:$0 sm:$0xff]  ;;  %v3618_v40 = vpack.c.bf16 %v2646_v39, %v2645_v38  ;;  %v2650_v45 = vld [vmem:[%s4950_s5 + $0xb8] sm:$0xff]  ;;  %v2628_v2 = vld [vmem:[%s4948_s3 + $0x88] sm:$0xff]  ;;  %p3869_p13 = pneg %p3868_p12 }
  0x23   : > { %3532 = vmatpush3.bf16.msra.mxu0 %v3531_v31  ;;  %3557 = vmatprep.subr.bf16.mxu1 %v3930_v3  ;;  %v2643_v31 = vld [vmem:[%s4950_s5 + $0x80] sm:$0xff]  ;;  %v3624_v46 = vpack.c.bf16 %v2650_v45, %v2649_v44  ;;  %v2629_v7 = vld [vmem:[%s4948_s3 + $0x90] sm:$0xff] }
  0x24   : > { %3533 = vmatprep.subr.bf16.mxu0 %v3930_v3  ;;  %v3615_v34 = vpack.c.bf16 %v2644_v32, %v2643_v31  ;;  %v2647_v41 = vld [vmem:[%s4950_s5 + $0xa0] sm:$0xff]  ;;  %v2633_v14 = vld [vmem:[%s4948_s3 + $0xb0] sm:$0xff]  ;;  %v2660_v31 = vld [vmem:[%s4952_s7 + $0x88] sm:$0xff] }
  0x25   : > { %v2651_v47 = vld [vmem:[%s4950_s5 + $0xc0] sm:$0xff]  ;;  %v2637_v20 = vld [vmem:[%s4948_s3 + $0xd0] sm:$0xff] }
  0x26   : > { %3559 = vmatpush3.bf16.msra.mxu1 %v3558_v36  ;;  %v2631_v10 = vld [vmem:[%s4948_s3 + $0xa0] sm:$0xff]  ;;  %v2665_v39 = vld [vmem:[%s4952_s7 + $0xb0] sm:$0xff] }
  0x27   : > { %3535 = vmatpush3.bf16.msra.mxu0 %v3534_v37  ;;  %3560 = vmatprep.subr.bf16.mxu1 %v3930_v3  ;;  %v2635_v17 = vld [vmem:[%s4948_s3 + $0xc0] sm:$0xff]  ;;  %v2669_v45 = vld [vmem:[%s4952_s7 + $0xd0] sm:$0xff] }
  0x28   : > { %3536 = vmatprep.subr.bf16.mxu0 %v3930_v3 }
  0x2a   : > { %3562 = vmatpush3.bf16.msra.mxu1 %v3561_v42  ;;  %v2648_v42 = vld [vmem:[%s4950_s5 + $0xa8] sm:$0xff] }
  0x2b   : > { %3538 = vmatpush3.bf16.msra.mxu0 %v3537_v43  ;;  %3563 = vmatprep.subr.bf16.mxu1 %v3930_v3  ;;  %v3621_v43 = vpack.c.bf16 %v2648_v42, %v2647_v41  ;;  %v2667_v42 = vld [vmem:[%s4952_s7 + $0xc0] sm:$0xff] }
  0x2c   : > { %3539 = vmatprep.subr.bf16.mxu0 %v3930_v3 }
  0x2e   : > { %3565 = vmatpush3.bf16.msra.mxu1 %v3564_v48  ;;  %v2652_v48 = vld [vmem:[%s4950_s5 + $0xc8] sm:$0xff] }
  0x2f   : > { %3541 = vmatpush3.bf16.msra.mxu0 %v3540_v49  ;;  %3143 = vmatprep.subr.mxu1 %v3932_v11  ;;  %v3627_v49 = vpack.c.bf16 %v2652_v48, %v2651_v47  ;;  %v2671_v48 = vld [vmem:[%s4952_s7 + $0xe0] sm:$0xff] }
  0x30   : > { %3566 = vmatprep.subr.bf16.mxu0 %v3930_v3 }
  0x31   : > { %3106 = vmatmul.mubr.f32.vlgmr.msra.gmra.mrb[0].mxu1 %v4172_v50 }
  0x32   : > { %3071 = vmatmul.mubr.f32.vlgmr.msra.gmra.mrb[0].mxu0 %v4175_v51  ;;  %3145 = vmatprep.mubr.msk.f32.mxu1 %vm3931_vm0, %v3932_v11 }
  0x33   : > { %3140 = vmatprep.mubr.msk.f32.mxu0 %vm3931_vm0, %v3932_v11  ;;  %3568 = vmatpush3.bf16.msra.mxu0 %v3567_v63 }
  0x34   : > { %3569 = vmatprep.subr.bf16.mxu0 %v3930_v3 }
  0x37   : > { %3571 = vmatpush3.bf16.msra.mxu0 %v3570_v1  ;;  %v2627_v1 = vld [vmem:[%s4948_s3 + $0x80] sm:$0xff] }
  0x38   : > { %3572 = vmatprep.subr.bf16.mxu0 %v3930_v3 }
  0x3b   : > { %3574 = vmatpush3.bf16.msra.mxu0 %v3573_v5  ;;  %v3591_v5 = vpack.c.bf16 %v2628_v2, %v2627_v1 }
  0x3c   : > { %3575 = vmatprep.subr.bf16.mxu0 %v3930_v3 }
  0x3f   : > { %3577 = vmatpush3.bf16.msra.mxu0 %v3576_v8  ;;  %v2630_v8 = vld [vmem:[%s4948_s3 + $0x98] sm:$0xff] }
  0x40   : > { %3578 = vmatprep.subr.bf16.mxu0 %v3930_v3  ;;  %v3594_v9 = vpack.c.bf16 %v2630_v8, %v2629_v7 }
  0x43   : > { %3580 = vmatpush3.bf16.msra.mxu0 %v3579_v12  ;;  %v2632_v12 = vld [vmem:[%s4948_s3 + $0xa8] sm:$0xff] }
  0x44   : > { %3581 = vmatprep.subr.bf16.mxu0 %v3930_v3  ;;  %v3597_v13 = vpack.c.bf16 %v2632_v12, %v2631_v10 }
  0x47   : > { %3583 = vmatpush3.bf16.msra.mxu0 %v3582_v15  ;;  %v2634_v15 = vld [vmem:[%s4948_s3 + $0xb8] sm:$0xff] }
  0x48   : > { %3584 = vmatprep.subr.bf16.mxu0 %v3930_v3  ;;  %v3600_v16 = vpack.c.bf16 %v2634_v15, %v2633_v14 }
  0x4b   : > { %3586 = vmatpush3.bf16.msra.mxu0 %v3585_v18  ;;  %v2636_v18 = vld [vmem:[%s4948_s3 + $0xc8] sm:$0xff] }
  0x4c   : > { %3587 = vmatprep.subr.bf16.mxu0 %v3930_v3  ;;  %v3603_v19 = vpack.c.bf16 %v2636_v18, %v2635_v17 }
  0x4f   : > { %3589 = vmatpush3.bf16.msra.mxu0 %v3588_v21  ;;  %v2638_v21 = vld [vmem:[%s4948_s3 + $0xd8] sm:$0xff] }
  0x50   : > { %3614 = vmatprep.subr.bf16.mxu0 %v3930_v3 }
  0x52   : > { %3141 = vmatmul.mubr.f32.vlgmr.msra.gmra.mrb[2].mxu0 %v4258_v22 }
  0x53   : > { %3220 = vmatprep.mubr.msk.f32.mxu0 %vm3931_vm0, %v3932_v11  ;;  %3616 = vmatpush3.bf16.msra.mxu0 %v3615_v34  ;;  %v2662_v34 = vld [vmem:[%s4952_s7 + $0x98] sm:$0xff] }
  0x54   : > { %3617 = vmatprep.subr.bf16.mxu0 %v3930_v3 }
  0x57   : > { %3619 = vmatpush3.bf16.msra.mxu0 %v3618_v40  ;;  %v2666_v40 = vld [vmem:[%s4952_s7 + $0xb8] sm:$0xff] }
  0x58   : > { %3620 = vmatprep.subr.bf16.mxu0 %v3930_v3  ;;  %v3648_v41 = vpack.c.bf16 %v2666_v40, %v2665_v39  ;;  %v2711_v39 = vld [vmem:[%s4950_s5 + $0x140] sm:$0xff]  ;;  %v2712_v40 = vld [vmem:[%s4950_s5 + $0x148] sm:$0xff] }
  0x5b   : > { %3622 = vmatpush3.bf16.msra.mxu0 %v3621_v43  ;;  %v2668_v43 = vld [vmem:[%s4952_s7 + $0xc8] sm:$0xff] }
  0x5c   : > { %3623 = vmatprep.subr.bf16.mxu0 %v3930_v3  ;;  %v3651_v44 = vpack.c.bf16 %v2668_v43, %v2667_v42  ;;  %v2713_v42 = vld [vmem:[%s4950_s5 + $0x150] sm:$0xff]  ;;  %v2714_v43 = vld [vmem:[%s4950_s5 + $0x158] sm:$0xff] }
  0x5f   : > { %3625 = vmatpush3.bf16.msra.mxu0 %v3624_v46  ;;  %v2670_v46 = vld [vmem:[%s4952_s7 + $0xd8] sm:$0xff] }
  0x60   : > { %3626 = vmatprep.subr.bf16.mxu0 %v3930_v3  ;;  %v3654_v47 = vpack.c.bf16 %v2670_v46, %v2669_v45  ;;  %v2715_v45 = vld [vmem:[%s4950_s5 + $0x160] sm:$0xff]  ;;  %v2716_v46 = vld [vmem:[%s4950_s5 + $0x168] sm:$0xff] }
  0x63   : > { %3628 = vmatpush3.bf16.msra.mxu0 %v3627_v49  ;;  %v2672_v49 = vld [vmem:[%s4952_s7 + $0xe8] sm:$0xff] }
  0x64   : > { %3629 = vmatprep.subr.bf16.mxu0 %v3930_v3 }
 0x104   : > { %v617_v54 = vpop.f32.mrb[0].mxu1 }
 0x105   : > { %v618_v55 = vadd.f32 %v2622_v52, %v617_v54  ;;  %v3107_v56 = vpop.f32.mrb[1].mxu1  ;;  %v539_v57 = vpop.f32.mrb[0].mxu0  ;;  %v2653_v52 = vld [vmem:[%s4950_s5 + $0xd0] sm:$0xff] }
 0x106   : > { %v540_v58 = vadd.f32 %v2621_v53, %v539_v57  ;;  %v3072_v59 = vpop.f32.mrb[1].mxu0  ;;  %v2654_v53 = vld [vmem:[%s4950_s5 + $0xd8] sm:$0xff]  ;;  %v2656_v56 = vld [vmem:[%s4950_s5 + $0xe8] sm:$0xff] }
 0x107   : > { %3144 = vmatpush3.xpose.msk.msra.mxu1 %vm699_vm1, %v618_v55  ;;  %v3630_v54 = vpack.c.bf16 %v2654_v53, %v2653_v52  ;;  %v2655_v55 = vld [vmem:[%s4950_s5 + $0xe0] sm:$0xff]  ;;  %v2658_v59 = vld [vmem:[%s4950_s5 + $0xf8] sm:$0xff]  ;;  %v3657_v52 = vpack.c.bf16 %v2672_v49, %v2671_v48  ;;  %v2673_v53 = vld [vmem:[%s4952_s7 + $0xf0] sm:$0xff] }
 0x108   : > { %3148 = vmatprep.subr.mxu1 %v3932_v11  ;;  %v3633_v57 = vpack.c.bf16 %v2656_v56, %v2655_v55  ;;  %v464_v56 = vld [vmem:[%s4954_s9] sm:$0xff]  ;;  %v2717_v48 = vld [vmem:[%s4950_s5 + $0x170] sm:$0xff]  ;;  %v2718_v49 = vld [vmem:[%s4950_s5 + $0x178] sm:$0xff] }
 0x109   : > { %3631 = vmatpush3.bf16.msra.mxu0 %v3630_v54  ;;  %v2674_v54 = vld [vmem:[%s4952_s7 + $0xf8] sm:$0xff] }
 0x10a   : > { %3146 = vmatmul.mubr.msk.f32.vlgmr.msra.gmra.mrb[2].mxu1 %vm699_vm1, %v540_v58  ;;  %3632 = vmatprep.subr.bf16.mxu0 %v3930_v3  ;;  %v2657_v58 = vld [vmem:[%s4950_s5 + $0xf0] sm:$0xff]  ;;  %v3660_v55 = vpack.c.bf16 %v2674_v54, %v2673_v53  ;;  %v2687_v53 = vld [vmem:[%s4948_s3 + $0x100] sm:$0xff]  ;;  %v2688_v54 = vld [vmem:[%s4948_s3 + $0x108] sm:$0xff] }
 0x10b   : > { %3150 = vmatprep.mubr.msk.f32.mxu1 %vm3931_vm0, %v3932_v11  ;;  %v3636_v60 = vpack.c.bf16 %v2658_v59, %v2657_v58 }
 0x10d   : > { %3634 = vmatpush3.bf16.msra.mxu0 %v3633_v57  ;;  %v2679_v57 = vld [vmem:[%s4951_s6 + $0x1] ss:$0 sm:$0xff] }
 0x10e   : > { %3635 = vmatprep.subr.bf16.mxu0 %v3930_v3 }
 0x111   : > { %3637 = vmatpush3.bf16.msra.mxu0 %v3636_v60 }
 0x112   : > { %3258 = vmatprep.subr.mxu0 %v3932_v11 }
 0x114   : > { %3221 = vmatmul.mubr.f32.vlgmr.msra.gmra.mrb[4].mxu0 %v4172_v50 }
 0x115   : > { %3260 = vmatprep.mubr.msk.f32.mxu0 %vm3931_vm0, %v3932_v11 }
 0x125   : > { %v695_v33 = vpop.f32.mrb[2].mxu0 }
 0x126   : > { %v3142_v36 = vpop.f32.mrb[3].mxu0  ;;  %v696_v37 = vadd.f32 %v2623_v35, %v695_v33  ;;  %v2661_v33 = vld [vmem:[%s4952_s7 + $0x90] sm:$0xff] }
 0x127   : > { %v3642_v35 = vpack.c.bf16 %v2662_v34, %v2661_v33  ;;  %v2663_v36 = vld [vmem:[%s4952_s7 + $0xa0] sm:$0xff]  ;;  %v2708_v34 = vld [vmem:[%s4950_s5 + $0x128] sm:$0xff] }
 0x128   : > { %3149 = vmatpush3.msra.mxu1 %v696_v37  ;;  %v2664_v37 = vld [vmem:[%s4952_s7 + $0xa8] sm:$0xff]  ;;  %v2707_v33 = vld [vmem:[%s4950_s5 + $0x120] sm:$0xff] }
 0x129   : > { %3590 = vmatprep.subr.bf16.mxu1 %v3930_v3  ;;  %v3645_v38 = vpack.c.bf16 %v2664_v37, %v2663_v36  ;;  %v2709_v36 = vld [vmem:[%s4950_s5 + $0x130] sm:$0xff]  ;;  %v2710_v37 = vld [vmem:[%s4950_s5 + $0x138] sm:$0xff] }
 0x1dd   : > { %v772_v23 = vpop.f32.mrb[2].mxu1 }
 0x1de   : > { %v3147_v24 = vpop.f32.mrb[3].mxu1  ;;  %v776_v25 = vsel %vm699_vm1, %v772_v23, -inf }
 0x1df   : > { %777 = vmax.xlane.f32.xlu0 %v776_v25  ;;  %v2639_v24 = vld [vmem:[%s4948_s3 + $0xe0] sm:$0xff]  ;;  %v2640_v25 = vld [vmem:[%s4948_s3 + $0xe8] sm:$0xff] }
 0x1e7   : > { %v1068_v58 = vpop.f32.mrb[4].mxu0 }
 0x1e8   : > { %v1069_v59 = vadd.f32 %v2679_v57, %v1068_v58  ;;  %v3222_v60 = vpop.f32.mrb[5].mxu0  ;;  %v2690_v57 = vld [vmem:[%s4948_s3 + $0x118] sm:$0xff] }
 0x1ea   : > { %3259 = vmatpush3.xpose.msk.msra.mxu0 %vm699_vm1, %v1069_v59 }
 0x1eb   : > { %3263 = vmatprep.subr.mxu0 %v3932_v11 }
 0x26c   : > { %v778_v26 = vpop.xlane.xlu0 %777 }
 0x26d   : > { %v779_v27 = vsub.f32 %v772_v23, %v778_v26  ;;  %v3606_v23 = vpack.c.bf16 %v2638_v21, %v2637_v20  ;;  %v3609_v26 = vpack.c.bf16 %v2640_v25, %v2639_v24  ;;  %v2704_v20 = vld [vmem:[%s4950_s5 + $0x108] sm:$0xff] }
 0x26f   : > { %v780_v28 = vmul.f32 1.442695, %v779_v27  ;;  %v2641_v27 = vld [vmem:[%s4948_s3 + $0xf0] sm:$0xff] }
 0x271   : > { %3848 = vpow2.f32 %v780_v28  ;;  %v2642_v28 = vld [vmem:[%s4948_s3 + $0xf8] sm:$0xff] }
 0x27b   : > { %v3849_v29 = vpop.eup %3848 }
 0x27c   : > { %v782_v30 = vsel %vm699_vm1, %v3849_v29, 0.0 }
 0x27d   : > { %783 = vadd.xlane.f32.xlu0 %v782_v30  ;;  %v2659_v30 = vld [vmem:[%s4952_s7 + $0x80] sm:$0xff] }
 0x27e   : > { %v3639_v32 = vpack.c.bf16 %v2660_v31, %v2659_v30  ;;  %v2705_v30 = vld [vmem:[%s4950_s5 + $0x110] sm:$0xff]  ;;  %v2706_v31 = vld [vmem:[%s4950_s5 + $0x118] sm:$0xff] }
 0x30a   : > { %v784_v61 = vpop.xlane.xlu0 %783 }
 0x30b   : > { %3850 = vrcp.f32 %v784_v61 }
 0x315   : > { %v3851_v62 = vpop.eup %3850 }
 0x316   : > { %v786_v63 = vmul.f32 %v3851_v62, %v784_v61 }
 0x318   : > { %v787_v0 = vsub.f32 2.0, %v786_v63  ;;  %v2677_v63 = vld [vmem:[%s4949_s4 + $0x1] ss:$0 sm:$0xff] }
 0x31a   : > { %v788_v4 = vmul.f32 %v3851_v62, %v787_v0 }
 0x31c   : > { %v789_v6 = vmul.f32 %v3849_v29, %v788_v4  ;;  %v3612_v29 = vpack.c.bf16 %v2642_v28, %v2641_v27  ;;  %v2681_v4 = vld [vmem:[%s4953_s8 + $0x1] ss:$0 sm:$0xff] }
 0x31e   : > { %3151 = vmatmul.mubr.msk.f32.vlgmr.msra.gmra.mrb[4].mxu1 %vm699_vm1, %v789_v6 }
 0x31f   : > { %3592 = vmatpush3.bf16.msra.mxu1 %v3591_v5  ;;  %3185 = vmatprep.mubr.msk.f32.mxu1 %vm3931_vm0, %v3932_v11 }
 0x320   : > { %3593 = vmatprep.subr.bf16.mxu1 %v3930_v3 }
 0x323   : > { %3595 = vmatpush3.bf16.msra.mxu1 %v3594_v9 }
 0x324   : > { %3596 = vmatprep.subr.bf16.mxu1 %v3930_v3 }
 0x327   : > { %3598 = vmatpush3.bf16.msra.mxu1 %v3597_v13 }
 0x328   : > { %3599 = vmatprep.subr.bf16.mxu1 %v3930_v3 }
 0x32b   : > { %3601 = vmatpush3.bf16.msra.mxu1 %v3600_v16 }
 0x32c   : > { %3602 = vmatprep.subr.bf16.mxu1 %v3930_v3 }
 0x32f   : > { %3604 = vmatpush3.bf16.msra.mxu1 %v3603_v19  ;;  %v2703_v19 = vld [vmem:[%s4950_s5 + $0x100] sm:$0xff] }
 0x330   : > { %3605 = vmatprep.subr.bf16.mxu1 %v3930_v3  ;;  %v3687_v21 = vpack.c.bf16 %v2704_v20, %v2703_v19 }
 0x333   : > { %3607 = vmatpush3.bf16.msra.mxu1 %v3606_v23 }
 0x334   : > { %3608 = vmatprep.subr.bf16.mxu1 %v3930_v3 }
 0x337   : > { %3610 = vmatpush3.bf16.msra.mxu1 %v3609_v26 }
 0x338   : > { %3611 = vmatprep.subr.bf16.mxu1 %v3930_v3 }
 0x33b   : > { %3613 = vmatpush3.bf16.msra.mxu1 %v3612_v29  ;;  %v2675_v29 = vld [vmem:[%s4954_s9 + $0x8] sm:$0xff] }
 0x33c   : > { %3638 = vmatprep.subr.bf16.mxu1 %v3930_v3 }
 0x33e   : > { %3186 = vmatmul.mubr.f32.vlgmr.msra.gmra.mrb[6].mxu1 %v4175_v51 }
 0x33f   : > { %3640 = vmatpush3.bf16.msra.mxu1 %v3639_v32  ;;  %3255 = vmatprep.mubr.msk.f32.mxu1 %vm3931_vm0, %v3932_v11  ;;  %v3690_v32 = vpack.c.bf16 %v2706_v31, %v2705_v30  ;;  %v2721_v30 = vld [vmem:[%s4952_s7 + $0x110] sm:$0xff] }
 0x340   : > { %3641 = vmatprep.subr.bf16.mxu1 %v3930_v3 }
 0x343   : > { %3643 = vmatpush3.bf16.msra.mxu1 %v3642_v35  ;;  %v3693_v35 = vpack.c.bf16 %v2708_v34, %v2707_v33  ;;  %v2723_v34 = vld [vmem:[%s4952_s7 + $0x120] sm:$0xff] }
 0x344   : > { %3644 = vmatprep.subr.bf16.mxu1 %v3930_v3 }
 0x347   : > { %3646 = vmatpush3.bf16.msra.mxu1 %v3645_v38  ;;  %v3696_v38 = vpack.c.bf16 %v2710_v37, %v2709_v36  ;;  %v2725_v37 = vld [vmem:[%s4952_s7 + $0x130] sm:$0xff] }
 0x348   : > { %3647 = vmatprep.subr.bf16.mxu1 %v3930_v3 }
 0x34b   : > { %3649 = vmatpush3.bf16.msra.mxu1 %v3648_v41  ;;  %v3699_v41 = vpack.c.bf16 %v2712_v40, %v2711_v39  ;;  %v2727_v40 = vld [vmem:[%s4952_s7 + $0x140] sm:$0xff] }
 0x34c   : > { %3650 = vmatprep.subr.bf16.mxu1 %v3930_v3 }
 0x34f   : > { %3652 = vmatpush3.bf16.msra.mxu1 %v3651_v44  ;;  %v3702_v44 = vpack.c.bf16 %v2714_v43, %v2713_v42  ;;  %v2729_v43 = vld [vmem:[%s4952_s7 + $0x150] sm:$0xff] }
 0x350   : > { %3653 = vmatprep.subr.bf16.mxu1 %v3930_v3 }
 0x353   : > { %3655 = vmatpush3.bf16.msra.mxu1 %v3654_v47  ;;  %v3705_v47 = vpack.c.bf16 %v2716_v46, %v2715_v45  ;;  %v2731_v46 = vld [vmem:[%s4952_s7 + $0x160] sm:$0xff] }
 0x354   : > { %3656 = vmatprep.subr.bf16.mxu1 %v3930_v3 }
 0x357   : > { %3658 = vmatpush3.bf16.msra.mxu1 %v3657_v52  ;;  %v3708_v52 = vpack.c.bf16 %v2718_v49, %v2717_v48  ;;  %v2733_v49 = vld [vmem:[%s4952_s7 + $0x170] sm:$0xff] }
 0x358   : > { %3659 = vmatprep.subr.bf16.mxu1 %v3930_v3 }
 0x35b   : > { %3661 = vmatpush3.bf16.msra.mxu1 %v3660_v55  ;;  %v3663_v55 = vpack.c.bf16 %v2688_v54, %v2687_v53 }
 0x35c   : > { %3273 = vmatprep.subr.mxu1 %v3932_v11 }
 0x35e   : > { %3256 = vmatmul.mubr.f32.vlgmr.msra.gmra.mrb[8].mxu1 %v4258_v22 }
 0x35f   : > { %3275 = vmatprep.mubr.msk.f32.mxu1 %vm3931_vm0, %v3932_v11  ;;  %3274 = vmatpush3.msra.mxu1 %v464_v56  ;;  %v2689_v56 = vld [vmem:[%s4948_s3 + $0x110] sm:$0xff] }
 0x360   : > { %3686 = vmatprep.subr.bf16.mxu1 %v3930_v3  ;;  %v3666_v60 = vpack.c.bf16 %v2690_v57, %v2689_v56 }
 0x3f1   : > { %v859_v61 = vpop.f32.mrb[4].mxu1 }
 0x3f2   : > { %v3152_v62 = vpop.f32.mrb[5].mxu1  ;;  %3276 = vmatmul.mubr.msk.f32.vlgmr.msra.gmra.mrb[10].mxu1 %vm699_vm1, %v859_v61  ;;  %v2691_v61 = vld [vmem:[%s4948_s3 + $0x120] sm:$0xff] }
 0x3f3   : > { %3345 = vmatprep.mubr.msk.f32.mxu1 %vm3931_vm0, %v3932_v11  ;;  %3688 = vmatpush3.bf16.msra.mxu1 %v3687_v21  ;;  %v2692_v62 = vld [vmem:[%s4948_s3 + $0x128] sm:$0xff] }
 0x3f4   : > { %3689 = vmatprep.subr.bf16.mxu1 %v3930_v3 }
 0x3f7   : > { %3691 = vmatpush3.bf16.msra.mxu1 %v3690_v32  ;;  %v2722_v32 = vld [vmem:[%s4952_s7 + $0x118] sm:$0xff] }
 0x3f8   : > { %3692 = vmatprep.subr.bf16.mxu1 %v3930_v3  ;;  %v3714_v33 = vpack.c.bf16 %v2722_v32, %v2721_v30  ;;  %v2775_v30 = vld [vmem:[%s4950_s5 + $0x1e8] sm:$0xff]  ;;  %v2776_v32 = vld [vmem:[%s4950_s5 + $0x1f0] sm:$0xff] }
 0x3fb   : > { %3694 = vmatpush3.bf16.msra.mxu1 %v3693_v35  ;;  %v2724_v35 = vld [vmem:[%s4952_s7 + $0x128] sm:$0xff] }
 0x3fc   : > { %3695 = vmatprep.subr.bf16.mxu1 %v3930_v3  ;;  %v3717_v36 = vpack.c.bf16 %v2724_v35, %v2723_v34  ;;  %v2746_v35 = vld [vmem:[%s4948_s3 + $0x180] sm:$0xff] }
 0x3ff   : > { %3697 = vmatpush3.bf16.msra.mxu1 %v3696_v38  ;;  %v2726_v38 = vld [vmem:[%s4952_s7 + $0x138] sm:$0xff] }
 0x400   : > { %3698 = vmatprep.subr.bf16.mxu1 %v3930_v3  ;;  %v3720_v39 = vpack.c.bf16 %v2726_v38, %v2725_v37  ;;  %v2748_v38 = vld [vmem:[%s4948_s3 + $0x190] sm:$0xff] }
 0x403   : > { %3700 = vmatpush3.bf16.msra.mxu1 %v3699_v41  ;;  %v2728_v41 = vld [vmem:[%s4952_s7 + $0x148] sm:$0xff] }
 0x404   : > { %3701 = vmatprep.subr.bf16.mxu1 %v3930_v3  ;;  %v3723_v42 = vpack.c.bf16 %v2728_v41, %v2727_v40 }
 0x407   : > { %3703 = vmatpush3.bf16.msra.mxu1 %v3702_v44  ;;  %v2730_v44 = vld [vmem:[%s4952_s7 + $0x158] sm:$0xff] }
 0x408   : > { %3704 = vmatprep.subr.bf16.mxu1 %v3930_v3  ;;  %v3726_v45 = vpack.c.bf16 %v2730_v44, %v2729_v43  ;;  %v2751_v43 = vld [vmem:[%s4948_s3 + $0x1a8] sm:$0xff] }
 0x40b   : > { %3706 = vmatpush3.bf16.msra.mxu1 %v3705_v47  ;;  %v2732_v47 = vld [vmem:[%s4952_s7 + $0x168] sm:$0xff] }
 0x40c   : > { %3707 = vmatprep.subr.bf16.mxu1 %v3930_v3  ;;  %v3729_v48 = vpack.c.bf16 %v2732_v47, %v2731_v46  ;;  %v2753_v46 = vld [vmem:[%s4948_s3 + $0x1b8] sm:$0xff] }
 0x40f   : > { %3709 = vmatpush3.bf16.msra.mxu1 %v3708_v52  ;;  %v2734_v52 = vld [vmem:[%s4952_s7 + $0x178] sm:$0xff] }
 0x410   : > { %3383 = vmatprep.subr.mxu1 %v3932_v11  ;;  %v3732_v53 = vpack.c.bf16 %v2734_v52, %v2733_v49  ;;  %v2755_v49 = vld [vmem:[%s4948_s3 + $0x1c8] sm:$0xff] }
 0x411   : > { %v990_v0 = vpop.f32.mrb[6].mxu1 }
 0x412   : > { %v991_v1 = vadd.f32 %v2677_v63, %v990_v0  ;;  %v3187_v2 = vpop.f32.mrb[7].mxu1  ;;  %3346 = vmatmul.mubr.f32.vlgmr.msra.gmra.mrb[12].mxu1 %v4172_v50  ;;  %v3669_v63 = vpack.c.bf16 %v2692_v62, %v2691_v61  ;;  %v2693_v0 = vld [vmem:[%s4948_s3 + $0x130] sm:$0xff] }
 0x413   : > { %3385 = vmatprep.mubr.msk.f32.mxu1 %vm3931_vm0, %v3932_v11 }
 0x414   : > { %3261 = vmatmul.mubr.msk.f32.vlgmr.msra.gmra.mrb[6].mxu0 %vm699_vm1, %v991_v1  ;;  %v2694_v1 = vld [vmem:[%s4948_s3 + $0x138] sm:$0xff] }
 0x415   : > { %3265 = vmatprep.mubr.msk.f32.mxu0 %vm3931_vm0, %v3932_v11  ;;  %v3672_v2 = vpack.c.bf16 %v2694_v1, %v2693_v0  ;;  %v2762_v1 = vld [vmem:[%s4950_s5 + $0x180] sm:$0xff] }
 0x431   : > { %v1146_v5 = vpop.f32.mrb[8].mxu1 }
 0x432   : > { %v1147_v6 = vadd.f32 %v2681_v4, %v1146_v5  ;;  %v3257_v7 = vpop.f32.mrb[9].mxu1  ;;  %v2695_v4 = vld [vmem:[%s4948_s3 + $0x140] sm:$0xff]  ;;  %v2696_v5 = vld [vmem:[%s4948_s3 + $0x148] sm:$0xff] }
 0x433   : > { %v2697_v7 = vld [vmem:[%s4948_s3 + $0x150] sm:$0xff] }
 0x434   : > { %3264 = vmatpush3.msra.mxu0 %v1147_v6  ;;  %v3675_v6 = vpack.c.bf16 %v2696_v5, %v2695_v4 }
 0x435   : > { %3268 = vmatprep.subr.mxu0 %v3932_v11 }
 0x4c5   : > { %v4472_v8 = vpop.f32.mrb[10].mxu1 }
 0x4c6   : > { %v3277_v9 = vpop.f32.mrb[11].mxu1 }
 0x4c7   : > { %v2698_v9 = vld [vmem:[%s4948_s3 + $0x158] sm:$0xff] }
 0x4e5   : > { %v1664_v19 = vpop.f32.mrb[12].mxu1 }
 0x4e6   : > { %v3347_v21 = vpop.f32.mrb[13].mxu1 }
 0x4e7   : > { %v1222_v10 = vpop.f32.mrb[6].mxu0  ;;  %v2769_v21 = vld [vmem:[%s4950_s5 + $0x1b8] sm:$0xff] }
 0x4e8   : > { %v3262_v12 = vpop.f32.mrb[7].mxu0  ;;  %v1226_v13 = vsel %vm699_vm1, %v1222_v10, -inf }
 0x4e9   : > { %1227 = vmax.xlane.f32.xlu1 %v1226_v13  ;;  %v2699_v12 = vld [vmem:[%s4948_s3 + $0x160] sm:$0xff]  ;;  %v2700_v13 = vld [vmem:[%s4948_s3 + $0x168] sm:$0xff] }
 0x576   : > { %v1228_v14 = vpop.xlane.xlu1 %1227 }
 0x577   : > { %v1229_v15 = vsub.f32 %v1222_v10, %v1228_v14  ;;  %v3678_v10 = vpack.c.bf16 %v2698_v9, %v2697_v7  ;;  %v3681_v14 = vpack.c.bf16 %v2700_v13, %v2699_v12  ;;  %v2735_v13 = vld [vmem:[%s4954_s9 + $0x10] sm:$0xff] }
 0x579   : > { %v1230_v16 = vmul.f32 1.442695, %v1229_v15  ;;  %v2701_v15 = vld [vmem:[%s4948_s3 + $0x170] sm:$0xff] }
 0x57b   : > { %3852 = vpow2.f32 %v1230_v16  ;;  %v2702_v16 = vld [vmem:[%s4948_s3 + $0x178] sm:$0xff] }
 0x585   : > { %v3853_v17 = vpop.eup %3852 }
 0x586   : > { %v1232_v18 = vsel %vm699_vm1, %v3853_v17, 0.0 }
 0x587   : > { %1233 = vadd.xlane.f32.xlu1 %v1232_v18  ;;  %v2739_v18 = vld [vmem:[%s4951_s6 + $0x2] ss:$0 sm:$0xff] }
 0x588   : > { %v1665_v20 = vadd.f32 %v2739_v18, %v1664_v19  ;;  %v2767_v18 = vld [vmem:[%s4950_s5 + $0x1a8] sm:$0xff] }
 0x58a   : > { %3384 = vmatpush3.xpose.msk.msra.mxu1 %vm699_vm1, %v1665_v20  ;;  %v2768_v20 = vld [vmem:[%s4950_s5 + $0x1b0] sm:$0xff] }
 0x58b   : > { %3388 = vmatprep.subr.mxu1 %v3932_v11 }
 0x614   : > { %v1234_v23 = vpop.xlane.xlu1 %1233 }
 0x615   : > { %3854 = vrcp.f32 %v1234_v23 }
 0x61f   : > { %v3855_v24 = vpop.eup %3854 }
 0x620   : > { %v1236_v25 = vmul.f32 %v3855_v24, %v1234_v23 }
 0x622   : > { %v1237_v26 = vsub.f32 2.0, %v1236_v25 }
 0x624   : > { %v1238_v27 = vmul.f32 %v3855_v24, %v1237_v26 }
 0x626   : > { %v1239_v28 = vmul.f32 %v3853_v17, %v1238_v27  ;;  %v3684_v17 = vpack.c.bf16 %v2702_v16, %v2701_v15  ;;  %v2765_v15 = vld [vmem:[%s4950_s5 + $0x198] sm:$0xff] }
 0x628   : > { %3266 = vmatmul.mubr.msk.f32.vlgmr.msra.gmra.mrb[8].mxu0 %vm699_vm1, %v1239_v28 }
 0x629   : > { %3269 = vmatpush3.msra.mxu0 %v2675_v29  ;;  %3270 = vmatprep.mubr.msk.f32.mxu0 %vm3931_vm0, %v3932_v11  ;;  %v2719_v29 = vld [vmem:[%s4952_s7 + $0x100] sm:$0xff] }
 0x62a   : > { %3662 = vmatprep.subr.bf16.mxu0 %v3930_v3 }
 0x6fb   : > { %v1309_v58 = vpop.f32.mrb[8].mxu0 }
 0x6fc   : > { %v3267_v59 = vpop.f32.mrb[9].mxu0  ;;  %3271 = vmatmul.mubr.msk.f32.vlgmr.msra.gmra.mrb[10].mxu0 %vm699_vm1, %v1309_v58 }
 0x6fd   : > { %3664 = vmatpush3.bf16.msra.mxu0 %v3663_v55  ;;  %3310 = vmatprep.mubr.msk.f32.mxu0 %vm3931_vm0, %v3932_v11 }
 0x6fe   : > { %3665 = vmatprep.subr.bf16.mxu0 %v3930_v3 }
 0x701   : > { %3667 = vmatpush3.bf16.msra.mxu0 %v3666_v60 }
 0x702   : > { %3668 = vmatprep.subr.bf16.mxu0 %v3930_v3 }
 0x705   : > { %3670 = vmatpush3.bf16.msra.mxu0 %v3669_v63 }
 0x706   : > { %3671 = vmatprep.subr.bf16.mxu0 %v3930_v3 }
 0x709   : > { %3673 = vmatpush3.bf16.msra.mxu0 %v3672_v2  ;;  %v2763_v2 = vld [vmem:[%s4950_s5 + $0x188] sm:$0xff] }
 0x70a   : > { %3674 = vmatprep.subr.bf16.mxu0 %v3930_v3  ;;  %v3759_v4 = vpack.c.bf16 %v2763_v2, %v2762_v1 }
 0x70d   : > { %3676 = vmatpush3.bf16.msra.mxu0 %v3675_v6 }
 0x70e   : > { %3677 = vmatprep.subr.bf16.mxu0 %v3930_v3 }
 0x711   : > { %3679 = vmatpush3.bf16.msra.mxu0 %v3678_v10 }
 0x712   : > { %3680 = vmatprep.subr.bf16.mxu0 %v3930_v3 }
 0x715   : > { %3682 = vmatpush3.bf16.msra.mxu0 %v3681_v14  ;;  %v2764_v14 = vld [vmem:[%s4950_s5 + $0x190] sm:$0xff] }
 0x716   : > { %3683 = vmatprep.subr.bf16.mxu0 %v3930_v3  ;;  %v3762_v16 = vpack.c.bf16 %v2765_v15, %v2764_v14  ;;  %v2781_v15 = vld [vmem:[%s4952_s7 + $0x198] sm:$0xff] }
 0x719   : > { %3685 = vmatpush3.bf16.msra.mxu0 %v3684_v17  ;;  %v2766_v17 = vld [vmem:[%s4950_s5 + $0x1a0] sm:$0xff] }
 0x71a   : > { %3710 = vmatprep.subr.bf16.mxu0 %v3930_v3  ;;  %v3765_v19 = vpack.c.bf16 %v2767_v18, %v2766_v17  ;;  %v2782_v17 = vld [vmem:[%s4952_s7 + $0x1a0] sm:$0xff]  ;;  %v2783_v18 = vld [vmem:[%s4952_s7 + $0x1a8] sm:$0xff] }
 0x71c   : > { %3311 = vmatmul.mubr.f32.vlgmr.msra.gmra.mrb[12].mxu0 %v4175_v51  ;;  %v2737_v51 = vld [vmem:[%s4949_s4 + $0x2] ss:$0 sm:$0xff] }
 0x71d   : > { %3380 = vmatprep.mubr.msk.f32.mxu0 %vm3931_vm0, %v3932_v11 }
 0x7cf   : > { %v1382_v23 = vpop.f32.mrb[10].mxu0 }
 0x7d0   : > { %v4610_v24 = vadd.f32 %v4472_v8, %v1382_v23  ;;  %v3272_v25 = vpop.f32.mrb[11].mxu0  ;;  %v2720_v8 = vld [vmem:[%s4952_s7 + $0x108] sm:$0xff]  ;;  %v3768_v23 = vpack.c.bf16 %v2769_v21, %v2768_v20  ;;  %v2784_v20 = vld [vmem:[%s4952_s7 + $0x1b0] sm:$0xff]  ;;  %v2785_v21 = vld [vmem:[%s4952_s7 + $0x1b8] sm:$0xff] }
 0x7d1   : > { %v3711_v31 = vpack.c.bf16 %v2720_v8, %v2719_v29  ;;  %v2770_v25 = vld [vmem:[%s4950_s5 + $0x1c0] sm:$0xff] }
 0x7d2   : > { %v2774_v8 = vld [vmem:[%s4950_s5 + $0x1e0] sm:$0xff] }
 0x7d3   : > { %3712 = vmatpush3.bf16.msra.mxu0 %v3711_v31  ;;  %v3777_v31 = vpack.c.bf16 %v2775_v30, %v2774_v8  ;;  %v2790_v8 = vld [vmem:[%s4952_s7 + $0x1e0] sm:$0xff]  ;;  %v2791_v30 = vld [vmem:[%s4952_s7 + $0x1e8] sm:$0xff] }
 0x7d4   : > { %3713 = vmatprep.subr.bf16.mxu0 %v3930_v3 }
 0x7d7   : > { %3715 = vmatpush3.bf16.msra.mxu0 %v3714_v33  ;;  %v2777_v33 = vld [vmem:[%s4950_s5 + $0x1f8] sm:$0xff] }
 0x7d8   : > { %3716 = vmatprep.subr.bf16.mxu0 %v3930_v3  ;;  %v3780_v34 = vpack.c.bf16 %v2777_v33, %v2776_v32  ;;  %v2792_v32 = vld [vmem:[%s4952_s7 + $0x1f0] sm:$0xff]  ;;  %v2793_v33 = vld [vmem:[%s4952_s7 + $0x1f8] sm:$0xff] }
 0x7db   : > { %3718 = vmatpush3.bf16.msra.mxu0 %v3717_v36  ;;  %v2747_v36 = vld [vmem:[%s4948_s3 + $0x188] sm:$0xff] }
 0x7dc   : > { %3719 = vmatprep.subr.bf16.mxu0 %v3930_v3  ;;  %v3735_v37 = vpack.c.bf16 %v2747_v36, %v2746_v35  ;;  %v3865_v35 = vld [vmem:[%s4255_s0] sm:$0xff]  ;;  %s4903_s0 = scalar_lea.hbm %s4956_s11, %s2807_s14 }
 0x7df   : > { %3721 = vmatpush3.bf16.msra.mxu0 %v3720_v39 }
 0x7e0   : > { %3722 = vmatprep.subr.bf16.mxu0 %v3930_v3 }
 0x7e3   : > { %3724 = vmatpush3.bf16.msra.mxu0 %v3723_v42  ;;  %v2750_v42 = vld [vmem:[%s4948_s3 + $0x1a0] sm:$0xff] }
 0x7e4   : > { %3725 = vmatprep.subr.bf16.mxu0 %v3930_v3  ;;  %v3741_v44 = vpack.c.bf16 %v2751_v43, %v2750_v42 }
 0x7e7   : > { %3727 = vmatpush3.bf16.msra.mxu0 %v3726_v45  ;;  %v2752_v45 = vld [vmem:[%s4948_s3 + $0x1b0] sm:$0xff] }
 0x7e8   : > { %3728 = vmatprep.subr.bf16.mxu0 %v3930_v3  ;;  %v3744_v47 = vpack.c.bf16 %v2753_v46, %v2752_v45 }
 0x7eb   : > { %3730 = vmatpush3.bf16.msra.mxu0 %v3729_v48  ;;  %v2754_v48 = vld [vmem:[%s4948_s3 + $0x1c0] sm:$0xff] }
 0x7ec   : > { %3731 = vmatprep.subr.bf16.mxu0 %v3930_v3  ;;  %v3747_v52 = vpack.c.bf16 %v2755_v49, %v2754_v48 }
 0x7ef   : > { %v1586_v26 = vpop.f32.mrb[12].mxu0  ;;  %3733 = vmatpush3.bf16.msra.mxu0 %v3732_v53  ;;  %v2756_v53 = vld [vmem:[%s4948_s3 + $0x1d0] sm:$0xff] }
 0x7f0   : > { %v1587_v27 = vadd.f32 %v2737_v51, %v1586_v26  ;;  %v3312_v28 = vpop.f32.mrb[13].mxu0  ;;  %3758 = vmatprep.subr.bf16.mxu0 %v3930_v3  ;;  %v2771_v51 = vld [vmem:[%s4950_s5 + $0x1c8] sm:$0xff] }
 0x7f1   : > { %v3771_v26 = vpack.c.bf16 %v2771_v51, %v2770_v25  ;;  %v2773_v28 = vld [vmem:[%s4950_s5 + $0x1d8] sm:$0xff]  ;;  %v2786_v25 = vld [vmem:[%s4952_s7 + $0x1c0] sm:$0xff]  ;;  %v2787_v51 = vld [vmem:[%s4952_s7 + $0x1c8] sm:$0xff] }
 0x7f2   : > { %3386 = vmatmul.mubr.msk.f32.vlgmr.msra.gmra.mrb[14].mxu1 %vm699_vm1, %v1587_v27  ;;  %3381 = vmatmul.mubr.f32.vlgmr.msra.gmra.mrb[14].mxu0 %v4258_v22  ;;  %v2741_v22 = vld [vmem:[%s4953_s8 + $0x2] ss:$0 sm:$0xff]  ;;  %v2772_v27 = vld [vmem:[%s4950_s5 + $0x1d0] sm:$0xff] }
 0x7f3   : > { %3390 = vmatprep.mubr.msk.f32.mxu1 %vm3931_vm0, %v3932_v11  ;;  %3465 = vmatprep.mubr.msk.f32.mxu0 %vm3931_vm0, %v3932_v11  ;;  %v3774_v29 = vpack.c.bf16 %v2773_v28, %v2772_v27  ;;  %v2788_v27 = vld [vmem:[%s4952_s7 + $0x1d0] sm:$0xff]  ;;  %v2789_v28 = vld [vmem:[%s4952_s7 + $0x1d8] sm:$0xff] }
 0x7f4   : > { %3760 = vmatpush3.bf16.msra.mxu0 %v3759_v4 }
 0x7f5   : > { %3761 = vmatprep.subr.bf16.mxu0 %v3930_v3 }
 0x7f8   : > { %3763 = vmatpush3.bf16.msra.mxu0 %v3762_v16 }
 0x7f9   : > { %3764 = vmatprep.subr.bf16.mxu0 %v3930_v3 }
 0x7fc   : > { %3766 = vmatpush3.bf16.msra.mxu0 %v3765_v19  ;;  %v3789_v19 = vpack.c.bf16 %v2783_v18, %v2782_v17 }
 0x7fd   : > { %3767 = vmatprep.subr.bf16.mxu0 %v3930_v3 }
 0x800   : > { %3769 = vmatpush3.bf16.msra.mxu0 %v3768_v23  ;;  %v3792_v23 = vpack.c.bf16 %v2785_v21, %v2784_v20 }
 0x801   : > { %3770 = vmatprep.subr.bf16.mxu0 %v3930_v3 }
 0x804   : > { %3772 = vmatpush3.bf16.msra.mxu0 %v3771_v26  ;;  %v3795_v26 = vpack.c.bf16 %v2787_v51, %v2786_v25 }
 0x805   : > { %3773 = vmatprep.subr.bf16.mxu0 %v3930_v3 }
 0x808   : > { %3775 = vmatpush3.bf16.msra.mxu0 %v3774_v29  ;;  %v3798_v29 = vpack.c.bf16 %v2789_v28, %v2788_v27 }
 0x809   : > { %3776 = vmatprep.subr.bf16.mxu0 %v3930_v3 }
 0x80c   : > { %3778 = vmatpush3.bf16.msra.mxu0 %v3777_v31  ;;  %v3801_v31 = vpack.c.bf16 %v2791_v30, %v2790_v8 }
 0x80d   : > { %3779 = vmatprep.subr.bf16.mxu0 %v3930_v3 }
 0x810   : > { %3781 = vmatpush3.bf16.msra.mxu0 %v3780_v34  ;;  %v3804_v34 = vpack.c.bf16 %v2793_v33, %v2792_v32 }
 0x811   : > { %3503 = vmatprep.subr.mxu0 %v3932_v11 }
 0x813   : > { %3466 = vmatmul.mubr.f32.vlgmr.msra.gmra.mrb[16].mxu0 %v4172_v50  ;;  %v2749_v50 = vld [vmem:[%s4948_s3 + $0x198] sm:$0xff] }
 0x814   : > { %3505 = vmatprep.mubr.msk.f32.mxu0 %vm3931_vm0, %v3932_v11  ;;  %v3738_v41 = vpack.c.bf16 %v2749_v50, %v2748_v38 }
 0x8c5   : > { %v1818_v54 = vpop.f32.mrb[14].mxu1  ;;  %v1742_v62 = vpop.f32.mrb[14].mxu0 }
 0x8c6   : > { %v3387_v55 = vpop.f32.mrb[15].mxu1  ;;  %v1822_v56 = vsel %vm699_vm1, %v1818_v54, -inf  ;;  %v3382_v63 = vpop.f32.mrb[15].mxu0  ;;  %v1743_v0 = vadd.f32 %v2741_v22, %v1742_v62  ;;  %v3864_v62 = vld [vmem:[%s4170_s12] sm:$0xff]  ;;  %s3872_s12 = scalar_lea.vmem %s3871_s16, 256 }
 0x8c7   : > { %1823 = vmax.xlane.f32.xlu0 %v1822_v56  ;;  %v2758_v56 = vld [vmem:[%s4948_s3 + $0x1e0] sm:$0xff]  ;;  %p3874_p1 = scmp.lt.s32.totalorder %s3872_s12, %s3866_s13 }
 0x8c8   : > { %3389 = vmatpush3.msra.mxu1 %v1743_v0  ;;  %v2798_v22 = vld [vmem:[%s4951_s6 + $0x3] ss:$0 sm:$0xff] }
 0x8c9   : > { %3393 = vmatprep.subr.mxu1 %v3932_v11  ;;  %p3875_p2 = por %p3874_p1, %p3873_p0 }
 0x8cb   : > { %p3876_p3 = pnand %p3875_p2, %p3869_p13 }
 0x8e6   : > { %v2188_v63 = vpop.f32.mrb[16].mxu0 }
 0x8e7   : > { %v2189_v0 = vadd.f32 %v2798_v22, %v2188_v63  ;;  %v3467_v1 = vpop.f32.mrb[17].mxu0 }
 0x8e9   : > { %3504 = vmatpush3.xpose.msk.msra.mxu0 %vm699_vm1, %v2189_v0 }
 0x8ea   : > { %3508 = vmatprep.subr.mxu0 %v3932_v11 }
 0x954   : > { %v1824_v57 = vpop.xlane.xlu0 %1823 }
 0x955   : > { %v1825_v58 = vsub.f32 %v1818_v54, %v1824_v57  ;;  %v2757_v54 = vld [vmem:[%s4948_s3 + $0x1d8] sm:$0xff]  ;;  %v2759_v57 = vld [vmem:[%s4948_s3 + $0x1e8] sm:$0xff] }
 0x956   : > { %v3750_v55 = vpack.c.bf16 %v2757_v54, %v2756_v53  ;;  %v2794_v54 = vld [vmem:[%s4954_s9 + $0x18] sm:$0xff] }
 0x957   : > { %v1826_v59 = vmul.f32 1.442695, %v1825_v58  ;;  %v3753_v58 = vpack.c.bf16 %v2759_v57, %v2758_v56 }
 0x959   : > { %3856 = vpow2.f32 %v1826_v59  ;;  %v2760_v59 = vld [vmem:[%s4948_s3 + $0x1f0] sm:$0xff] }
 0x963   : > { %v3857_v60 = vpop.eup %3856 }
 0x964   : > { %v1828_v61 = vsel %vm699_vm1, %v3857_v60, 0.0 }
 0x965   : > { %1829 = vadd.xlane.f32.xlu1 %v1828_v61 }
 0x9f2   : > { %v1830_v5 = vpop.xlane.xlu1 %1829 }
 0x9f3   : > { %3858 = vrcp.f32 %v1830_v5 }
 0x9fd   : > { %v3859_v6 = vpop.eup %3858 }
 0x9fe   : > { %v1832_v7 = vmul.f32 %v3859_v6, %v1830_v5 }
 0xa00   : > { %v1833_v9 = vsub.f32 2.0, %v1832_v7 }
 0xa02   : > { %v1834_v10 = vmul.f32 %v3859_v6, %v1833_v9  ;;  %v2796_v6 = vld [vmem:[%s4949_s4 + $0x3] ss:$0 sm:$0xff] }
 0xa04   : > { %v1835_v12 = vmul.f32 %v3857_v60, %v1834_v10  ;;  %v2761_v60 = vld [vmem:[%s4948_s3 + $0x1f8] sm:$0xff] }
 0xa05   : > { %v3756_v61 = vpack.c.bf16 %v2761_v60, %v2760_v59 }
 0xa06   : > { %3391 = vmatmul.mubr.msk.f32.vlgmr.msra.gmra.mrb[16].mxu1 %vm699_vm1, %v1835_v12  ;;  %v2778_v12 = vld [vmem:[%s4952_s7 + $0x180] sm:$0xff] }
 0xa07   : > { %3394 = vmatpush3.msra.mxu1 %v2735_v13  ;;  %3395 = vmatprep.mubr.msk.f32.mxu1 %vm3931_vm0, %v3932_v11  ;;  %v2780_v13 = vld [vmem:[%s4952_s7 + $0x190] sm:$0xff] }
 0xa08   : > { %3734 = vmatprep.subr.bf16.mxu1 %v3930_v3  ;;  %v3786_v16 = vpack.c.bf16 %v2781_v15, %v2780_v13 }
 0xad9   : > { %v1905_v39 = vpop.f32.mrb[16].mxu1 }
 0xada   : > { %v3392_v40 = vpop.f32.mrb[17].mxu1  ;;  %3396 = vmatmul.mubr.msk.f32.vlgmr.msra.gmra.mrb[18].mxu1 %vm699_vm1, %v1905_v39 }
 0xadb   : > { %3736 = vmatpush3.bf16.msra.mxu1 %v3735_v37  ;;  %3430 = vmatprep.mubr.msk.f32.mxu1 %vm3931_vm0, %v3932_v11 }
 0xadc   : > { %3737 = vmatprep.subr.bf16.mxu1 %v3930_v3 }
 0xadf   : > { %3739 = vmatpush3.bf16.msra.mxu1 %v3738_v41 }
 0xae0   : > { %3740 = vmatprep.subr.bf16.mxu1 %v3930_v3 }
 0xae3   : > { %3742 = vmatpush3.bf16.msra.mxu1 %v3741_v44 }
 0xae4   : > { %3743 = vmatprep.subr.bf16.mxu1 %v3930_v3 }
 0xae7   : > { %3745 = vmatpush3.bf16.msra.mxu1 %v3744_v47 }
 0xae8   : > { %3746 = vmatprep.subr.bf16.mxu1 %v3930_v3 }
 0xaeb   : > { %3748 = vmatpush3.bf16.msra.mxu1 %v3747_v52 }
 0xaec   : > { %3749 = vmatprep.subr.bf16.mxu1 %v3930_v3 }
 0xaef   : > { %3751 = vmatpush3.bf16.msra.mxu1 %v3750_v55 }
 0xaf0   : > { %3752 = vmatprep.subr.bf16.mxu1 %v3930_v3 }
 0xaf3   : > { %3754 = vmatpush3.bf16.msra.mxu1 %v3753_v58  ;;  %v2805_v58 = vld [vmem:[%s4955_s10] ss:$0 sm:$0xff] }
 0xaf4   : > { %3755 = vmatprep.subr.bf16.mxu1 %v3930_v3 }
 0xaf7   : > { %3757 = vmatpush3.bf16.msra.mxu1 %v3756_v61 }
 0xaf8   : > { %3782 = vmatprep.subr.bf16.mxu1 %v3930_v3 }
 0xafa   : > { %3431 = vmatmul.mubr.f32.vlgmr.msra.gmra.mrb[20].mxu1 %v3864_v62 }
 0xafb   : > { %3500 = vmatprep.mubr.msk.f32.mxu1 %vm3931_vm0, %v3932_v11 }
 0xbad   : > { %v1978_v2 = vpop.f32.mrb[18].mxu1 }
 0xbae   : > { %v4817_v4 = vadd.f32 %v1978_v2, %v4610_v24  ;;  %v3397_v5 = vpop.f32.mrb[19].mxu1  ;;  %v2779_v24 = vld [vmem:[%s4952_s7 + $0x188] sm:$0xff] }
 0xbaf   : > { %v3783_v14 = vpack.c.bf16 %v2779_v24, %v2778_v12 }
 0xbb1   : > { %3784 = vmatpush3.bf16.msra.mxu1 %v3783_v14 }
 0xbb2   : > { %3785 = vmatprep.subr.bf16.mxu1 %v3930_v3 }
 0xbb5   : > { %3787 = vmatpush3.bf16.msra.mxu1 %v3786_v16 }
 0xbb6   : > { %3788 = vmatprep.subr.bf16.mxu1 %v3930_v3 }
 0xbb9   : > { %3790 = vmatpush3.bf16.msra.mxu1 %v3789_v19 }
 0xbba   : > { %3791 = vmatprep.subr.bf16.mxu1 %v3930_v3 }
 0xbbd   : > { %3793 = vmatpush3.bf16.msra.mxu1 %v3792_v23 }
 0xbbe   : > { %3794 = vmatprep.subr.bf16.mxu1 %v3930_v3 }
 0xbc1   : > { %3796 = vmatpush3.bf16.msra.mxu1 %v3795_v26 }
 0xbc2   : > { %3797 = vmatprep.subr.bf16.mxu1 %v3930_v3 }
 0xbc5   : > { %3799 = vmatpush3.bf16.msra.mxu1 %v3798_v29 }
 0xbc6   : > { %3800 = vmatprep.subr.bf16.mxu1 %v3930_v3 }
 0xbc9   : > { %3802 = vmatpush3.bf16.msra.mxu1 %v3801_v31 }
 0xbca   : > { %3803 = vmatprep.subr.bf16.mxu1 %v3930_v3  ;;  %v2800_v3 = vld [vmem:[%s4953_s8 + $0x3] ss:$0 sm:$0xff] }
 0xbcd   : > { %v2110_v7 = vpop.f32.mrb[20].mxu1  ;;  %3805 = vmatpush3.bf16.msra.mxu1 %v3804_v34 }
 0xbce   : > { %v2111_v9 = vadd.f32 %v2796_v6, %v2110_v7  ;;  %v3432_v10 = vpop.f32.mrb[21].mxu1 }
 0xbd0   : > { %3506 = vmatmul.mubr.msk.f32.vlgmr.msra.gmra.mrb[18].mxu0 %vm699_vm1, %v2111_v9  ;;  %3501 = vmatmul.mubr.f32.vlgmr.msra.gmra.mrb[22].mxu1 %v3865_v35 }
 0xbd1   : > { %3510 = vmatprep.mubr.msk.f32.mxu0 %vm3931_vm0, %v3932_v11 }
 0xca3   : > { %v2342_v36 = vpop.f32.mrb[18].mxu0  ;;  %v2266_v43 = vpop.f32.mrb[22].mxu1 }
 0xca4   : > { %v3507_v37 = vpop.f32.mrb[19].mxu0  ;;  %v2346_v38 = vsel %vm699_vm1, %v2342_v36, -inf  ;;  %v3502_v44 = vpop.f32.mrb[23].mxu1  ;;  %v2267_v45 = vadd.f32 %v2800_v3, %v2266_v43 }
 0xca5   : > { %2347 = vmax.xlane.f32.xlu0 %v2346_v38 }
 0xca6   : > { %3509 = vmatpush3.msra.mxu0 %v2267_v45 }
 0xca7   : > { %3513 = vmatprep.subr.mxu0 %v3932_v11 }
 0xd32   : > { %v2348_v50 = vpop.xlane.xlu0 %2347 }
 0xd33   : > { %v2349_v39 = vsub.f32 %v2342_v36, %v2348_v50 }
 0xd35   : > { %v2350_v40 = vmul.f32 1.442695, %v2349_v39 }
 0xd37   : > { %3860 = vpow2.f32 %v2350_v40 }
 0xd41   : > { %v3861_v41 = vpop.eup %3860 }
 0xd42   : > { %v2352_v42 = vsel %vm699_vm1, %v3861_v41, 0.0 }
 0xd43   : > { %2353 = vadd.xlane.f32.xlu1 %v2352_v42 }
 0xdd0   : > { %v2354_v46 = vpop.xlane.xlu1 %2353 }
 0xdd1   : > { %3862 = vrcp.f32 %v2354_v46 }
 0xddb   : > { %v3863_v47 = vpop.eup %3862 }
 0xddc   : > { %v2356_v48 = vmul.f32 %v3863_v47, %v2354_v46 }
 0xdde   : > { %v2357_v49 = vsub.f32 2.0, %v2356_v48 }
 0xde0   : > { %v2358_v52 = vmul.f32 %v3863_v47, %v2357_v49 }
 0xde2   : > { %v2359_v53 = vmul.f32 %v3861_v41, %v2358_v52 }
 0xde4   : > { %3511 = vmatmul.mubr.msk.f32.vlgmr.msra.gmra.mrb[20].mxu0 %vm699_vm1, %v2359_v53 }
 0xde5   : > { %3514 = vmatpush3.msra.mxu0 %v2794_v54  ;;  %3515 = vmatprep.mubr.msk.f32.mxu0 %vm3931_vm0, %v3932_v11 }
 0xeb7   : > { %v2429_v55 = vpop.f32.mrb[20].mxu0 }
 0xeb8   : > { %v3512_v56 = vpop.f32.mrb[21].mxu0  ;;  %3516 = vmatmul.mubr.msk.f32.vlgmr.msra.gmra.mrb[22].mxu0 %vm699_vm1, %v2429_v55 }
 0xf8b   : > { %v2502_v57 = vpop.f32.mrb[22].mxu0 }
 0xf8c   : > { %v2506_v59 = vadd.f32 %v2502_v57, %v4817_v4  ;;  %v3517_v60 = vpop.f32.mrb[23].mxu0 }
 0xf8e   : > { %v2514_v61 = vadd.f32 %v2805_v58, %v2506_v59 }
 0xf90   : > { %2515 = vst [vmem:[%s403_s15] sm:$0xff] %v2514_v61 }
 0xf91   : > { %3879 = shalt.err (!%p3876_p3)
}
 0xf92   : > { %s3880_s30 = scalar_lea.hbm %s4903_s0, 128  ;;  %s3884_s24 = scalar_lea.hbm %s4956_s11, 256 }
 0xf93   : > { %p3881_p4 = scmp.ne.s32.totalorder %s4903_s0, %s3880_s30  ;;  %p3885_p9 = scmp.lt.u32.totalorder %s4903_s0, %s4956_s11 }
 0xf94   : > { %p3886_p10 = scmp.lt.u32.totalorder %s3884_s24, %s3880_s30  ;;  %p3888_p12 = scmp.lt.u32.totalorder %s3880_s30, %s4903_s0 }
 0xf95   : > { %p3882_p7 = pnand %p3881_p4, %p4032_p5 }
 0xf96   : > { %p3887_p11 = por %p3886_p10, %p3885_p9 }
 0xf97   : > { %p3883_p8 = pneg %p3882_p7 }
 0xf98   : > { %p3889_p13 = por %p3888_p12, %p3887_p11 }
 0xf9a   : > { %p3890_p0 = pnand %p3889_p13, %p3883_p8 }
 0xf9c   : > { %3893 = shalt.err (!%p3890_p0)
}
 0xf9d   : > { %3806 = dma.vmem_to_hbm [thread:$0]  (%p4032_p5), %s4905_s22, 128, %s4903_s0, %s2517_s29  }
 0xf9e PF: > { %p3812_p1 = scmp.ge.s32.totalorder %s3928_s20, 2  ;;  %s2542_s13 = sand.u32 1, %s3916_s17  }
 0xf9f   : > { %s2543_s16 = scalar_lea.sflag [#allocation3], %s2542_s13 }
 0xfa0   : > { %p3809_p2 = pnand %p3812_p1, %p4036_p6 }
 0xfa2   : > { %3911 = dma.done.wait (!%p3809_p2), %s2543_s16, 128  }
 0xfa3   : > { %3913 = vsyncadd (!%p3809_p2), %s2543_s16, 4294967168  ;;  %p21_p3 = scmp.ge.s32.totalorder %s4019_s23, 4   ;;  %s4961_s17 = smov %s3920_s18 }
 0xfa4   : > { %s4962_s18 = smov %s3924_s19  ;;  %s4963_s19 = smov %s4030_s26 }
 0xfa5   : > { %s4964_s20 = smov %s4019_s23  ;;  %23 = sbr.rel (!%p21_p3) target bundleno = 5 (0x5), region = 126 }
 0xfac   :  { %2548 = vsyncpa [#allocation3], 1 }
 0xfad   :  { %2550 = vsyncpa [#allocation3 + $0x1], 1 }

</bundles_post_ra>
